<compile_context>
chip_gen: v7x
topology: tpu7x:2x2x1
jax: 0.10.0
libtpu: 0.0.40
codegen_flags: <defaults>
</compile_context>

<pallas_src>
import functools

import numpy as np
import jax
import jax.numpy as jnp
from jax.experimental import pallas as pl
from jax.experimental.pallas import tpu as pltpu


def _round_up(x, m):
    return ((x + m - 1) // m) * m


def make_pos_encoding(max_len, d_model):
    pos = np.arange(max_len)[:, None].astype(np.float64)
    i = np.arange(d_model)[None, :].astype(np.float64)
    pe = pos / 10000 ** (2 * i / d_model)
    pe[:, 0::2] = np.sin(pe[:, 0::2])
    pe[:, 1::2] = np.cos(pe[:, 1::2])
    return jnp.asarray(pe, dtype=jnp.float32)


# ----------------------------------------------------------------------------
# One fused kernel per grid step (TB sequences): embedding gather (one-hot
# matmul) -> pos-enc add -> n_enc encoder layers -> flatten -> fc -> softmax.
# ----------------------------------------------------------------------------
def fused_transformer_kernel(ids_ref, bias_ref, embed_ref, pe_ref,
                             wqkv_ref, bqkv_ref, wo_ref, bo_ref,
                             g1_ref, be1_ref, w2_ref, b2_ref, g2_ref, be2_ref,
                             fcw_ref, fcb_ref, o_ref, *,
                             n_enc, n_heads, d_head, d_model, seq_len, tb):
    f32 = jnp.float32
    D, L, TB = d_model, seq_len, tb
    R = TB * L                                   # rows processed per grid step
    inv_ld = np.float32(1.0 / (L * D))
    eps = np.float32(1e-5)

    def layer_norm(v2, g, b):
        # nn.LayerNorm([L, D]): per-sequence stats over the whole (L, D) block.
        v3 = v2.reshape(TB, L, D)                # leading-dim split only (free)
        mean = jnp.sum(jnp.sum(v3, axis=2, keepdims=True),
                       axis=1, keepdims=True) * inv_ld
        c = v3 - mean
        var = jnp.sum(jnp.sum(c * c, axis=2, keepdims=True),
                      axis=1, keepdims=True) * inv_ld
        y3 = c * jax.lax.rsqrt(var + eps) * g + b
        return y3.reshape(R, D)

    # ---- fused embedding gather: one-hot (R, V_pad) @ table (V_pad, D) on MXU.
    # Table pre-scaled by (1 + sqrt(d_model)); pos encoding pre-tiled to (R, D).
    ids = ids_ref[...]                                        # (R, 1) int32
    v_pad = embed_ref.shape[0]
    lane_v = jax.lax.broadcasted_iota(jnp.int32, (R, v_pad), 1)
    one_hot = jnp.where(lane_v == ids, f32(1.0), f32(0.0))
    x = jnp.dot(one_hot, embed_ref[...], preferred_element_type=f32) + pe_ref[...]

    attn_bias = bias_ref[...]                                 # (R, R) 0 / -1e30

    for layer in range(n_enc):                   # static unroll (n_enc small)
        # fused lane-dense QKV projection (Q scale folded in, V packed "wide")
        qkv = (jnp.dot(x, wqkv_ref[layer], preferred_element_type=f32)
               + bqkv_ref[layer])                              # (R, qkv_pad)

        mha = jnp.zeros((R, D), f32)
        for h in range(n_heads):                 # static unroll
            q = qkv[:, h * d_head:(h + 1) * d_head]
            k = qkv[:, D + h * d_head:D + (h + 1) * d_head]
            vw = qkv[:, 2 * D + h * D:2 * D + (h + 1) * D]     # head-placed V
            s = jax.lax.dot_general(q, k, (((1,), (1,)), ((), ())),
                                    preferred_element_type=f32)    # (R, R)
            s = s + attn_bias                    # block-diagonal per-sequence mask
            s = s - jnp.max(s, axis=-1, keepdims=True)
            e = jnp.exp(s)
            attn = e * pl.reciprocal(jnp.sum(e, axis=-1, keepdims=True),
                                     approx=True)
            # lands in head h's lane slice; summing heads == concat over heads
            mha = mha + jnp.dot(attn, vw, preferred_element_type=f32)
        mha = jnp.dot(mha, wo_ref[layer], preferred_element_type=f32) + bo_ref[layer]

        # residual + LayerNorm, position-wise linear + residual + LayerNorm
        y = layer_norm(mha + x, g1_ref[layer], be1_ref[layer])
        z = jnp.dot(y, w2_ref[layer], preferred_element_type=f32) + b2_ref[layer]
        x = layer_norm(z + y, g2_ref[layer], be2_ref[layer])

    # ---- flatten (the only lane-relayout in the kernel) + single fc matmul.
    xf = x.reshape(TB, L * D)                                  # (TB, 256)
    logits = jnp.dot(xf, fcw_ref[...], preferred_element_type=f32) + fcb_ref[...]
    # padded classes carry a -1e30 bias -> exp() == 0; exact normalization.
    m = jnp.max(logits, axis=-1, keepdims=True)
    e = jnp.exp(logits - m)
    o_ref[...] = e / jnp.sum(e, axis=-1, keepdims=True)


# ----------------------------------------------------------------------------
# Parameter init (deterministic, shapes per the PyTorch module's __init__).
# nn.Linear weights are stored pre-transposed as (in, out) so kernels do x @ W.
# ----------------------------------------------------------------------------
def init_params(key, vocab_size, max_seq_len, d_model, n_enc, n_heads, n_classes):
    d_head = d_model // n_heads
    qkv_w = (2 + n_heads) * d_model              # [Q | K | wide-V blocks]
    qkv_pad = _round_up(qkv_w, 128)
    c_pad = _round_up(n_classes, 128)
    v_pad = _round_up(vocab_size, 128)           # one-hot contraction dim
    inv_sqrt_dh = np.float32(1.0 / np.sqrt(d_head))
    keys = iter(jax.random.split(key, 4096))

    def linear(fan_in, fan_out):
        bound = 1.0 / np.sqrt(fan_in)
        w = jax.random.uniform(next(keys), (fan_in, fan_out), jnp.float32, -bound, bound)
        b = jax.random.uniform(next(keys), (fan_out,), jnp.float32, -bound, bound)
        return w, b

    # embedding table: fold (1 + sqrt(d_model)) from emb + pos_encoding(emb).
    embed = jax.random.normal(next(keys), (vocab_size, d_model), jnp.float32)
    embed = embed * np.float32(1.0 + np.sqrt(d_model))
    embed = jnp.pad(embed, ((0, v_pad - vocab_size), (0, 0)))
    pe = make_pos_encoding(max_seq_len, d_model)

    stacks = {k: [] for k in
              ("wqkv", "bqkv", "wo", "bo", "g1", "be1", "w2", "b2", "g2", "be2")}
    for _ in range(n_enc):
        q_cols, k_cols, v_blocks = [], [], []
        q_bias, k_bias, v_bias = [], [], []
        for h in range(n_heads):
            wq, bq = linear(d_model, d_head)
            wk, bk = linear(d_model, d_head)
            wv, bv = linear(d_model, d_head)
            q_cols.append(wq * inv_sqrt_dh)      # fold 1/sqrt(d_head) into Q
            q_bias.append(bq * inv_sqrt_dh)
            k_cols.append(wk)
            k_bias.append(bk)
            vb = jnp.zeros((d_model, d_model), jnp.float32)
            v_blocks.append(vb.at[:, h * d_head:(h + 1) * d_head].set(wv))
            vbias = jnp.zeros((d_model,), jnp.float32)
            v_bias.append(vbias.at[h * d_head:(h + 1) * d_head].set(bv))
        wqkv = jnp.concatenate(
            [jnp.concatenate(q_cols, axis=1), jnp.concatenate(k_cols, axis=1)]
            + v_blocks, axis=1)                                    # (D, qkv_w)
        bqkv = jnp.concatenate(
            [jnp.concatenate(q_bias), jnp.concatenate(k_bias)] + v_bias)
        wqkv = jnp.pad(wqkv, ((0, 0), (0, qkv_pad - qkv_w)))
        bqkv = jnp.pad(bqkv, (0, qkv_pad - qkv_w))[None, :]
        wo, bo = linear(d_model, d_model)
        w2, b2 = linear(d_model, d_model)
        stacks["wqkv"].append(wqkv)
        stacks["bqkv"].append(bqkv)
        stacks["wo"].append(wo)
        stacks["bo"].append(bo[None, :])
        stacks["g1"].append(jnp.ones((max_seq_len, d_model), jnp.float32))
        stacks["be1"].append(jnp.zeros((max_seq_len, d_model), jnp.float32))
        stacks["w2"].append(w2)
        stacks["b2"].append(b2[None, :])
        stacks["g2"].append(jnp.ones((max_seq_len, d_model), jnp.float32))
        stacks["be2"].append(jnp.zeros((max_seq_len, d_model), jnp.float32))

    fc_w, fc_b = linear(max_seq_len * d_model, n_classes)
    fcw = jnp.pad(fc_w, ((0, 0), (0, c_pad - n_classes)))          # (L*D, c_pad)
    fcb = jnp.concatenate(
        [fc_b, jnp.full((c_pad - n_classes,), -1e30, jnp.float32)])[None, :]

    params = {k: jnp.stack(v) for k, v in stacks.items()}
    params.update(embed=embed, pe=pe, fcw=fcw, fcb=fcb)

    cfg = dict(max_seq_len=max_seq_len, d_model=d_model, n_enc=n_enc,
               n_heads=n_heads, d_head=d_head, n_classes=n_classes,
               c_pad=c_pad, qkv_pad=qkv_pad, v_pad=v_pad)
    return params, cfg


# ----------------------------------------------------------------------------
# Full forward (matches Transformer.forward semantics; dropout = identity).
# ----------------------------------------------------------------------------
def make_forward(cfg, tb=8):
    L = cfg["max_seq_len"]
    D = cfg["d_model"]
    n_classes = cfg["n_classes"]
    c_pad = cfg["c_pad"]
    TB = tb
    R = TB * L

    kernel = functools.partial(
        fused_transformer_kernel, n_enc=cfg["n_enc"], n_heads=cfg["n_heads"],
        d_head=cfg["d_head"], d_model=D, seq_len=L, tb=TB)

    # Block-diagonal additive attention mask: sequence b only attends within
    # its own rows [b*L, (b+1)*L).  Precomputed on host (tiny constant).
    seq_id = np.repeat(np.arange(TB), L)
    attn_bias = jnp.asarray(
        np.where(seq_id[:, None] == seq_id[None, :], 0.0, -1e30).astype(np.float32))

    def _full(arr):
        n = arr.ndim
        return pl.BlockSpec(arr.shape, lambda b, n=n: (0,) * n)

    @jax.jit
    def forward(params, inputs, seqs_len):
        del seqs_len                       # unused, same as the PyTorch forward
        B = inputs.shape[0]
        b_pad = _round_up(B, TB)
        ids = inputs.astype(jnp.int32)
        if b_pad != B:
            ids = jnp.pad(ids, ((0, b_pad - B), (0, 0)))
        ids_col = ids.reshape(b_pad * L, 1)                    # row = b*L + l
        pe_t = jnp.tile(params["pe"], (TB, 1))                 # (R, D)

        weights = (attn_bias, params["embed"], pe_t,
                   params["wqkv"], params["bqkv"], params["wo"], params["bo"],
                   params["g1"], params["be1"], params["w2"], params["b2"],
                   params["g2"], params["be2"], params["fcw"], params["fcb"])
        in_specs = [pl.BlockSpec((R, 1), lambda b: (b, 0))]    # token ids
        in_specs += [_full(w) for w in weights]                # VMEM-resident weights
        out = pl.pallas_call(
            kernel,
            out_shape=jax.ShapeDtypeStruct((b_pad, c_pad), jnp.float32),
            grid=(b_pad // TB,),
            in_specs=in_specs,
            out_specs=pl.BlockSpec((TB, c_pad), lambda b: (b, 0)),
            compiler_params=pltpu.CompilerParams(
                dimension_semantics=("parallel",)),
        )(ids_col, *weights)
        return out[:B, :n_classes]          # drop batch + class-lane padding

    return forward


if __name__ == "__main__":
    vocab_size, max_seq_len, d_model = 100, 8, 32
    n_enc, n_heads, n_classes = 2, 4, 10
    batch = 16                              # 2 parallel grid steps of TB=8 sequences

    key = jax.random.PRNGKey(0)
    pkey, dkey = jax.random.split(key)
    params, cfg = init_params(pkey, vocab_size, max_seq_len, d_model,
                              n_enc, n_heads, n_classes)
    forward = make_forward(cfg, tb=8)

    inputs = jax.random.randint(dkey, (batch, max_seq_len), 0, vocab_size,
                                dtype=jnp.int32)
    seqs_len = jnp.full((batch,), max_seq_len, dtype=jnp.int32)

    # TODO(synk): for large vocabularies the one-hot-matmul gather should be
    # replaced by an in-kernel DMA gather; at vocab=100 the matmul is cheaper.
    out = jax.block_until_ready(forward(params, inputs, seqs_len))
    assert out.shape == (batch, n_classes)
    assert np.all(np.isfinite(np.asarray(out)))
    assert np.allclose(np.asarray(jnp.sum(out, axis=-1)), 1.0, atol=1e-5)
    print("KERNEL_OK")
</pallas_src>

<mosaic_0001>
module attributes {stable_mosaic.version = 11 : i64} {
  func.func @fused_transformer_kernel(%arg0: i32, %arg1: memref<64x1xi32, #tpu.memory_space<vmem>>, %arg2: memref<64x64xf32, #tpu.memory_space<vmem>>, %arg3: memref<128x32xf32, #tpu.memory_space<vmem>>, %arg4: memref<64x32xf32, #tpu.memory_space<vmem>>, %arg5: memref<2x32x256xf32, #tpu.memory_space<vmem>>, %arg6: memref<2x1x256xf32, #tpu.memory_space<vmem>>, %arg7: memref<2x32x32xf32, #tpu.memory_space<vmem>>, %arg8: memref<2x1x32xf32, #tpu.memory_space<vmem>>, %arg9: memref<2x8x32xf32, #tpu.memory_space<vmem>>, %arg10: memref<2x8x32xf32, #tpu.memory_space<vmem>>, %arg11: memref<2x32x32xf32, #tpu.memory_space<vmem>>, %arg12: memref<2x1x32xf32, #tpu.memory_space<vmem>>, %arg13: memref<2x8x32xf32, #tpu.memory_space<vmem>>, %arg14: memref<2x8x32xf32, #tpu.memory_space<vmem>>, %arg15: memref<256x128xf32, #tpu.memory_space<vmem>>, %arg16: memref<1x128xf32, #tpu.memory_space<vmem>>, %arg17: memref<8x128xf32, #tpu.memory_space<vmem>>) attributes {dimension_semantics = [#tpu.dimension_semantics<parallel>], iteration_bounds = array<i64: 2>, scalar_prefetch = 0 : i64, scratch_operands = 0 : i64, tpu.core_type = #tpu.core_type<tc>, window_params = [{transform_indices = @transform_0, window_bounds = array<i64: 64, 1>}, {pipeline_mode = #tpu.pipeline_mode<synchronous>, transform_indices = @transform_1, window_bounds = array<i64: 64, 64>}, {pipeline_mode = #tpu.pipeline_mode<synchronous>, transform_indices = @transform_2, window_bounds = array<i64: 128, 32>}, {pipeline_mode = #tpu.pipeline_mode<synchronous>, transform_indices = @transform_3, window_bounds = array<i64: 64, 32>}, {pipeline_mode = #tpu.pipeline_mode<synchronous>, transform_indices = @transform_4, window_bounds = array<i64: 2, 32, 256>}, {pipeline_mode = #tpu.pipeline_mode<synchronous>, transform_indices = @transform_5, window_bounds = array<i64: 2, 1, 256>}, {pipeline_mode = #tpu.pipeline_mode<synchronous>, transform_indices = @transform_6, window_bounds = array<i64: 2, 32, 32>}, {pipeline_mode = #tpu.pipeline_mode<synchronous>, transform_indices = @transform_7, window_bounds = array<i64: 2, 1, 32>}, {pipeline_mode = #tpu.pipeline_mode<synchronous>, transform_indices = @transform_8, window_bounds = array<i64: 2, 8, 32>}, {pipeline_mode = #tpu.pipeline_mode<synchronous>, transform_indices = @transform_9, window_bounds = array<i64: 2, 8, 32>}, {pipeline_mode = #tpu.pipeline_mode<synchronous>, transform_indices = @transform_10, window_bounds = array<i64: 2, 32, 32>}, {pipeline_mode = #tpu.pipeline_mode<synchronous>, transform_indices = @transform_11, window_bounds = array<i64: 2, 1, 32>}, {pipeline_mode = #tpu.pipeline_mode<synchronous>, transform_indices = @transform_12, window_bounds = array<i64: 2, 8, 32>}, {pipeline_mode = #tpu.pipeline_mode<synchronous>, transform_indices = @transform_13, window_bounds = array<i64: 2, 8, 32>}, {pipeline_mode = #tpu.pipeline_mode<synchronous>, transform_indices = @transform_14, window_bounds = array<i64: 256, 128>}, {pipeline_mode = #tpu.pipeline_mode<synchronous>, transform_indices = @transform_15, window_bounds = array<i64: 1, 128>}, {transform_indices = @transform_16, window_bounds = array<i64: 8, 128>}]} {
    %c0 = arith.constant 0 : index
    %c0_0 = arith.constant 0 : index
    %0 = vector.load %arg1[%c0, %c0_0] : memref<64x1xi32, #tpu.memory_space<vmem>>, vector<64x1xi32>
    %1 = tpu.iota {dimensions = array<i32: 1>} : vector<64x128xi32>
    %2 = vector.broadcast %0 : vector<64x1xi32> to vector<64x128xi32>
    %3 = arith.cmpi eq, %1, %2 : vector<64x128xi32>
    %cst = arith.constant 1.000000e+00 : f32
    %cst_1 = arith.constant 0.000000e+00 : f32
    %4 = vector.broadcast %cst : f32 to vector<64x128xf32>
    %5 = vector.broadcast %cst_1 : f32 to vector<64x128xf32>
    %6 = arith.select %3, %4, %5 : vector<64x128xi1>, vector<64x128xf32>
    %c0_2 = arith.constant 0 : index
    %c0_3 = arith.constant 0 : index
    %7 = vector.load %arg3[%c0_2, %c0_3] : memref<128x32xf32, #tpu.memory_space<vmem>>, vector<128x32xf32>
    %cst_4 = arith.constant dense<0.000000e+00> : vector<64x32xf32>
    %8 = tpu.matmul %6, %7, %cst_4 {dimension_numbers = #tpu.dot_dimension_numbers<[1], [0], [0], [1], [0, 0, 1, 1], [], []>} : vector<64x128xf32>, vector<128x32xf32>, vector<64x32xf32> -> vector<64x32xf32>
    %c0_5 = arith.constant 0 : index
    %c0_6 = arith.constant 0 : index
    %9 = vector.load %arg4[%c0_5, %c0_6] : memref<64x32xf32, #tpu.memory_space<vmem>>, vector<64x32xf32>
    %10 = arith.addf %8, %9 : vector<64x32xf32>
    %c0_7 = arith.constant 0 : index
    %c0_8 = arith.constant 0 : index
    %11 = vector.load %arg2[%c0_7, %c0_8] : memref<64x64xf32, #tpu.memory_space<vmem>>, vector<64x64xf32>
    %c0_9 = arith.constant 0 : index
    %c0_10 = arith.constant 0 : index
    %c0_11 = arith.constant 0 : index
    %12 = vector.load %arg5[%c0_9, %c0_10, %c0_11] : memref<2x32x256xf32, #tpu.memory_space<vmem>>, vector<1x32x256xf32>
    %13 = vector.shape_cast %12 : vector<1x32x256xf32> to vector<32x256xf32>
    %cst_12 = arith.constant dense<0.000000e+00> : vector<64x256xf32>
    %14 = tpu.matmul %10, %13, %cst_12 {dimension_numbers = #tpu.dot_dimension_numbers<[1], [0], [0], [1], [0, 0, 1, 1], [], []>} : vector<64x32xf32>, vector<32x256xf32>, vector<64x256xf32> -> vector<64x256xf32>
    %c0_13 = arith.constant 0 : index
    %c0_14 = arith.constant 0 : index
    %c0_15 = arith.constant 0 : index
    %15 = vector.load %arg6[%c0_13, %c0_14, %c0_15] : memref<2x1x256xf32, #tpu.memory_space<vmem>>, vector<1x1x256xf32>
    %16 = vector.shape_cast %15 : vector<1x1x256xf32> to vector<1x256xf32>
    %17 = vector.broadcast %16 : vector<1x256xf32> to vector<64x256xf32>
    %18 = arith.addf %14, %17 : vector<64x256xf32>
    %cst_16 = arith.constant 0.000000e+00 : f32
    %19 = vector.broadcast %cst_16 : f32 to vector<64x32xf32>
    %20 = vector.extract_strided_slice %18 {offsets = [0, 0], sizes = [64, 8], strides = [1, 1]} : vector<64x256xf32> to vector<64x8xf32>
    %21 = vector.extract_strided_slice %18 {offsets = [0, 32], sizes = [64, 8], strides = [1, 1]} : vector<64x256xf32> to vector<64x8xf32>
    %22 = vector.extract_strided_slice %18 {offsets = [0, 64], sizes = [64, 32], strides = [1, 1]} : vector<64x256xf32> to vector<64x32xf32>
    %cst_17 = arith.constant dense<0.000000e+00> : vector<64x64xf32>
    %23 = tpu.matmul %20, %21, %cst_17 {dimension_numbers = #tpu.dot_dimension_numbers<[1], [1], [0], [0], [0, 0, 1, 0], [], []>} : vector<64x8xf32>, vector<64x8xf32>, vector<64x64xf32> -> vector<64x64xf32>
    %24 = arith.addf %23, %11 : vector<64x64xf32>
    %cst_18 = arith.constant dense<0xFF800000> : vector<64xf32>
    %25 = vector.multi_reduction <maximumf>, %24, %cst_18 [1] : vector<64x64xf32> to vector<64xf32>
    %26 = vector.shape_cast %25 : vector<64xf32> to vector<64x1xf32>
    %27 = vector.broadcast %26 : vector<64x1xf32> to vector<64x64xf32>
    %28 = arith.subf %24, %27 : vector<64x64xf32>
    %29 = math.exp %28 : vector<64x64xf32>
    %cst_19 = arith.constant dense<0.000000e+00> : vector<64xf32>
    %30 = vector.multi_reduction <add>, %29, %cst_19 [1] : vector<64x64xf32> to vector<64xf32>
    %31 = vector.shape_cast %30 : vector<64xf32> to vector<64x1xf32>
    %32 = tpu.reciprocal %31 {approx = true} : vector<64x1xf32> -> vector<64x1xf32>
    %33 = vector.broadcast %32 : vector<64x1xf32> to vector<64x64xf32>
    %34 = arith.mulf %29, %33 : vector<64x64xf32>
    %cst_20 = arith.constant dense<0.000000e+00> : vector<64x32xf32>
    %35 = tpu.matmul %34, %22, %cst_20 {dimension_numbers = #tpu.dot_dimension_numbers<[1], [0], [0], [1], [0, 0, 1, 1], [], []>} : vector<64x64xf32>, vector<64x32xf32>, vector<64x32xf32> -> vector<64x32xf32>
    %36 = arith.addf %19, %35 : vector<64x32xf32>
    %37 = vector.extract_strided_slice %18 {offsets = [0, 8], sizes = [64, 8], strides = [1, 1]} : vector<64x256xf32> to vector<64x8xf32>
    %38 = vector.extract_strided_slice %18 {offsets = [0, 40], sizes = [64, 8], strides = [1, 1]} : vector<64x256xf32> to vector<64x8xf32>
    %39 = vector.extract_strided_slice %18 {offsets = [0, 96], sizes = [64, 32], strides = [1, 1]} : vector<64x256xf32> to vector<64x32xf32>
    %cst_21 = arith.constant dense<0.000000e+00> : vector<64x64xf32>
    %40 = tpu.matmul %37, %38, %cst_21 {dimension_numbers = #tpu.dot_dimension_numbers<[1], [1], [0], [0], [0, 0, 1, 0], [], []>} : vector<64x8xf32>, vector<64x8xf32>, vector<64x64xf32> -> vector<64x64xf32>
    %41 = arith.addf %40, %11 : vector<64x64xf32>
    %cst_22 = arith.constant dense<0xFF800000> : vector<64xf32>
    %42 = vector.multi_reduction <maximumf>, %41, %cst_22 [1] : vector<64x64xf32> to vector<64xf32>
    %43 = vector.shape_cast %42 : vector<64xf32> to vector<64x1xf32>
    %44 = vector.broadcast %43 : vector<64x1xf32> to vector<64x64xf32>
    %45 = arith.subf %41, %44 : vector<64x64xf32>
    %46 = math.exp %45 : vector<64x64xf32>
    %cst_23 = arith.constant dense<0.000000e+00> : vector<64xf32>
    %47 = vector.multi_reduction <add>, %46, %cst_23 [1] : vector<64x64xf32> to vector<64xf32>
    %48 = vector.shape_cast %47 : vector<64xf32> to vector<64x1xf32>
    %49 = tpu.reciprocal %48 {approx = true} : vector<64x1xf32> -> vector<64x1xf32>
    %50 = vector.broadcast %49 : vector<64x1xf32> to vector<64x64xf32>
    %51 = arith.mulf %46, %50 : vector<64x64xf32>
    %cst_24 = arith.constant dense<0.000000e+00> : vector<64x32xf32>
    %52 = tpu.matmul %51, %39, %cst_24 {dimension_numbers = #tpu.dot_dimension_numbers<[1], [0], [0], [1], [0, 0, 1, 1], [], []>} : vector<64x64xf32>, vector<64x32xf32>, vector<64x32xf32> -> vector<64x32xf32>
    %53 = arith.addf %36, %52 : vector<64x32xf32>
    %54 = vector.extract_strided_slice %18 {offsets = [0, 16], sizes = [64, 8], strides = [1, 1]} : vector<64x256xf32> to vector<64x8xf32>
    %55 = vector.extract_strided_slice %18 {offsets = [0, 48], sizes = [64, 8], strides = [1, 1]} : vector<64x256xf32> to vector<64x8xf32>
    %56 = vector.extract_strided_slice %18 {offsets = [0, 128], sizes = [64, 32], strides = [1, 1]} : vector<64x256xf32> to vector<64x32xf32>
    %cst_25 = arith.constant dense<0.000000e+00> : vector<64x64xf32>
    %57 = tpu.matmul %54, %55, %cst_25 {dimension_numbers = #tpu.dot_dimension_numbers<[1], [1], [0], [0], [0, 0, 1, 0], [], []>} : vector<64x8xf32>, vector<64x8xf32>, vector<64x64xf32> -> vector<64x64xf32>
    %58 = arith.addf %57, %11 : vector<64x64xf32>
    %cst_26 = arith.constant dense<0xFF800000> : vector<64xf32>
    %59 = vector.multi_reduction <maximumf>, %58, %cst_26 [1] : vector<64x64xf32> to vector<64xf32>
    %60 = vector.shape_cast %59 : vector<64xf32> to vector<64x1xf32>
    %61 = vector.broadcast %60 : vector<64x1xf32> to vector<64x64xf32>
    %62 = arith.subf %58, %61 : vector<64x64xf32>
    %63 = math.exp %62 : vector<64x64xf32>
    %cst_27 = arith.constant dense<0.000000e+00> : vector<64xf32>
    %64 = vector.multi_reduction <add>, %63, %cst_27 [1] : vector<64x64xf32> to vector<64xf32>
    %65 = vector.shape_cast %64 : vector<64xf32> to vector<64x1xf32>
    %66 = tpu.reciprocal %65 {approx = true} : vector<64x1xf32> -> vector<64x1xf32>
    %67 = vector.broadcast %66 : vector<64x1xf32> to vector<64x64xf32>
    %68 = arith.mulf %63, %67 : vector<64x64xf32>
    %cst_28 = arith.constant dense<0.000000e+00> : vector<64x32xf32>
    %69 = tpu.matmul %68, %56, %cst_28 {dimension_numbers = #tpu.dot_dimension_numbers<[1], [0], [0], [1], [0, 0, 1, 1], [], []>} : vector<64x64xf32>, vector<64x32xf32>, vector<64x32xf32> -> vector<64x32xf32>
    %70 = arith.addf %53, %69 : vector<64x32xf32>
    %71 = vector.extract_strided_slice %18 {offsets = [0, 24], sizes = [64, 8], strides = [1, 1]} : vector<64x256xf32> to vector<64x8xf32>
    %72 = vector.extract_strided_slice %18 {offsets = [0, 56], sizes = [64, 8], strides = [1, 1]} : vector<64x256xf32> to vector<64x8xf32>
    %73 = vector.extract_strided_slice %18 {offsets = [0, 160], sizes = [64, 32], strides = [1, 1]} : vector<64x256xf32> to vector<64x32xf32>
    %cst_29 = arith.constant dense<0.000000e+00> : vector<64x64xf32>
    %74 = tpu.matmul %71, %72, %cst_29 {dimension_numbers = #tpu.dot_dimension_numbers<[1], [1], [0], [0], [0, 0, 1, 0], [], []>} : vector<64x8xf32>, vector<64x8xf32>, vector<64x64xf32> -> vector<64x64xf32>
    %75 = arith.addf %74, %11 : vector<64x64xf32>
    %cst_30 = arith.constant dense<0xFF800000> : vector<64xf32>
    %76 = vector.multi_reduction <maximumf>, %75, %cst_30 [1] : vector<64x64xf32> to vector<64xf32>
    %77 = vector.shape_cast %76 : vector<64xf32> to vector<64x1xf32>
    %78 = vector.broadcast %77 : vector<64x1xf32> to vector<64x64xf32>
    %79 = arith.subf %75, %78 : vector<64x64xf32>
    %80 = math.exp %79 : vector<64x64xf32>
    %cst_31 = arith.constant dense<0.000000e+00> : vector<64xf32>
    %81 = vector.multi_reduction <add>, %80, %cst_31 [1] : vector<64x64xf32> to vector<64xf32>
    %82 = vector.shape_cast %81 : vector<64xf32> to vector<64x1xf32>
    %83 = tpu.reciprocal %82 {approx = true} : vector<64x1xf32> -> vector<64x1xf32>
    %84 = vector.broadcast %83 : vector<64x1xf32> to vector<64x64xf32>
    %85 = arith.mulf %80, %84 : vector<64x64xf32>
    %cst_32 = arith.constant dense<0.000000e+00> : vector<64x32xf32>
    %86 = tpu.matmul %85, %73, %cst_32 {dimension_numbers = #tpu.dot_dimension_numbers<[1], [0], [0], [1], [0, 0, 1, 1], [], []>} : vector<64x64xf32>, vector<64x32xf32>, vector<64x32xf32> -> vector<64x32xf32>
    %87 = arith.addf %70, %86 : vector<64x32xf32>
    %c0_33 = arith.constant 0 : index
    %c0_34 = arith.constant 0 : index
    %c0_35 = arith.constant 0 : index
    %88 = vector.load %arg7[%c0_33, %c0_34, %c0_35] : memref<2x32x32xf32, #tpu.memory_space<vmem>>, vector<1x32x32xf32>
    %89 = vector.shape_cast %88 : vector<1x32x32xf32> to vector<32x32xf32>
    %cst_36 = arith.constant dense<0.000000e+00> : vector<64x32xf32>
    %90 = tpu.matmul %87, %89, %cst_36 {dimension_numbers = #tpu.dot_dimension_numbers<[1], [0], [0], [1], [0, 0, 1, 1], [], []>} : vector<64x32xf32>, vector<32x32xf32>, vector<64x32xf32> -> vector<64x32xf32>
    %c0_37 = arith.constant 0 : index
    %c0_38 = arith.constant 0 : index
    %c0_39 = arith.constant 0 : index
    %91 = vector.load %arg8[%c0_37, %c0_38, %c0_39] : memref<2x1x32xf32, #tpu.memory_space<vmem>>, vector<1x1x32xf32>
    %92 = vector.shape_cast %91 : vector<1x1x32xf32> to vector<1x32xf32>
    %93 = vector.broadcast %92 : vector<1x32xf32> to vector<64x32xf32>
    %94 = arith.addf %90, %93 : vector<64x32xf32>
    %95 = arith.addf %94, %10 : vector<64x32xf32>
    %c0_40 = arith.constant 0 : index
    %c0_41 = arith.constant 0 : index
    %c0_42 = arith.constant 0 : index
    %96 = vector.load %arg9[%c0_40, %c0_41, %c0_42] : memref<2x8x32xf32, #tpu.memory_space<vmem>>, vector<1x8x32xf32>
    %97 = vector.shape_cast %96 : vector<1x8x32xf32> to vector<8x32xf32>
    %c0_43 = arith.constant 0 : index
    %c0_44 = arith.constant 0 : index
    %c0_45 = arith.constant 0 : index
    %98 = vector.load %arg10[%c0_43, %c0_44, %c0_45] : memref<2x8x32xf32, #tpu.memory_space<vmem>>, vector<1x8x32xf32>
    %99 = vector.shape_cast %98 : vector<1x8x32xf32> to vector<8x32xf32>
    %100 = vector.shape_cast %95 : vector<64x32xf32> to vector<8x8x32xf32>
    %cst_46 = arith.constant dense<0.000000e+00> : vector<8x8xf32>
    %101 = vector.multi_reduction <add>, %100, %cst_46 [2] : vector<8x8x32xf32> to vector<8x8xf32>
    %102 = vector.shape_cast %101 : vector<8x8xf32> to vector<8x8x1xf32>
    %cst_47 = arith.constant dense<0.000000e+00> : vector<8x1xf32>
    %103 = vector.multi_reduction <add>, %102, %cst_47 [1] : vector<8x8x1xf32> to vector<8x1xf32>
    %104 = vector.shape_cast %103 : vector<8x1xf32> to vector<8x1x1xf32>
    %cst_48 = arith.constant 3.906250e-03 : f32
    %105 = vector.broadcast %cst_48 : f32 to vector<8x1x1xf32>
    %106 = arith.mulf %104, %105 : vector<8x1x1xf32>
    %107 = vector.broadcast %106 : vector<8x1x1xf32> to vector<8x8x32xf32>
    %108 = arith.subf %100, %107 : vector<8x8x32xf32>
    %109 = arith.mulf %108, %108 : vector<8x8x32xf32>
    %cst_49 = arith.constant dense<0.000000e+00> : vector<8x8xf32>
    %110 = vector.multi_reduction <add>, %109, %cst_49 [2] : vector<8x8x32xf32> to vector<8x8xf32>
    %111 = vector.shape_cast %110 : vector<8x8xf32> to vector<8x8x1xf32>
    %cst_50 = arith.constant dense<0.000000e+00> : vector<8x1xf32>
    %112 = vector.multi_reduction <add>, %111, %cst_50 [1] : vector<8x8x1xf32> to vector<8x1xf32>
    %113 = vector.shape_cast %112 : vector<8x1xf32> to vector<8x1x1xf32>
    %cst_51 = arith.constant 3.906250e-03 : f32
    %114 = vector.broadcast %cst_51 : f32 to vector<8x1x1xf32>
    %115 = arith.mulf %113, %114 : vector<8x1x1xf32>
    %cst_52 = arith.constant 9.99999974E-6 : f32
    %116 = vector.broadcast %cst_52 : f32 to vector<8x1x1xf32>
    %117 = arith.addf %115, %116 : vector<8x1x1xf32>
    %118 = math.rsqrt %117 : vector<8x1x1xf32>
    %119 = vector.broadcast %118 : vector<8x1x1xf32> to vector<8x8x32xf32>
    %120 = arith.mulf %108, %119 : vector<8x8x32xf32>
    %121 = vector.shape_cast %97 : vector<8x32xf32> to vector<1x8x32xf32>
    %122 = vector.broadcast %121 : vector<1x8x32xf32> to vector<8x8x32xf32>
    %123 = arith.mulf %120, %122 : vector<8x8x32xf32>
    %124 = vector.shape_cast %99 : vector<8x32xf32> to vector<1x8x32xf32>
    %125 = vector.broadcast %124 : vector<1x8x32xf32> to vector<8x8x32xf32>
    %126 = arith.addf %123, %125 : vector<8x8x32xf32>
    %127 = vector.shape_cast %126 : vector<8x8x32xf32> to vector<64x32xf32>
    %c0_53 = arith.constant 0 : index
    %c0_54 = arith.constant 0 : index
    %c0_55 = arith.constant 0 : index
    %128 = vector.load %arg11[%c0_53, %c0_54, %c0_55] : memref<2x32x32xf32, #tpu.memory_space<vmem>>, vector<1x32x32xf32>
    %129 = vector.shape_cast %128 : vector<1x32x32xf32> to vector<32x32xf32>
    %cst_56 = arith.constant dense<0.000000e+00> : vector<64x32xf32>
    %130 = tpu.matmul %127, %129, %cst_56 {dimension_numbers = #tpu.dot_dimension_numbers<[1], [0], [0], [1], [0, 0, 1, 1], [], []>} : vector<64x32xf32>, vector<32x32xf32>, vector<64x32xf32> -> vector<64x32xf32>
    %c0_57 = arith.constant 0 : index
    %c0_58 = arith.constant 0 : index
    %c0_59 = arith.constant 0 : index
    %131 = vector.load %arg12[%c0_57, %c0_58, %c0_59] : memref<2x1x32xf32, #tpu.memory_space<vmem>>, vector<1x1x32xf32>
    %132 = vector.shape_cast %131 : vector<1x1x32xf32> to vector<1x32xf32>
    %133 = vector.broadcast %132 : vector<1x32xf32> to vector<64x32xf32>
    %134 = arith.addf %130, %133 : vector<64x32xf32>
    %135 = arith.addf %134, %127 : vector<64x32xf32>
    %c0_60 = arith.constant 0 : index
    %c0_61 = arith.constant 0 : index
    %c0_62 = arith.constant 0 : index
    %136 = vector.load %arg13[%c0_60, %c0_61, %c0_62] : memref<2x8x32xf32, #tpu.memory_space<vmem>>, vector<1x8x32xf32>
    %137 = vector.shape_cast %136 : vector<1x8x32xf32> to vector<8x32xf32>
    %c0_63 = arith.constant 0 : index
    %c0_64 = arith.constant 0 : index
    %c0_65 = arith.constant 0 : index
    %138 = vector.load %arg14[%c0_63, %c0_64, %c0_65] : memref<2x8x32xf32, #tpu.memory_space<vmem>>, vector<1x8x32xf32>
    %139 = vector.shape_cast %138 : vector<1x8x32xf32> to vector<8x32xf32>
    %140 = vector.shape_cast %135 : vector<64x32xf32> to vector<8x8x32xf32>
    %cst_66 = arith.constant dense<0.000000e+00> : vector<8x8xf32>
    %141 = vector.multi_reduction <add>, %140, %cst_66 [2] : vector<8x8x32xf32> to vector<8x8xf32>
    %142 = vector.shape_cast %141 : vector<8x8xf32> to vector<8x8x1xf32>
    %cst_67 = arith.constant dense<0.000000e+00> : vector<8x1xf32>
    %143 = vector.multi_reduction <add>, %142, %cst_67 [1] : vector<8x8x1xf32> to vector<8x1xf32>
    %144 = vector.shape_cast %143 : vector<8x1xf32> to vector<8x1x1xf32>
    %cst_68 = arith.constant 3.906250e-03 : f32
    %145 = vector.broadcast %cst_68 : f32 to vector<8x1x1xf32>
    %146 = arith.mulf %144, %145 : vector<8x1x1xf32>
    %147 = vector.broadcast %146 : vector<8x1x1xf32> to vector<8x8x32xf32>
    %148 = arith.subf %140, %147 : vector<8x8x32xf32>
    %149 = arith.mulf %148, %148 : vector<8x8x32xf32>
    %cst_69 = arith.constant dense<0.000000e+00> : vector<8x8xf32>
    %150 = vector.multi_reduction <add>, %149, %cst_69 [2] : vector<8x8x32xf32> to vector<8x8xf32>
    %151 = vector.shape_cast %150 : vector<8x8xf32> to vector<8x8x1xf32>
    %cst_70 = arith.constant dense<0.000000e+00> : vector<8x1xf32>
    %152 = vector.multi_reduction <add>, %151, %cst_70 [1] : vector<8x8x1xf32> to vector<8x1xf32>
    %153 = vector.shape_cast %152 : vector<8x1xf32> to vector<8x1x1xf32>
    %cst_71 = arith.constant 3.906250e-03 : f32
    %154 = vector.broadcast %cst_71 : f32 to vector<8x1x1xf32>
    %155 = arith.mulf %153, %154 : vector<8x1x1xf32>
    %cst_72 = arith.constant 9.99999974E-6 : f32
    %156 = vector.broadcast %cst_72 : f32 to vector<8x1x1xf32>
    %157 = arith.addf %155, %156 : vector<8x1x1xf32>
    %158 = math.rsqrt %157 : vector<8x1x1xf32>
    %159 = vector.broadcast %158 : vector<8x1x1xf32> to vector<8x8x32xf32>
    %160 = arith.mulf %148, %159 : vector<8x8x32xf32>
    %161 = vector.shape_cast %137 : vector<8x32xf32> to vector<1x8x32xf32>
    %162 = vector.broadcast %161 : vector<1x8x32xf32> to vector<8x8x32xf32>
    %163 = arith.mulf %160, %162 : vector<8x8x32xf32>
    %164 = vector.shape_cast %139 : vector<8x32xf32> to vector<1x8x32xf32>
    %165 = vector.broadcast %164 : vector<1x8x32xf32> to vector<8x8x32xf32>
    %166 = arith.addf %163, %165 : vector<8x8x32xf32>
    %167 = vector.shape_cast %166 : vector<8x8x32xf32> to vector<64x32xf32>
    %c1 = arith.constant 1 : index
    %c0_73 = arith.constant 0 : index
    %c0_74 = arith.constant 0 : index
    %168 = vector.load %arg5[%c1, %c0_73, %c0_74] : memref<2x32x256xf32, #tpu.memory_space<vmem>>, vector<1x32x256xf32>
    %169 = vector.shape_cast %168 : vector<1x32x256xf32> to vector<32x256xf32>
    %cst_75 = arith.constant dense<0.000000e+00> : vector<64x256xf32>
    %170 = tpu.matmul %167, %169, %cst_75 {dimension_numbers = #tpu.dot_dimension_numbers<[1], [0], [0], [1], [0, 0, 1, 1], [], []>} : vector<64x32xf32>, vector<32x256xf32>, vector<64x256xf32> -> vector<64x256xf32>
    %c1_76 = arith.constant 1 : index
    %c0_77 = arith.constant 0 : index
    %c0_78 = arith.constant 0 : index
    %171 = vector.load %arg6[%c1_76, %c0_77, %c0_78] : memref<2x1x256xf32, #tpu.memory_space<vmem>>, vector<1x1x256xf32>
    %172 = vector.shape_cast %171 : vector<1x1x256xf32> to vector<1x256xf32>
    %173 = vector.broadcast %172 : vector<1x256xf32> to vector<64x256xf32>
    %174 = arith.addf %170, %173 : vector<64x256xf32>
    %cst_79 = arith.constant 0.000000e+00 : f32
    %175 = vector.broadcast %cst_79 : f32 to vector<64x32xf32>
    %176 = vector.extract_strided_slice %174 {offsets = [0, 0], sizes = [64, 8], strides = [1, 1]} : vector<64x256xf32> to vector<64x8xf32>
    %177 = vector.extract_strided_slice %174 {offsets = [0, 32], sizes = [64, 8], strides = [1, 1]} : vector<64x256xf32> to vector<64x8xf32>
    %178 = vector.extract_strided_slice %174 {offsets = [0, 64], sizes = [64, 32], strides = [1, 1]} : vector<64x256xf32> to vector<64x32xf32>
    %cst_80 = arith.constant dense<0.000000e+00> : vector<64x64xf32>
    %179 = tpu.matmul %176, %177, %cst_80 {dimension_numbers = #tpu.dot_dimension_numbers<[1], [1], [0], [0], [0, 0, 1, 0], [], []>} : vector<64x8xf32>, vector<64x8xf32>, vector<64x64xf32> -> vector<64x64xf32>
    %180 = arith.addf %179, %11 : vector<64x64xf32>
    %cst_81 = arith.constant dense<0xFF800000> : vector<64xf32>
    %181 = vector.multi_reduction <maximumf>, %180, %cst_81 [1] : vector<64x64xf32> to vector<64xf32>
    %182 = vector.shape_cast %181 : vector<64xf32> to vector<64x1xf32>
    %183 = vector.broadcast %182 : vector<64x1xf32> to vector<64x64xf32>
    %184 = arith.subf %180, %183 : vector<64x64xf32>
    %185 = math.exp %184 : vector<64x64xf32>
    %cst_82 = arith.constant dense<0.000000e+00> : vector<64xf32>
    %186 = vector.multi_reduction <add>, %185, %cst_82 [1] : vector<64x64xf32> to vector<64xf32>
    %187 = vector.shape_cast %186 : vector<64xf32> to vector<64x1xf32>
    %188 = tpu.reciprocal %187 {approx = true} : vector<64x1xf32> -> vector<64x1xf32>
    %189 = vector.broadcast %188 : vector<64x1xf32> to vector<64x64xf32>
    %190 = arith.mulf %185, %189 : vector<64x64xf32>
    %cst_83 = arith.constant dense<0.000000e+00> : vector<64x32xf32>
    %191 = tpu.matmul %190, %178, %cst_83 {dimension_numbers = #tpu.dot_dimension_numbers<[1], [0], [0], [1], [0, 0, 1, 1], [], []>} : vector<64x64xf32>, vector<64x32xf32>, vector<64x32xf32> -> vector<64x32xf32>
    %192 = arith.addf %175, %191 : vector<64x32xf32>
    %193 = vector.extract_strided_slice %174 {offsets = [0, 8], sizes = [64, 8], strides = [1, 1]} : vector<64x256xf32> to vector<64x8xf32>
    %194 = vector.extract_strided_slice %174 {offsets = [0, 40], sizes = [64, 8], strides = [1, 1]} : vector<64x256xf32> to vector<64x8xf32>
    %195 = vector.extract_strided_slice %174 {offsets = [0, 96], sizes = [64, 32], strides = [1, 1]} : vector<64x256xf32> to vector<64x32xf32>
    %cst_84 = arith.constant dense<0.000000e+00> : vector<64x64xf32>
    %196 = tpu.matmul %193, %194, %cst_84 {dimension_numbers = #tpu.dot_dimension_numbers<[1], [1], [0], [0], [0, 0, 1, 0], [], []>} : vector<64x8xf32>, vector<64x8xf32>, vector<64x64xf32> -> vector<64x64xf32>
    %197 = arith.addf %196, %11 : vector<64x64xf32>
    %cst_85 = arith.constant dense<0xFF800000> : vector<64xf32>
    %198 = vector.multi_reduction <maximumf>, %197, %cst_85 [1] : vector<64x64xf32> to vector<64xf32>
    %199 = vector.shape_cast %198 : vector<64xf32> to vector<64x1xf32>
    %200 = vector.broadcast %199 : vector<64x1xf32> to vector<64x64xf32>
    %201 = arith.subf %197, %200 : vector<64x64xf32>
    %202 = math.exp %201 : vector<64x64xf32>
    %cst_86 = arith.constant dense<0.000000e+00> : vector<64xf32>
    %203 = vector.multi_reduction <add>, %202, %cst_86 [1] : vector<64x64xf32> to vector<64xf32>
    %204 = vector.shape_cast %203 : vector<64xf32> to vector<64x1xf32>
    %205 = tpu.reciprocal %204 {approx = true} : vector<64x1xf32> -> vector<64x1xf32>
    %206 = vector.broadcast %205 : vector<64x1xf32> to vector<64x64xf32>
    %207 = arith.mulf %202, %206 : vector<64x64xf32>
    %cst_87 = arith.constant dense<0.000000e+00> : vector<64x32xf32>
    %208 = tpu.matmul %207, %195, %cst_87 {dimension_numbers = #tpu.dot_dimension_numbers<[1], [0], [0], [1], [0, 0, 1, 1], [], []>} : vector<64x64xf32>, vector<64x32xf32>, vector<64x32xf32> -> vector<64x32xf32>
    %209 = arith.addf %192, %208 : vector<64x32xf32>
    %210 = vector.extract_strided_slice %174 {offsets = [0, 16], sizes = [64, 8], strides = [1, 1]} : vector<64x256xf32> to vector<64x8xf32>
    %211 = vector.extract_strided_slice %174 {offsets = [0, 48], sizes = [64, 8], strides = [1, 1]} : vector<64x256xf32> to vector<64x8xf32>
    %212 = vector.extract_strided_slice %174 {offsets = [0, 128], sizes = [64, 32], strides = [1, 1]} : vector<64x256xf32> to vector<64x32xf32>
    %cst_88 = arith.constant dense<0.000000e+00> : vector<64x64xf32>
    %213 = tpu.matmul %210, %211, %cst_88 {dimension_numbers = #tpu.dot_dimension_numbers<[1], [1], [0], [0], [0, 0, 1, 0], [], []>} : vector<64x8xf32>, vector<64x8xf32>, vector<64x64xf32> -> vector<64x64xf32>
    %214 = arith.addf %213, %11 : vector<64x64xf32>
    %cst_89 = arith.constant dense<0xFF800000> : vector<64xf32>
    %215 = vector.multi_reduction <maximumf>, %214, %cst_89 [1] : vector<64x64xf32> to vector<64xf32>
    %216 = vector.shape_cast %215 : vector<64xf32> to vector<64x1xf32>
    %217 = vector.broadcast %216 : vector<64x1xf32> to vector<64x64xf32>
    %218 = arith.subf %214, %217 : vector<64x64xf32>
    %219 = math.exp %218 : vector<64x64xf32>
    %cst_90 = arith.constant dense<0.000000e+00> : vector<64xf32>
    %220 = vector.multi_reduction <add>, %219, %cst_90 [1] : vector<64x64xf32> to vector<64xf32>
    %221 = vector.shape_cast %220 : vector<64xf32> to vector<64x1xf32>
    %222 = tpu.reciprocal %221 {approx = true} : vector<64x1xf32> -> vector<64x1xf32>
    %223 = vector.broadcast %222 : vector<64x1xf32> to vector<64x64xf32>
    %224 = arith.mulf %219, %223 : vector<64x64xf32>
    %cst_91 = arith.constant dense<0.000000e+00> : vector<64x32xf32>
    %225 = tpu.matmul %224, %212, %cst_91 {dimension_numbers = #tpu.dot_dimension_numbers<[1], [0], [0], [1], [0, 0, 1, 1], [], []>} : vector<64x64xf32>, vector<64x32xf32>, vector<64x32xf32> -> vector<64x32xf32>
    %226 = arith.addf %209, %225 : vector<64x32xf32>
    %227 = vector.extract_strided_slice %174 {offsets = [0, 24], sizes = [64, 8], strides = [1, 1]} : vector<64x256xf32> to vector<64x8xf32>
    %228 = vector.extract_strided_slice %174 {offsets = [0, 56], sizes = [64, 8], strides = [1, 1]} : vector<64x256xf32> to vector<64x8xf32>
    %229 = vector.extract_strided_slice %174 {offsets = [0, 160], sizes = [64, 32], strides = [1, 1]} : vector<64x256xf32> to vector<64x32xf32>
    %cst_92 = arith.constant dense<0.000000e+00> : vector<64x64xf32>
    %230 = tpu.matmul %227, %228, %cst_92 {dimension_numbers = #tpu.dot_dimension_numbers<[1], [1], [0], [0], [0, 0, 1, 0], [], []>} : vector<64x8xf32>, vector<64x8xf32>, vector<64x64xf32> -> vector<64x64xf32>
    %231 = arith.addf %230, %11 : vector<64x64xf32>
    %cst_93 = arith.constant dense<0xFF800000> : vector<64xf32>
    %232 = vector.multi_reduction <maximumf>, %231, %cst_93 [1] : vector<64x64xf32> to vector<64xf32>
    %233 = vector.shape_cast %232 : vector<64xf32> to vector<64x1xf32>
    %234 = vector.broadcast %233 : vector<64x1xf32> to vector<64x64xf32>
    %235 = arith.subf %231, %234 : vector<64x64xf32>
    %236 = math.exp %235 : vector<64x64xf32>
    %cst_94 = arith.constant dense<0.000000e+00> : vector<64xf32>
    %237 = vector.multi_reduction <add>, %236, %cst_94 [1] : vector<64x64xf32> to vector<64xf32>
    %238 = vector.shape_cast %237 : vector<64xf32> to vector<64x1xf32>
    %239 = tpu.reciprocal %238 {approx = true} : vector<64x1xf32> -> vector<64x1xf32>
    %240 = vector.broadcast %239 : vector<64x1xf32> to vector<64x64xf32>
    %241 = arith.mulf %236, %240 : vector<64x64xf32>
    %cst_95 = arith.constant dense<0.000000e+00> : vector<64x32xf32>
    %242 = tpu.matmul %241, %229, %cst_95 {dimension_numbers = #tpu.dot_dimension_numbers<[1], [0], [0], [1], [0, 0, 1, 1], [], []>} : vector<64x64xf32>, vector<64x32xf32>, vector<64x32xf32> -> vector<64x32xf32>
    %243 = arith.addf %226, %242 : vector<64x32xf32>
    %c1_96 = arith.constant 1 : index
    %c0_97 = arith.constant 0 : index
    %c0_98 = arith.constant 0 : index
    %244 = vector.load %arg7[%c1_96, %c0_97, %c0_98] : memref<2x32x32xf32, #tpu.memory_space<vmem>>, vector<1x32x32xf32>
    %245 = vector.shape_cast %244 : vector<1x32x32xf32> to vector<32x32xf32>
    %cst_99 = arith.constant dense<0.000000e+00> : vector<64x32xf32>
    %246 = tpu.matmul %243, %245, %cst_99 {dimension_numbers = #tpu.dot_dimension_numbers<[1], [0], [0], [1], [0, 0, 1, 1], [], []>} : vector<64x32xf32>, vector<32x32xf32>, vector<64x32xf32> -> vector<64x32xf32>
    %c1_100 = arith.constant 1 : index
    %c0_101 = arith.constant 0 : index
    %c0_102 = arith.constant 0 : index
    %247 = vector.load %arg8[%c1_100, %c0_101, %c0_102] : memref<2x1x32xf32, #tpu.memory_space<vmem>>, vector<1x1x32xf32>
    %248 = vector.shape_cast %247 : vector<1x1x32xf32> to vector<1x32xf32>
    %249 = vector.broadcast %248 : vector<1x32xf32> to vector<64x32xf32>
    %250 = arith.addf %246, %249 : vector<64x32xf32>
    %251 = arith.addf %250, %167 : vector<64x32xf32>
    %c1_103 = arith.constant 1 : index
    %c0_104 = arith.constant 0 : index
    %c0_105 = arith.constant 0 : index
    %252 = vector.load %arg9[%c1_103, %c0_104, %c0_105] : memref<2x8x32xf32, #tpu.memory_space<vmem>>, vector<1x8x32xf32>
    %253 = vector.shape_cast %252 : vector<1x8x32xf32> to vector<8x32xf32>
    %c1_106 = arith.constant 1 : index
    %c0_107 = arith.constant 0 : index
    %c0_108 = arith.constant 0 : index
    %254 = vector.load %arg10[%c1_106, %c0_107, %c0_108] : memref<2x8x32xf32, #tpu.memory_space<vmem>>, vector<1x8x32xf32>
    %255 = vector.shape_cast %254 : vector<1x8x32xf32> to vector<8x32xf32>
    %256 = vector.shape_cast %251 : vector<64x32xf32> to vector<8x8x32xf32>
    %cst_109 = arith.constant dense<0.000000e+00> : vector<8x8xf32>
    %257 = vector.multi_reduction <add>, %256, %cst_109 [2] : vector<8x8x32xf32> to vector<8x8xf32>
    %258 = vector.shape_cast %257 : vector<8x8xf32> to vector<8x8x1xf32>
    %cst_110 = arith.constant dense<0.000000e+00> : vector<8x1xf32>
    %259 = vector.multi_reduction <add>, %258, %cst_110 [1] : vector<8x8x1xf32> to vector<8x1xf32>
    %260 = vector.shape_cast %259 : vector<8x1xf32> to vector<8x1x1xf32>
    %cst_111 = arith.constant 3.906250e-03 : f32
    %261 = vector.broadcast %cst_111 : f32 to vector<8x1x1xf32>
    %262 = arith.mulf %260, %261 : vector<8x1x1xf32>
    %263 = vector.broadcast %262 : vector<8x1x1xf32> to vector<8x8x32xf32>
    %264 = arith.subf %256, %263 : vector<8x8x32xf32>
    %265 = arith.mulf %264, %264 : vector<8x8x32xf32>
    %cst_112 = arith.constant dense<0.000000e+00> : vector<8x8xf32>
    %266 = vector.multi_reduction <add>, %265, %cst_112 [2] : vector<8x8x32xf32> to vector<8x8xf32>
    %267 = vector.shape_cast %266 : vector<8x8xf32> to vector<8x8x1xf32>
    %cst_113 = arith.constant dense<0.000000e+00> : vector<8x1xf32>
    %268 = vector.multi_reduction <add>, %267, %cst_113 [1] : vector<8x8x1xf32> to vector<8x1xf32>
    %269 = vector.shape_cast %268 : vector<8x1xf32> to vector<8x1x1xf32>
    %cst_114 = arith.constant 3.906250e-03 : f32
    %270 = vector.broadcast %cst_114 : f32 to vector<8x1x1xf32>
    %271 = arith.mulf %269, %270 : vector<8x1x1xf32>
    %cst_115 = arith.constant 9.99999974E-6 : f32
    %272 = vector.broadcast %cst_115 : f32 to vector<8x1x1xf32>
    %273 = arith.addf %271, %272 : vector<8x1x1xf32>
    %274 = math.rsqrt %273 : vector<8x1x1xf32>
    %275 = vector.broadcast %274 : vector<8x1x1xf32> to vector<8x8x32xf32>
    %276 = arith.mulf %264, %275 : vector<8x8x32xf32>
    %277 = vector.shape_cast %253 : vector<8x32xf32> to vector<1x8x32xf32>
    %278 = vector.broadcast %277 : vector<1x8x32xf32> to vector<8x8x32xf32>
    %279 = arith.mulf %276, %278 : vector<8x8x32xf32>
    %280 = vector.shape_cast %255 : vector<8x32xf32> to vector<1x8x32xf32>
    %281 = vector.broadcast %280 : vector<1x8x32xf32> to vector<8x8x32xf32>
    %282 = arith.addf %279, %281 : vector<8x8x32xf32>
    %283 = vector.shape_cast %282 : vector<8x8x32xf32> to vector<64x32xf32>
    %c1_116 = arith.constant 1 : index
    %c0_117 = arith.constant 0 : index
    %c0_118 = arith.constant 0 : index
    %284 = vector.load %arg11[%c1_116, %c0_117, %c0_118] : memref<2x32x32xf32, #tpu.memory_space<vmem>>, vector<1x32x32xf32>
    %285 = vector.shape_cast %284 : vector<1x32x32xf32> to vector<32x32xf32>
    %cst_119 = arith.constant dense<0.000000e+00> : vector<64x32xf32>
    %286 = tpu.matmul %283, %285, %cst_119 {dimension_numbers = #tpu.dot_dimension_numbers<[1], [0], [0], [1], [0, 0, 1, 1], [], []>} : vector<64x32xf32>, vector<32x32xf32>, vector<64x32xf32> -> vector<64x32xf32>
    %c1_120 = arith.constant 1 : index
    %c0_121 = arith.constant 0 : index
    %c0_122 = arith.constant 0 : index
    %287 = vector.load %arg12[%c1_120, %c0_121, %c0_122] : memref<2x1x32xf32, #tpu.memory_space<vmem>>, vector<1x1x32xf32>
    %288 = vector.shape_cast %287 : vector<1x1x32xf32> to vector<1x32xf32>
    %289 = vector.broadcast %288 : vector<1x32xf32> to vector<64x32xf32>
    %290 = arith.addf %286, %289 : vector<64x32xf32>
    %291 = arith.addf %290, %283 : vector<64x32xf32>
    %c1_123 = arith.constant 1 : index
    %c0_124 = arith.constant 0 : index
    %c0_125 = arith.constant 0 : index
    %292 = vector.load %arg13[%c1_123, %c0_124, %c0_125] : memref<2x8x32xf32, #tpu.memory_space<vmem>>, vector<1x8x32xf32>
    %293 = vector.shape_cast %292 : vector<1x8x32xf32> to vector<8x32xf32>
    %c1_126 = arith.constant 1 : index
    %c0_127 = arith.constant 0 : index
    %c0_128 = arith.constant 0 : index
    %294 = vector.load %arg14[%c1_126, %c0_127, %c0_128] : memref<2x8x32xf32, #tpu.memory_space<vmem>>, vector<1x8x32xf32>
    %295 = vector.shape_cast %294 : vector<1x8x32xf32> to vector<8x32xf32>
    %296 = vector.shape_cast %291 : vector<64x32xf32> to vector<8x8x32xf32>
    %cst_129 = arith.constant dense<0.000000e+00> : vector<8x8xf32>
    %297 = vector.multi_reduction <add>, %296, %cst_129 [2] : vector<8x8x32xf32> to vector<8x8xf32>
    %298 = vector.shape_cast %297 : vector<8x8xf32> to vector<8x8x1xf32>
    %cst_130 = arith.constant dense<0.000000e+00> : vector<8x1xf32>
    %299 = vector.multi_reduction <add>, %298, %cst_130 [1] : vector<8x8x1xf32> to vector<8x1xf32>
    %300 = vector.shape_cast %299 : vector<8x1xf32> to vector<8x1x1xf32>
    %cst_131 = arith.constant 3.906250e-03 : f32
    %301 = vector.broadcast %cst_131 : f32 to vector<8x1x1xf32>
    %302 = arith.mulf %300, %301 : vector<8x1x1xf32>
    %303 = vector.broadcast %302 : vector<8x1x1xf32> to vector<8x8x32xf32>
    %304 = arith.subf %296, %303 : vector<8x8x32xf32>
    %305 = arith.mulf %304, %304 : vector<8x8x32xf32>
    %cst_132 = arith.constant dense<0.000000e+00> : vector<8x8xf32>
    %306 = vector.multi_reduction <add>, %305, %cst_132 [2] : vector<8x8x32xf32> to vector<8x8xf32>
    %307 = vector.shape_cast %306 : vector<8x8xf32> to vector<8x8x1xf32>
    %cst_133 = arith.constant dense<0.000000e+00> : vector<8x1xf32>
    %308 = vector.multi_reduction <add>, %307, %cst_133 [1] : vector<8x8x1xf32> to vector<8x1xf32>
    %309 = vector.shape_cast %308 : vector<8x1xf32> to vector<8x1x1xf32>
    %cst_134 = arith.constant 3.906250e-03 : f32
    %310 = vector.broadcast %cst_134 : f32 to vector<8x1x1xf32>
    %311 = arith.mulf %309, %310 : vector<8x1x1xf32>
    %cst_135 = arith.constant 9.99999974E-6 : f32
    %312 = vector.broadcast %cst_135 : f32 to vector<8x1x1xf32>
    %313 = arith.addf %311, %312 : vector<8x1x1xf32>
    %314 = math.rsqrt %313 : vector<8x1x1xf32>
    %315 = vector.broadcast %314 : vector<8x1x1xf32> to vector<8x8x32xf32>
    %316 = arith.mulf %304, %315 : vector<8x8x32xf32>
    %317 = vector.shape_cast %293 : vector<8x32xf32> to vector<1x8x32xf32>
    %318 = vector.broadcast %317 : vector<1x8x32xf32> to vector<8x8x32xf32>
    %319 = arith.mulf %316, %318 : vector<8x8x32xf32>
    %320 = vector.shape_cast %295 : vector<8x32xf32> to vector<1x8x32xf32>
    %321 = vector.broadcast %320 : vector<1x8x32xf32> to vector<8x8x32xf32>
    %322 = arith.addf %319, %321 : vector<8x8x32xf32>
    %323 = vector.shape_cast %322 : vector<8x8x32xf32> to vector<64x32xf32>
    %324 = vector.shape_cast %323 : vector<64x32xf32> to vector<8x256xf32>
    %c0_136 = arith.constant 0 : index
    %c0_137 = arith.constant 0 : index
    %325 = vector.load %arg15[%c0_136, %c0_137] : memref<256x128xf32, #tpu.memory_space<vmem>>, vector<256x128xf32>
    %cst_138 = arith.constant dense<0.000000e+00> : vector<8x128xf32>
    %326 = tpu.matmul %324, %325, %cst_138 {dimension_numbers = #tpu.dot_dimension_numbers<[1], [0], [0], [1], [0, 0, 1, 1], [], []>} : vector<8x256xf32>, vector<256x128xf32>, vector<8x128xf32> -> vector<8x128xf32>
    %c0_139 = arith.constant 0 : index
    %c0_140 = arith.constant 0 : index
    %327 = vector.load %arg16[%c0_139, %c0_140] : memref<1x128xf32, #tpu.memory_space<vmem>>, vector<1x128xf32>
    %328 = vector.broadcast %327 : vector<1x128xf32> to vector<8x128xf32>
    %329 = arith.addf %326, %328 : vector<8x128xf32>
    %cst_141 = arith.constant dense<0xFF800000> : vector<8xf32>
    %330 = vector.multi_reduction <maximumf>, %329, %cst_141 [1] : vector<8x128xf32> to vector<8xf32>
    %331 = vector.shape_cast %330 : vector<8xf32> to vector<8x1xf32>
    %332 = vector.broadcast %331 : vector<8x1xf32> to vector<8x128xf32>
    %333 = arith.subf %329, %332 : vector<8x128xf32>
    %334 = math.exp %333 : vector<8x128xf32>
    %cst_142 = arith.constant dense<0.000000e+00> : vector<8xf32>
    %335 = vector.multi_reduction <add>, %334, %cst_142 [1] : vector<8x128xf32> to vector<8xf32>
    %336 = vector.shape_cast %335 : vector<8xf32> to vector<8x1xf32>
    %337 = vector.broadcast %336 : vector<8x1xf32> to vector<8x128xf32>
    %338 = arith.divf %334, %337 : vector<8x128xf32>
    %c0_143 = arith.constant 0 : index
    %c0_144 = arith.constant 0 : index
    %339 = vector.load %arg17[%c0_143, %c0_144] : memref<8x128xf32, #tpu.memory_space<vmem>>, vector<8x128xf32>
    tpu.vector_store %arg17[%c0_143, %c0_144], %338 {strides = array<i32>} : memref<8x128xf32, #tpu.memory_space<vmem>>, vector<8x128xf32>,
    return
  }
  func.func @transform_0(%arg0: i32) -> (i32, i32) {
    %c0_i32 = arith.constant 0 : i32
    %c0_i32_0 = arith.constant 0 : i32
    return %arg0, %c0_i32 : i32, i32
  }
  func.func @transform_1(%arg0: i32) -> (i32, i32) {
    %c0_i32 = arith.constant 0 : i32
    %c0_i32_0 = arith.constant 0 : i32
    %c0_i32_1 = arith.constant 0 : i32
    return %c0_i32, %c0_i32_0 : i32, i32
  }
  func.func @transform_2(%arg0: i32) -> (i32, i32) {
    %c0_i32 = arith.constant 0 : i32
    %c0_i32_0 = arith.constant 0 : i32
    %c0_i32_1 = arith.constant 0 : i32
    return %c0_i32, %c0_i32_0 : i32, i32
  }
  func.func @transform_3(%arg0: i32) -> (i32, i32) {
    %c0_i32 = arith.constant 0 : i32
    %c0_i32_0 = arith.constant 0 : i32
    %c0_i32_1 = arith.constant 0 : i32
    return %c0_i32, %c0_i32_0 : i32, i32
  }
  func.func @transform_4(%arg0: i32) -> (i32, i32, i32) {
    %c0_i32 = arith.constant 0 : i32
    %c0_i32_0 = arith.constant 0 : i32
    %c0_i32_1 = arith.constant 0 : i32
    %c0_i32_2 = arith.constant 0 : i32
    return %c0_i32, %c0_i32_0, %c0_i32_1 : i32, i32, i32
  }
  func.func @transform_5(%arg0: i32) -> (i32, i32, i32) {
    %c0_i32 = arith.constant 0 : i32
    %c0_i32_0 = arith.constant 0 : i32
    %c0_i32_1 = arith.constant 0 : i32
    %c0_i32_2 = arith.constant 0 : i32
    return %c0_i32, %c0_i32_0, %c0_i32_1 : i32, i32, i32
  }
  func.func @transform_6(%arg0: i32) -> (i32, i32, i32) {
    %c0_i32 = arith.constant 0 : i32
    %c0_i32_0 = arith.constant 0 : i32
    %c0_i32_1 = arith.constant 0 : i32
    %c0_i32_2 = arith.constant 0 : i32
    return %c0_i32, %c0_i32_0, %c0_i32_1 : i32, i32, i32
  }
  func.func @transform_7(%arg0: i32) -> (i32, i32, i32) {
    %c0_i32 = arith.constant 0 : i32
    %c0_i32_0 = arith.constant 0 : i32
    %c0_i32_1 = arith.constant 0 : i32
    %c0_i32_2 = arith.constant 0 : i32
    return %c0_i32, %c0_i32_0, %c0_i32_1 : i32, i32, i32
  }
  func.func @transform_8(%arg0: i32) -> (i32, i32, i32) {
    %c0_i32 = arith.constant 0 : i32
    %c0_i32_0 = arith.constant 0 : i32
    %c0_i32_1 = arith.constant 0 : i32
    %c0_i32_2 = arith.constant 0 : i32
    return %c0_i32, %c0_i32_0, %c0_i32_1 : i32, i32, i32
  }
  func.func @transform_9(%arg0: i32) -> (i32, i32, i32) {
    %c0_i32 = arith.constant 0 : i32
    %c0_i32_0 = arith.constant 0 : i32
    %c0_i32_1 = arith.constant 0 : i32
    %c0_i32_2 = arith.constant 0 : i32
    return %c0_i32, %c0_i32_0, %c0_i32_1 : i32, i32, i32
  }
  func.func @transform_10(%arg0: i32) -> (i32, i32, i32) {
    %c0_i32 = arith.constant 0 : i32
    %c0_i32_0 = arith.constant 0 : i32
    %c0_i32_1 = arith.constant 0 : i32
    %c0_i32_2 = arith.constant 0 : i32
    return %c0_i32, %c0_i32_0, %c0_i32_1 : i32, i32, i32
  }
  func.func @transform_11(%arg0: i32) -> (i32, i32, i32) {
    %c0_i32 = arith.constant 0 : i32
    %c0_i32_0 = arith.constant 0 : i32
    %c0_i32_1 = arith.constant 0 : i32
    %c0_i32_2 = arith.constant 0 : i32
    return %c0_i32, %c0_i32_0, %c0_i32_1 : i32, i32, i32
  }
  func.func @transform_12(%arg0: i32) -> (i32, i32, i32) {
    %c0_i32 = arith.constant 0 : i32
    %c0_i32_0 = arith.constant 0 : i32
    %c0_i32_1 = arith.constant 0 : i32
    %c0_i32_2 = arith.constant 0 : i32
    return %c0_i32, %c0_i32_0, %c0_i32_1 : i32, i32, i32
  }
  func.func @transform_13(%arg0: i32) -> (i32, i32, i32) {
    %c0_i32 = arith.constant 0 : i32
    %c0_i32_0 = arith.constant 0 : i32
    %c0_i32_1 = arith.constant 0 : i32
    %c0_i32_2 = arith.constant 0 : i32
    return %c0_i32, %c0_i32_0, %c0_i32_1 : i32, i32, i32
  }
  func.func @transform_14(%arg0: i32) -> (i32, i32) {
    %c0_i32 = arith.constant 0 : i32
    %c0_i32_0 = arith.constant 0 : i32
    %c0_i32_1 = arith.constant 0 : i32
    return %c0_i32, %c0_i32_0 : i32, i32
  }
  func.func @transform_15(%arg0: i32) -> (i32, i32) {
    %c0_i32 = arith.constant 0 : i32
    %c0_i32_0 = arith.constant 0 : i32
    %c0_i32_1 = arith.constant 0 : i32
    return %c0_i32, %c0_i32_0 : i32, i32
  }
  func.func @transform_16(%arg0: i32) -> (i32, i32) {
    %c0_i32 = arith.constant 0 : i32
    %c0_i32_0 = arith.constant 0 : i32
    return %arg0, %c0_i32 : i32, i32
  }
}

</mosaic_0001>

<bundles_post_ra>
// kernel: forward.1
= control target key start
LH: loop header
LB: loop body
LE: loop exit
PB: predicated region body
PF: predicated region fallthrough
CT: control target
= control target key end

     0   :  { %s11731_s0 = inlined_call_operand.vmem [shape: s32[128,1], index: 0, kind: input, shape index: {}]   ;;  %s11732_s1 = inlined_call_operand.vmem [shape: f32[64,64], index: 1, kind: input, shape index: {}]   ;;  %s11733_s2 = inlined_call_operand.vmem [shape: f32[128,32], index: 2, kind: input, shape index: {}]   ;;  %s11734_s3 = inlined_call_operand.vmem [shape: f32[64,32], index: 3, kind: input, shape index: {}]   ;;  %s11735_s4 = inlined_call_operand.vmem [shape: f32[2,32,256], index: 4, kind: input, shape index: {}]   ;;  %s11736_s5 = inlined_call_operand.vmem [shape: f32[2,1,256], index: 5, kind: input, shape index: {}]   ;;  %s11737_s6 = inlined_call_operand.hbm [shape: f32[2,32,32], index: 6, kind: input, shape index: {}]   ;;  %s11738_s7 = inlined_call_operand.hbm [shape: f32[2,1,32], index: 7, kind: input, shape index: {}]   ;;  %s11739_s8 = inlined_call_operand.hbm [shape: f32[2,8,32], index: 8, kind: input, shape index: {}]   ;;  %s11740_s9 = inlined_call_operand.hbm [shape: f32[2,8,32], index: 9, kind: input, shape index: {}]   ;;  %s11741_s10 = inlined_call_operand.hbm [shape: f32[2,32,32], index: 10, kind: input, shape index: {}]   ;;  %s11742_s11 = inlined_call_operand.hbm [shape: f32[2,1,32], index: 11, kind: input, shape index: {}]   ;;  %s11743_s12 = inlined_call_operand.hbm [shape: f32[2,8,32], index: 12, kind: input, shape index: {}]   ;;  %s11744_s13 = inlined_call_operand.hbm [shape: f32[2,8,32], index: 13, kind: input, shape index: {}]   ;;  %s11745_s14 = inlined_call_operand.vmem [shape: f32[256,128], index: 14, kind: input, shape index: {}]   ;;  %s11746_s15 = inlined_call_operand.vmem [shape: f32[1,128], index: 15, kind: input, shape index: {}]   ;;  %s11747_s16 = inlined_call_operand.hbm [shape: f32[16,128], index: 16, kind: output, shape index: {}]  }
   0x1   :  { %11799 = sst [smem:[#allocation51_spill]] %s11731_s0 }
   0x2   :  { %11800 = sst [smem:[#allocation52_spill]] %s11732_s1 }
   0x3   :  { %11801 = sst [smem:[#allocation53_spill]] %s11745_s14 }
   0x4   :  { %11802 = sst [smem:[#allocation54_spill]] %s11746_s15 }
   0x5   :  { %11803 = sst [smem:[#allocation55_spill]] %s11747_s16 }
   0x6   :  { %21 = vsyncpa [#allocation3], 0 }
   0x7   :  { %22 = vsyncpa [#allocation6], 0 }
   0x8   :  { %23 = vsyncpa [#allocation9], 0 }
   0x9   :  { %24 = vsyncpa [#allocation12], 0 }
   0xa   :  { %25 = vsyncpa [#allocation15], 0 }
   0xb   :  { %26 = vsyncpa [#allocation4], 0 }
   0xc   :  { %28 = vsyncpa [#allocation4 + $0x1], 0  ;;  %s9218_s21 = smov 0   ;;  %s9220_s22 = smov 0  }
   0xd   :  { %s9222_s23 = smov 0   ;;  %s9224_s24 = smov 0  }
   0xe LB: > { %11804 = sst [smem:[#allocation23_spill]] %s9092_s21  ;;  %s9239_s25 = sadd.s32 4294967295, %s9104_s24   ;;  %s9104_s24 = sphi %s9224_s24, %s11909_s24   ;;  %s9100_s23 = sphi %s9222_s23, %s11912_s23   ;;  %s9096_s22 = sphi %s9220_s22, %s11911_s22   ;;  %s9092_s21 = sphi %s9218_s21, %s11910_s21  }
   0xf   : > { %11805 = sst [smem:[#allocation24_spill]] %s9096_s22  ;;  %s6319_s26 = sadd.s32 4294967294, %s9104_s24  }
  0x10   : > { %11806 = sst [smem:[#allocation25_spill]] %s9100_s23  ;;  %s9243_s27 = sadd.s32 1, %s9104_s24  }
  0x11   : > { %11807 = sst [smem:[#allocation26_spill]] %s9104_s24  ;;  %s382_s28 = sadd.s32 1, %s9100_s23 }
  0x12   : > { %11808 = sst [smem:[#allocation27_spill]] %s9243_s27  ;;  %s379_s29 = ssub.s32 %s9104_s24, %s9243_s27 }
  0x13   : > { %p392_p0 = scmp.ne.s32.totalorder %s9100_s23, %s9096_s22  ;;  %p380_p1 = scmp.eq.s32.totalorder %s379_s29, 0 }
  0x14   : > { %p393_p2 = scmp.eq.s32.totalorder %s9239_s25, 1  ;;  %p398_p3 = scmp.ne.s32.totalorder %s9096_s22, %s9092_s21 }
  0x15   : > { %p399_p4 = scmp.eq.s32.totalorder %s6319_s26, 1  ;;  %p6320_p7 = scmp.ge.s32.totalorder %s9104_s24, 1 }
  0x16   : > { %s9254_s30 = scalar_select %p380_p1, %s9100_s23, %s382_s28  }
  0x17   : > { %p9256_p5 = por %p393_p2, %p392_p0  ;;  %p9260_p6 = por %p399_p4, %p398_p3 }
  0x18   : > { %11809 = sst [smem:[#allocation28_spill]] %s9254_s30  ;;  %p406_p8 = scmp.lt.s32.totalorder %s9104_s24, 3 }
  0x19   : > { %s11810_s0 = scalar_select %p9256_p5, 1, 0 }
  0x1a   : > { %s11812_s17 = scalar_select %p9260_p6, 1, 0 }
  0x1b   : > { %11811 = sst [smem:[#allocation29_spill]] %s11810_s0  ;;  %p11755_p9 = scmp.eq.s32.totalorder %s9239_s25, 0 }
  0x1c   : > { %11813 = sst [smem:[#allocation30_spill]] %s11812_s17  ;;  %p9267_p10 = pnand %p6320_p7, %p406_p8 }
  0x1d   : > { %s9106_s19 = smov [#allocation5]   ;;  %s9107_s28 = smov [#allocation8]  }
  0x1e   : > { %s11814_s18 = scalar_select %p9267_p10, 1, 0 }
  0x1f   : > { %s446_s20 = sshll.u32 %s9106_s19, 4  ;;  %p8065_p11 = pneg %p9267_p10  ;;  %s447_s20 = int_to_ptr.vmem [resolvable:$true] %s446_s20 }
  0x20   : > { %s472_s29 = sshll.u32 %s9107_s28, 4  ;;  %s8798_s27 = scalar_lea.hbm %s11738_s7, 32  ;;  %s473_s29 = int_to_ptr.vmem [resolvable:$true] %s472_s29 }
  0x21   : > { %p9275_p12 = pnand %p11755_p9, %p8065_p11  ;;  %p8799_p13 = scmp.ne.s32.totalorder %s11738_s7, %s8798_s27 }
  0x22   : > { %p8805_p3 = scmp.lt.u32.totalorder %s8798_s27, %s11738_s7 }
  0x23   : > { %p9287_p0 = pneg %p9275_p12 }
  0x25   : > { %p8801_p1 = pnand %p9287_p0, %p8799_p13 }
  0x27   : > { %p8802_p2 = pneg %p8801_p1 }
  0x29   : > { %p8807_p4 = pnand %p8805_p3, %p8802_p2 }
  0x2b   : > { %8810 = shalt.err (!%p8807_p4)
}
  0x2c   : > { %s8811_s23 = scalar_lea.vmem %s447_s20, 32  ;;  %p8819_p9 = scmp.lt.s32.totalorder %s447_s20, %s447_s20 }
  0x2d   : > { %p8812_p7 = scmp.ne.s32.totalorder %s447_s20, %s8811_s23  ;;  %p8820_p6 = scmp.lt.s32.totalorder %s8811_s23, %s8811_s23 }
  0x2f   : > { %p8814_p8 = pnand %p8812_p7, %p9287_p0  ;;  %p8821_p5 = por %p8820_p6, %p8819_p9 }
  0x31   : > { %p8815_p11 = pneg %p8814_p8 }
  0x33   : > { %p8822_p10 = pnand %p8821_p5, %p8815_p11 }
  0x35   : > { %8825 = shalt.err (!%p8822_p10)
}
  0x36   : > { %s9108_s21 = smov 16   ;;  %s9109_s30 = smov 1  }
  0x37   : > { %8071 = dma.hbm_to_vmem [thread:$0]  (!%p9275_p12), %s11738_s7, 32, %s447_s20, [#allocation6], %s9108_s21, %s9108_s21, %s9109_s30  }
  0x38   : > { %s9110_s27 = smov [#allocation11]   ;;  %s8826_s0 = scalar_lea.hbm %s11740_s9, 256 }
  0x39   : > { %s498_s17 = sshll.u32 %s9110_s27, 4  ;;  %p8827_p5 = scmp.ne.s32.totalorder %s11740_s9, %s8826_s0  ;;  %s499_s17 = int_to_ptr.vmem [resolvable:$true] %s498_s17 }
  0x3a   : > { %p8833_p10 = scmp.lt.u32.totalorder %s8826_s0, %s11740_s9 }
  0x3b   : > { %p8829_p6 = pnand %p8827_p5, %p9287_p0 }
  0x3d   : > { %p8830_p9 = pneg %p8829_p6 }
  0x3f   : > { %p8835_p13 = pnand %p8833_p10, %p8830_p9 }
  0x41   : > { %8838 = shalt.err (!%p8835_p13)
}
  0x42   : > { %s8839_s20 = scalar_lea.vmem %s473_s29, 256  ;;  %p8847_p4 = scmp.lt.s32.totalorder %s473_s29, %s473_s29 }
  0x43   : > { %p8840_p1 = scmp.ne.s32.totalorder %s473_s29, %s8839_s20  ;;  %p8848_p7 = scmp.lt.s32.totalorder %s8839_s20, %s8839_s20 }
  0x45   : > { %p8842_p2 = pnand %p8840_p1, %p9287_p0  ;;  %p8849_p8 = por %p8848_p7, %p8847_p4 }
  0x47   : > { %p8843_p3 = pneg %p8842_p2 }
  0x49   : > { %p8850_p11 = pnand %p8849_p8, %p8843_p3 }
  0x4b   : > { %8853 = shalt.err (!%p8850_p11)
}
  0x4c   : > { %s11763_s15 = smov 128   ;;  %s11765_s22 = smov 8  }
  0x4d   : > { %8077 = dma.hbm_to_vmem [thread:$0]  (!%p9275_p12), %s11740_s9, 256, %s473_s29, [#allocation9], %s11763_s15, %s11763_s15, %s11765_s22  }
  0x4e   : > { %s8854_s24 = scalar_lea.hbm %s11742_s11, 32 }
  0x4f   : > { %p8855_p5 = scmp.ne.s32.totalorder %s11742_s11, %s8854_s24  ;;  %p8861_p10 = scmp.lt.u32.totalorder %s8854_s24, %s11742_s11 }
  0x51   : > { %p8857_p6 = pnand %p8855_p5, %p9287_p0 }
  0x53   : > { %p8858_p9 = pneg %p8857_p6 }
  0x55   : > { %p8863_p13 = pnand %p8861_p10, %p8858_p9 }
  0x57   : > { %8866 = shalt.err (!%p8863_p13)
}
  0x58   : > { %s8867_s1 = scalar_lea.vmem %s499_s17, 32  ;;  %p8875_p4 = scmp.lt.s32.totalorder %s499_s17, %s499_s17 }
  0x59   : > { %p8868_p1 = scmp.ne.s32.totalorder %s499_s17, %s8867_s1  ;;  %p8876_p7 = scmp.lt.s32.totalorder %s8867_s1, %s8867_s1 }
  0x5b   : > { %p8870_p2 = pnand %p8868_p1, %p9287_p0  ;;  %p8877_p8 = por %p8876_p7, %p8875_p4 }
  0x5d   : > { %p8871_p3 = pneg %p8870_p2 }
  0x5f   : > { %p8878_p11 = pnand %p8877_p8, %p8871_p3 }
  0x61   : > { %8881 = shalt.err (!%p8878_p11)
}
  0x62   : > { %8083 = dma.hbm_to_vmem [thread:$0]  (!%p9275_p12), %s11742_s11, 32, %s499_s17, [#allocation12], %s9108_s21, %s9108_s21, %s9109_s30  }
  0x63   : > { %s9113_s0 = smov [#allocation2]   ;;  %s9114_s24 = smov [#allocation7]  }
  0x64   : > { %s433_s16 = sshll.u32 %s9113_s0, 4  ;;  %s459_s27 = sshll.u32 %s9114_s24, 4  ;;  %s434_s16 = int_to_ptr.vmem [resolvable:$true] %s433_s16  ;;  %s460_s27 = int_to_ptr.vmem [resolvable:$true] %s459_s27 }
  0x65   : > { %s8882_s20 = scalar_lea.hbm %s11737_s6, 1024 }
  0x66   : > { %p8883_p5 = scmp.ne.s32.totalorder %s11737_s6, %s8882_s20  ;;  %p8889_p10 = scmp.lt.u32.totalorder %s8882_s20, %s11737_s6 }
  0x68   : > { %p8885_p6 = pnand %p8883_p5, %p9287_p0 }
  0x6a   : > { %p8886_p9 = pneg %p8885_p6 }
  0x6c   : > { %p8891_p13 = pnand %p8889_p10, %p8886_p9 }
  0x6e   : > { %8894 = shalt.err (!%p8891_p13)
}
  0x6f   : > { %s8895_s21 = scalar_lea.vmem %s434_s16, 1024  ;;  %p8903_p4 = scmp.lt.s32.totalorder %s434_s16, %s434_s16 }
  0x70   : > { %p8896_p1 = scmp.ne.s32.totalorder %s434_s16, %s8895_s21  ;;  %p8904_p7 = scmp.lt.s32.totalorder %s8895_s21, %s8895_s21 }
  0x72   : > { %p8898_p2 = pnand %p8896_p1, %p9287_p0  ;;  %p8905_p8 = por %p8904_p7, %p8903_p4 }
  0x74   : > { %p8899_p3 = pneg %p8898_p2 }
  0x76   : > { %p8906_p11 = pnand %p8905_p8, %p8899_p3 }
  0x78   : > { %8909 = shalt.err (!%p8906_p11)
}
  0x79   : > { %s11817_s30 = smov 8   ;;  %s11818_s17 = smov 128  }
  0x7a   : > { %8068 = dma.hbm_to_vmem [thread:$0]  (!%p9275_p12), %s11737_s6, 1024, %s434_s16, [#allocation3], %s11818_s17, %s11818_s17, %s11817_s30  }
  0x7b   : > { %s8910_s24 = scalar_lea.hbm %s11739_s8, 256 }
  0x7c   : > { %p8911_p5 = scmp.ne.s32.totalorder %s11739_s8, %s8910_s24  ;;  %p8917_p10 = scmp.lt.u32.totalorder %s8910_s24, %s11739_s8 }
  0x7e   : > { %p8913_p6 = pnand %p8911_p5, %p9287_p0 }
  0x80   : > { %p8914_p9 = pneg %p8913_p6 }
  0x82   : > { %p8919_p13 = pnand %p8917_p10, %p8914_p9 }
  0x84   : > { %8922 = shalt.err (!%p8919_p13)
}
  0x85   : > { %s8923_s29 = scalar_lea.vmem %s460_s27, 256  ;;  %p8931_p4 = scmp.lt.s32.totalorder %s460_s27, %s460_s27 }
  0x86   : > { %p8924_p1 = scmp.ne.s32.totalorder %s460_s27, %s8923_s29  ;;  %p8932_p7 = scmp.lt.s32.totalorder %s8923_s29, %s8923_s29 }
  0x88   : > { %p8926_p2 = pnand %p8924_p1, %p9287_p0  ;;  %p8933_p8 = por %p8932_p7, %p8931_p4 }
  0x8a   : > { %p8927_p3 = pneg %p8926_p2 }
  0x8c   : > { %p8934_p11 = pnand %p8933_p8, %p8927_p3 }
  0x8e   : > { %8937 = shalt.err (!%p8934_p11)
}
  0x8f   : > { %8074 = dma.hbm_to_vmem [thread:$0]  (!%p9275_p12), %s11739_s8, 256, %s460_s27, [#allocation6], %s11818_s17, %s11818_s17, %s11817_s30  }
  0x90   : > { %s9115_s15 = smov [#allocation10]   ;;  %s9116_s14 = smov [#allocation13]  }
  0x91   : > { %s485_s22 = sshll.u32 %s9115_s15, 4  ;;  %s511_s0 = sshll.u32 %s9116_s14, 4  ;;  %s486_s22 = int_to_ptr.vmem [resolvable:$true] %s485_s22  ;;  %s512_s0 = int_to_ptr.vmem [resolvable:$true] %s511_s0 }
  0x92   : > { %s8938_s23 = scalar_lea.hbm %s11741_s10, 1024 }
  0x93   : > { %p8939_p5 = scmp.ne.s32.totalorder %s11741_s10, %s8938_s23  ;;  %p8945_p10 = scmp.lt.u32.totalorder %s8938_s23, %s11741_s10 }
  0x95   : > { %p8941_p6 = pnand %p8939_p5, %p9287_p0 }
  0x97   : > { %p8942_p9 = pneg %p8941_p6 }
  0x99   : > { %p8947_p13 = pnand %p8945_p10, %p8942_p9 }
  0x9b   : > { %8950 = shalt.err (!%p8947_p13)
}
  0x9c   : > { %s8951_s27 = scalar_lea.vmem %s486_s22, 1024  ;;  %p8959_p4 = scmp.lt.s32.totalorder %s486_s22, %s486_s22 }
  0x9d   : > { %p8952_p1 = scmp.ne.s32.totalorder %s486_s22, %s8951_s27  ;;  %p8960_p7 = scmp.lt.s32.totalorder %s8951_s27, %s8951_s27 }
  0x9f   : > { %p8954_p2 = pnand %p8952_p1, %p9287_p0  ;;  %p8961_p8 = por %p8960_p7, %p8959_p4 }
  0xa1   : > { %p8955_p3 = pneg %p8954_p2 }
  0xa3   : > { %p8962_p11 = pnand %p8961_p8, %p8955_p3 }
  0xa5   : > { %8965 = shalt.err (!%p8962_p11)
}
  0xa6   : > { %8080 = dma.hbm_to_vmem [thread:$0]  (!%p9275_p12), %s11741_s10, 1024, %s486_s22, [#allocation9], %s11818_s17, %s11818_s17, %s11817_s30  }
  0xa7   : > { %s8966_s28 = scalar_lea.hbm %s11743_s12, 256 }
  0xa8   : > { %p8967_p5 = scmp.ne.s32.totalorder %s11743_s12, %s8966_s28  ;;  %p8973_p10 = scmp.lt.u32.totalorder %s8966_s28, %s11743_s12 }
  0xaa   : > { %p8969_p6 = pnand %p8967_p5, %p9287_p0 }
  0xac   : > { %p8970_p9 = pneg %p8969_p6 }
  0xae   : > { %p8975_p13 = pnand %p8973_p10, %p8970_p9 }
  0xb0   : > { %8978 = shalt.err (!%p8975_p13)
}
  0xb1   : > { %s8979_s16 = scalar_lea.vmem %s512_s0, 256  ;;  %p8987_p4 = scmp.lt.s32.totalorder %s512_s0, %s512_s0 }
  0xb2   : > { %p8980_p1 = scmp.ne.s32.totalorder %s512_s0, %s8979_s16  ;;  %p8988_p7 = scmp.lt.s32.totalorder %s8979_s16, %s8979_s16 }
  0xb4   : > { %p8982_p2 = pnand %p8980_p1, %p9287_p0  ;;  %p8989_p8 = por %p8988_p7, %p8987_p4 }
  0xb6   : > { %p8983_p3 = pneg %p8982_p2 }
  0xb8   : > { %p8990_p11 = pnand %p8989_p8, %p8983_p3 }
  0xba   : > { %8993 = shalt.err (!%p8990_p11)
}
  0xbb   : > { %8086 = dma.hbm_to_vmem [thread:$0]  (!%p9275_p12), %s11743_s12, 256, %s512_s0, [#allocation12], %s11818_s17, %s11818_s17, %s11817_s30  }
  0xbc   : > { %s9117_s21 = smov [#allocation14]   ;;  %s8994_s28 = scalar_lea.hbm %s11744_s13, 256 }
  0xbd   : > { %s524_s15 = sshll.u32 %s9117_s21, 4  ;;  %p8995_p5 = scmp.ne.s32.totalorder %s11744_s13, %s8994_s28  ;;  %s525_s15 = int_to_ptr.vmem [resolvable:$true] %s524_s15 }
  0xbe   : > { %p9001_p10 = scmp.lt.u32.totalorder %s8994_s28, %s11744_s13 }
  0xbf   : > { %p8997_p6 = pnand %p8995_p5, %p9287_p0 }
  0xc1   : > { %p8998_p9 = pneg %p8997_p6 }
  0xc3   : > { %p9003_p13 = pnand %p9001_p10, %p8998_p9 }
  0xc5   : > { %9006 = shalt.err (!%p9003_p13)
}
  0xc6   : > { %s9007_s0 = scalar_lea.vmem %s525_s15, 256  ;;  %p9015_p4 = scmp.lt.s32.totalorder %s525_s15, %s525_s15 }
  0xc7   : > { %p9008_p1 = scmp.ne.s32.totalorder %s525_s15, %s9007_s0  ;;  %p9016_p7 = scmp.lt.s32.totalorder %s9007_s0, %s9007_s0 }
  0xc9   : > { %p9010_p2 = pnand %p9008_p1, %p9287_p0  ;;  %p9017_p8 = por %p9016_p7, %p9015_p4 }
  0xcb   : > { %p9011_p3 = pneg %p9010_p2 }
  0xcd   : > { %p9018_p11 = pnand %p9017_p8, %p9011_p3 }
  0xcf   : > { %9021 = shalt.err (!%p9018_p11)
}
  0xd0   : > { %8089 = dma.hbm_to_vmem [thread:$0]  (!%p9275_p12), %s11744_s13, 256, %s525_s15, [#allocation15], %s11818_s17, %s11818_s17, %s11817_s30  }
  0xd1   : > { %p11819_p5 = scmp.ne.s32.totalorder %s11814_s18, 0 }
  0xd3   : > { %555 = sbr.rel (%p11819_p5) target bundleno = 6632 (0x19e8), region = 84 }
  0xda   : > { %p11820_p0 = scmp.eq.s32.totalorder %s9239_s25, 0 }
  0xdc   : > { %9067 = dma.done.wait (%p11820_p0), [#allocation3], 1024   ;;  %p11821_p6 = pmov %p11820_p0 }
  0xdd   : > { %p11822_p9 = pmov %p11820_p0 }
  0xde   : > { %9069 = vsyncadd (%p11821_p6), [#allocation3], 4294966272 }
  0xdf   : > { %9071 = dma.done.wait (%p11822_p9), [#allocation6], 288   ;;  %p11823_p10 = pmov %p11820_p0 }
  0xe0   : > { %p11824_p13 = pmov %p11820_p0 }
  0xe1   : > { %9073 = vsyncadd (%p11823_p10), [#allocation6], 4294967008 }
  0xe2   : > { %9075 = dma.done.wait (%p11824_p13), [#allocation9], 1280   ;;  %p11825_p12 = pmov %p11820_p0 }
  0xe3   : > { %p11826_p1 = pmov %p11820_p0 }
  0xe4   : > { %9077 = vsyncadd (%p11825_p12), [#allocation9], 4294966016 }
  0xe5   : > { %9079 = dma.done.wait (%p11826_p1), [#allocation12], 288   ;;  %p11827_p2 = pmov %p11820_p0 }
  0xe6   : > { %p11828_p3 = pmov %p11820_p0 }
  0xe7   : > { %9081 = vsyncadd (%p11827_p2), [#allocation12], 4294967008 }
  0xe8   : > { %9083 = dma.done.wait (%p11828_p3), [#allocation15], 256   ;;  %p11829_p4 = pmov %p11820_p0 }
  0xe9   : > { %s6340_s18 = sshll.u32 %s9239_s25, 3  ;;  %v9118_v0 = vmov 0   ;;  %s11830_s17 = sld [smem:[#allocation51_spill]]  ;;  %v689_v5 = vld [vmem:[%s11733_s2] sm:$0xff]  ;;  %v690_v6 = vld [vmem:[%s11733_s2 + $0x8] sm:$0xff]  ;;  %v691_v7 = vld [vmem:[%s11733_s2 + $0x10] sm:$0xff]  ;;  %v647_v39 = vlaneseq }
  0xea   : > { %9085 = vsyncadd (%p11829_p4), [#allocation15], 4294967040  ;;  %8170 = vset.pattern.permute.xlu1 %v9118_v0  ;;  %8169 = vset.pattern.permute.xlu0 %v9118_v0  ;;  %p634_p7 = scmp.lt.s32.totalorder %s6340_s18, 15  ;;  %v692_v8 = vld [vmem:[%s11733_s2 + $0x18] sm:$0xff]  ;;  %v7543_v9 = vpack.c.bf16 %v690_v6, %v689_v5  ;;  %v693_v11 = vld [vmem:[%s11733_s2 + $0x20] sm:$0xff]  ;;  %v9119_v43 = vmov 1.0  }
  0xeb   : > { %v7547_v10 = vpack.c.bf16 %v692_v8, %v691_v7  ;;  %v694_v12 = vld [vmem:[%s11733_s2 + $0x28] sm:$0xff]  ;;  %v695_v16 = vld [vmem:[%s11733_s2 + $0x30] sm:$0xff]  ;;  %v696_v17 = vld [vmem:[%s11733_s2 + $0x38] sm:$0xff]  ;;  %v648_v40 = vand.u32 127, %v647_v39  ;;  %v11769_v56 = vmov 0.0   ;;  %vm846_vm8 = vcmask 261120  }
  0xec   : > { %s11914_s18 = smov (!%p634_p7, %s6340_s18), 15  ;;  %7544 = vmatprep.subr.bf16.mxu0 %v7543_v9  ;;  %v7551_v15 = vpack.c.bf16 %v694_v12, %v693_v11  ;;  %v7555_v20 = vpack.c.bf16 %v696_v17, %v695_v16  ;;  %v697_v21 = vld [vmem:[%s11733_s2 + $0x40] sm:$0xff]  ;;  %v698_v22 = vld [vmem:[%s11733_s2 + $0x48] sm:$0xff]  ;;  %v699_v24 = vld [vmem:[%s11733_s2 + $0x50] sm:$0xff]  ;;  %935 = vmatprep.mubr.f32.mxu1 %v11769_v56  ;;  %v9617_v17 = vshrl.u32 %v647_v39, 7  ;;  %vm1008_vm9 = vcmask 64512  }
  0xed   : > { %s6341_s26 = sshll.u32 %s11914_s18, 3  ;;  %7546 = vmatpush3.bf16.msra.mxu0 %v7543_v9  ;;  %v7559_v23 = vpack.c.bf16 %v698_v22, %v697_v21  ;;  %v700_v25 = vld [vmem:[%s11733_s2 + $0x58] sm:$0xff]  ;;  %v827_v26 = vld [vmem:[%s11735_s4 + $0x8] sm:$0xff]  ;;  %v826_v28 = vld [vmem:[%s11735_s4] sm:$0xff]  ;;  %s9121_s18 = smov 88   ;;  %vm1146_vm11 = vcmask 523264  }
  0xee   : > { %7548 = vmatprep.subr.bf16.mxu0 %v7547_v10  ;;  %v829_v27 = vld [vmem:[%s11735_s4 + $0x18] sm:$0xff]  ;;  %v828_v30 = vld [vmem:[%s11735_s4 + $0x10] sm:$0xff]  ;;  %v7563_v31 = vpack.c.bf16 %v700_v25, %v699_v24  ;;  %v701_v33 = vld [vmem:[%s11733_s2 + $0x60] sm:$0xff]  ;;  %11839 = vst [vmem:[#allocation39_spill] sm:$0xff] %v9617_v17  ;;  %v11767_v21 = vsub.s32 1, %v9617_v17  ;;  %s9123_s19 = smov 120  }
  0xef   : > { %s637_s27 = scalar_lea.vmem %s11830_s17, %s6341_s26  ;;  %v7575_v29 = vpack.c.bf16 %v829_v27, %v827_v26  ;;  %v7577_v32 = vpack.c.bf16 %v828_v30, %v826_v28  ;;  %v702_v34 = vld [vmem:[%s11733_s2 + $0x68] sm:$0xff]  ;;  %v703_v36 = vld [vmem:[%s11733_s2 + $0x70] sm:$0xff]  ;;  %v704_v37 = vld [vmem:[%s11733_s2 + $0x78] sm:$0xff]  ;;  %s9122_s26 = smov 96   ;;  %vm6043_vm12 = vcmask 785408  }
  0xf0   : > { %v641_v1 = vld [vmem:[%s637_s27 + $0x10] sm:$0xff]  ;;  %v639_v2 = vld [vmem:[%s637_s27] sm:$0xff]  ;;  %v642_v3 = vld [vmem:[%s637_s27 + $0x18] sm:$0xff]  ;;  %v7567_v35 = vpack.c.bf16 %v702_v34, %v701_v33  ;;  %v7571_v38 = vpack.c.bf16 %v704_v37, %v703_v36  ;;  %s9124_s30 = smov 80   ;;  %s9125_s17 = smov 112  }
  0xf1   : > { %656 = vperm.xlu1 %8170, %v641_v1   ;;  %650 = vperm.xlu0 %8169, %v639_v2   ;;  %v640_v4 = vld [vmem:[%s637_s27 + $0x8] sm:$0xff]  ;;  %v643_v14 = vld [vmem:[%s637_s27 + $0x20] sm:$0xff]  ;;  %v646_v18 = vld [vmem:[%s637_s27 + $0x38] sm:$0xff]  ;;  %s9126_s21 = smov 32   ;;  %s11850_s24 = sld [smem:[#allocation52_spill]] }
  0xf2   : > { %v644_v13 = vld [vmem:[%s637_s27 + $0x28] sm:$0xff]  ;;  %v645_v19 = vld [vmem:[%s637_s27 + $0x30] sm:$0xff]  ;;  %7550 = vmatpush3.bf16.msra.mxu0 %v7547_v10  ;;  %7576 = vmatprep.subr.bf16.mxu1 %v7575_v29  ;;  %v833_v51 = vld [vmem:[%s11735_s4 + $0x38] sm:$0xff]  ;;  %s9127_s23 = smov 64   ;;  %s9128_s29 = smov 72  }
  0xf3   : > { %7552 = vmatprep.subr.bf16.mxu0 %v7551_v15  ;;  %7578 = vmatpush1.bf16.msra.mxu1 %v7577_v32  ;;  %v831_v50 = vld [vmem:[%s11735_s4 + $0x28] sm:$0xff]  ;;  %v830_v53 = vld [vmem:[%s11735_s4 + $0x20] sm:$0xff]  ;;  %v832_v54 = vld [vmem:[%s11735_s4 + $0x30] sm:$0xff]  ;;  %s9129_s0 = smov 104   ;;  %s6605_s15 = sshll.u32 %s9239_s25, 7 }
  0xf4   : > { %v7579_v52 = vpack.c.bf16 %v833_v51, %v831_v50  ;;  %v7581_v55 = vpack.c.bf16 %v832_v54, %v830_v53  ;;  %v705_v57 = vld [vmem:[%s11734_s3] sm:$0xff]  ;;  %v706_v61 = vld [vmem:[%s11734_s3 + $0x8] sm:$0xff]  ;;  %v707_v1 = vld [vmem:[%s11734_s3 + $0x10] sm:$0xff]  ;;  %s11903_s1 = sld [smem:[#allocation55_spill]]  ;;  %s9132_s25 = smov [#allocation16]  }
  0xf5   : > { %659 = vperm.xlu1 %8170, %v642_v3   ;;  %653 = vperm.xlu0 %8169, %v640_v4   ;;  %v708_v5 = vld [vmem:[%s11734_s3 + $0x18] sm:$0xff]  ;;  %v709_v9 = vld [vmem:[%s11734_s3 + $0x20] sm:$0xff]  ;;  %v710_v11 = vld [vmem:[%s11734_s3 + $0x28] sm:$0xff] }
  0xf6   : > { %7554 = vmatpush3.bf16.msra.mxu0 %v7551_v15  ;;  %7580 = vmatprep.subr.bf16.mxu1 %v7579_v52  ;;  %v712_v15 = vld [vmem:[%s11734_s3 + $0x38] sm:$0xff]  ;;  %vm9768_vm10 = vmpackc.low %vm1008_vm9, %vm1008_vm9 }
  0xf7   : > { %7556 = vmatprep.subr.bf16.mxu0 %v7555_v20  ;;  %7582 = vmatpush1.bf16.msra.mxu1 %v7581_v55  ;;  %s11851_s28 = smov %s11850_s24 }
  0xf9   : > { %665 = vperm.xlu1 %8170, %v644_v13   ;;  %662 = vperm.xlu0 %8169, %v643_v14   ;;  %v711_v13 = vld [vmem:[%s11734_s3 + $0x30] sm:$0xff] }
  0xfa   : > { %7558 = vmatpush3.bf16.msra.mxu0 %v7555_v20  ;;  %s11689_s16 = scalar_lea.hbm %s11903_s1, %s6605_s15 }
  0xfb   : > { %7560 = vmatprep.subr.bf16.mxu0 %v7559_v23 }
  0xfd   : > { %671 = vperm.xlu1 %8170, %v646_v18   ;;  %668 = vperm.xlu0 %8169, %v645_v19   ;;  %v11768_v18 = vsub.s32 0, %v9617_v17  ;;  %v834_v19 = vld [vmem:[%s11736_s5] sm:$0x3] }
  0xfe   : > { %7562 = vmatpush3.bf16.msra.mxu0 %v7559_v23  ;;  %v843_v25 = vrot.slane %v834_v19, %v11767_v21 }
  0xff   : > { %7564 = vmatprep.subr.bf16.mxu0 %v7563_v31  ;;  %v839_v20 = vrot.slane %v834_v19, %v11768_v18 }
 0x102   : > { %7566 = vmatpush3.bf16.msra.mxu0 %v7563_v31 }
 0x103   : > { %7568 = vmatprep.subr.bf16.mxu0 %v7567_v35 }
 0x106   : > { %7570 = vmatpush3.bf16.msra.mxu0 %v7567_v35 }
 0x107   : > { %7572 = vmatprep.subr.bf16.mxu0 %v7571_v38 }
 0x10a   : > { %7574 = vmatpush3.bf16.msra.mxu0 %v7571_v38 }
 0x170   : > { %v657_v41 = vpop.permute.xlu1 %656  ;;  %v651_v42 = vpop.permute.xlu0 %650 }
 0x171   : > { %vm673_vm0 = vcmp.eq.s32.totalorder %v648_v40, %v651_v42  ;;  %vm675_vm1 = vcmp.eq.s32.totalorder %v648_v40, %v657_v41 }
 0x172   : > { %7003 = vmatprep.mubr.msk.f32.mxu0 %vm673_vm0, %v9119_v43 }
 0x174   : > { %v660_v44 = vpop.permute.xlu1 %659  ;;  %v654_v45 = vpop.permute.xlu0 %653 }
 0x175   : > { %vm674_vm2 = vcmp.eq.s32.totalorder %v648_v40, %v654_v45  ;;  %vm676_vm3 = vcmp.eq.s32.totalorder %v648_v40, %v660_v44 }
 0x176   : > { %7004 = vmatmul.mubr.msk.f32.vlgmr.msra.gmra.mrb[0].mxu0 %vm674_vm2, %v9119_v43 }
 0x177   : > { %7006 = vmatprep.mubr.msk.f32.mxu0 %vm675_vm1, %v9119_v43 }
 0x178   : > { %v666_v46 = vpop.permute.xlu1 %665  ;;  %v663_v47 = vpop.permute.xlu0 %662 }
 0x179   : > { %vm677_vm4 = vcmp.eq.s32.totalorder %v648_v40, %v663_v47  ;;  %vm678_vm5 = vcmp.eq.s32.totalorder %v648_v40, %v666_v46 }
 0x17a   : > { %7007 = vmatmul.mubr.msk.f32.gmra.mrb[2].mxu0 %vm676_vm3, %v9119_v43 }
 0x17b   : > { %7009 = vmatprep.mubr.msk.f32.mxu0 %vm677_vm4, %v9119_v43 }
 0x17c   : > { %v669_v48 = vpop.permute.xlu0 %668  ;;  %v672_v49 = vpop.permute.xlu1 %671 }
 0x17d   : > { %vm679_vm6 = vcmp.eq.s32.totalorder %v648_v40, %v669_v48  ;;  %vm680_vm7 = vcmp.eq.s32.totalorder %v648_v40, %v672_v49 }
 0x17e   : > { %7010 = vmatmul.mubr.msk.f32.gmra.mrb[4].mxu0 %vm678_vm5, %v9119_v43 }
 0x17f   : > { %7012 = vmatprep.mubr.msk.f32.mxu0 %vm679_vm6, %v9119_v43 }
 0x182   : > { %7013 = vmatmul.mubr.msk.f32.gmra.mrb[6].mxu0 %vm680_vm7, %v9119_v43 }
 0x249   : > { %v7005_v58 = vpop.f32.mrb[0].mxu0 }
 0x24a   : > { %v779_v59 = vpop.f32.mrb[1].mxu0  ;;  %v9564_v0 = vadd.f32 %v7005_v58, %v706_v61 }
 0x24b   : > { %v9556_v60 = vadd.f32 %v779_v59, %v705_v57 }
 0x24c   : > { %11832 = vst [vmem:[#allocation32_spill] sm:$0xff] %v9564_v0 }
 0x24d   : > { %11831 = vst [vmem:[#allocation31_spill] sm:$0xff] %v9556_v60  ;;  %v7008_v62 = vpop.f32.mrb[2].mxu0  ;;  %6350 = vmatmul.mubr.msk.f32.vlgmr.msra.gmra.mrb[0].mxu1 %vm846_vm8, %v9556_v60 }
 0x24e   : > { %v789_v63 = vpop.f32.mrb[3].mxu0  ;;  %941 = vmatprep.mubr.f32.mxu1 %v11769_v56  ;;  %v9580_v8 = vadd.f32 %v7008_v62, %v708_v5 }
 0x24f   : > { %v9572_v4 = vadd.f32 %v789_v63, %v707_v1 }
 0x250   : > { %11834 = vst [vmem:[#allocation34_spill] sm:$0xff] %v9580_v8 }
 0x251   : > { %v7011_v2 = vpop.f32.mrb[4].mxu0  ;;  %6351 = vmatmul.mubr.msk.f32.gmra.mrb[2].mxu1 %vm846_vm8, %v9564_v0  ;;  %11833 = vst [vmem:[#allocation33_spill] sm:$0xff] %v9572_v4 }
 0x252   : > { %v799_v3 = vpop.f32.mrb[5].mxu0  ;;  %947 = vmatprep.mubr.f32.mxu1 %v11769_v56  ;;  %v9596_v12 = vadd.f32 %v7011_v2, %v710_v11 }
 0x253   : > { %v9588_v10 = vadd.f32 %v799_v3, %v709_v9 }
 0x254   : > { %11836 = vst [vmem:[#allocation36_spill] sm:$0xff] %v9596_v12 }
 0x255   : > { %v7014_v6 = vpop.f32.mrb[6].mxu0  ;;  %6352 = vmatmul.mubr.msk.f32.gmra.mrb[4].mxu1 %vm846_vm8, %v9572_v4  ;;  %11835 = vst [vmem:[#allocation35_spill] sm:$0xff] %v9588_v10 }
 0x256   : > { %v809_v7 = vpop.f32.mrb[7].mxu0  ;;  %953 = vmatprep.mubr.f32.mxu1 %v11769_v56  ;;  %v9612_v16 = vadd.f32 %v7014_v6, %v712_v15 }
 0x257   : > { %v9604_v14 = vadd.f32 %v809_v7, %v711_v13 }
 0x258   : > { %11838 = vst [vmem:[#allocation38_spill] sm:$0xff] %v9612_v16 }
 0x259   : > { %6353 = vmatmul.mubr.msk.f32.gmra.mrb[6].mxu1 %vm846_vm8, %v9580_v8  ;;  %11837 = vst [vmem:[#allocation37_spill] sm:$0xff] %v9604_v14 }
 0x25a   : > { %959 = vmatprep.mubr.f32.mxu1 %v11769_v56 }
 0x25d   : > { %6354 = vmatmul.mubr.msk.f32.gmra.mrb[8].mxu1 %vm846_vm8, %v9588_v10 }
 0x25e   : > { %965 = vmatprep.mubr.f32.mxu1 %v11769_v56 }
 0x261   : > { %6355 = vmatmul.mubr.msk.f32.gmra.mrb[10].mxu1 %vm846_vm8, %v9596_v12 }
 0x262   : > { %971 = vmatprep.mubr.f32.mxu1 %v11769_v56 }
 0x265   : > { %6356 = vmatmul.mubr.msk.f32.gmra.mrb[12].mxu1 %vm846_vm8, %v9604_v14 }
 0x266   : > { %977 = vmatprep.mubr.f32.mxu1 %v11769_v56 }
 0x269   : > { %6357 = vmatmul.mubr.msk.f32.gmra.mrb[14].mxu1 %vm846_vm8, %v9612_v16 }
 0x320   : > { %v937_v22 = vpop.f32.mrb[0].mxu1 }
 0x321   : > { %v9626_v23 = vadd.f32 %v937_v22, %v839_v20  ;;  %v939_v24 = vpop.f32.mrb[1].mxu1 }
 0x322   : > { %v9634_v29 = vadd.f32 %v939_v24, %v843_v25 }
 0x323   : > { %7031 = vmatprep.mubr.msk.f32.mxu1 %vm1008_vm9, %v9626_v23 }
 0x324   : > { %v943_v26 = vpop.f32.mrb[2].mxu1  ;;  %11840 = vst [vmem:[#allocation40_spill] sm:$0xff] %v9634_v29 }
 0x325   : > { %v9632_v27 = vadd.f32 %v943_v26, %v839_v20  ;;  %v945_v28 = vpop.f32.mrb[3].mxu1 }
 0x326   : > { %v9636_v30 = vadd.f32 %v945_v28, %v843_v25 }
 0x327   : > { %v9640_v31 = vpack.i.bf16 %v9632_v27, %v9626_v23 }
 0x328   : > { %11841 = vst [vmem:[#allocation41_spill] sm:$0xff] %v9636_v30  ;;  %v9646_v33 = vpack.c.bf16 %v9636_v30, %v9634_v29  ;;  %v949_v34 = vpop.f32.mrb[4].mxu1 }
 0x329   : > { %v951_v35 = vpop.f32.mrb[5].mxu1  ;;  %8172 = vrot.lane.b32.xlu0 %v9640_v31, %s9121_s18  ;;  %v9652_v38 = vadd.f32 %v949_v34, %v839_v20 }
 0x32a   : > { %v9650_v36 = vadd.f32 %v951_v35, %v843_v25 }
 0x32c   : > { %11842 = vst [vmem:[#allocation42_spill] sm:$0xff] %v9650_v36  ;;  %v955_v37 = vpop.f32.mrb[6].mxu1 }
 0x32d   : > { %v9654_v39 = vadd.f32 %v955_v37, %v839_v20  ;;  %v957_v40 = vpop.f32.mrb[7].mxu1  ;;  %8182 = vrot.lane.b32.xlu0 %v9640_v31, %s9122_s26 }
 0x32e   : > { %v9658_v41 = vadd.f32 %v957_v40, %v843_v25 }
 0x32f   : > { %v9662_v42 = vpack.i.bf16 %v9654_v39, %v9652_v38 }
 0x330   : > { %11843 = vst [vmem:[#allocation43_spill] sm:$0xff] %v9658_v41  ;;  %v9668_v44 = vpack.c.bf16 %v9658_v41, %v9650_v36  ;;  %v961_v45 = vpop.f32.mrb[8].mxu1 }
 0x331   : > { %8177 = vrot.lane.b32.xlu1 %v9662_v42, %s9121_s18  ;;  %8192 = vrot.lane.b32.xlu0 %v9662_v42, %s9122_s26  ;;  %v963_v46 = vpop.f32.mrb[9].mxu1  ;;  %v9676_v49 = vadd.f32 %v961_v45, %v839_v20 }
 0x332   : > { %v9674_v47 = vadd.f32 %v963_v46, %v843_v25 }
 0x334   : > { %11844 = vst [vmem:[#allocation44_spill] sm:$0xff] %v9674_v47  ;;  %v967_v48 = vpop.f32.mrb[10].mxu1 }
 0x335   : > { %v9678_v50 = vadd.f32 %v967_v48, %v839_v20  ;;  %v969_v51 = vpop.f32.mrb[11].mxu1 }
 0x336   : > { %v9680_v52 = vadd.f32 %v969_v51, %v843_v25 }
 0x337   : > { %v9684_v53 = vpack.i.bf16 %v9678_v50, %v9676_v49 }
 0x338   : > { %11845 = vst [vmem:[#allocation45_spill] sm:$0xff] %v9680_v52  ;;  %v9690_v55 = vpack.c.bf16 %v9680_v52, %v9674_v47  ;;  %v973_v57 = vpop.f32.mrb[12].mxu1 }
 0x339   : > { %8197 = vrot.lane.b32.xlu0 %v9684_v53, %s9122_s26  ;;  %8187 = vrot.lane.b32.xlu1 %v9684_v53, %s9121_s18  ;;  %v975_v58 = vpop.f32.mrb[13].mxu1  ;;  %v9698_v62 = vadd.f32 %v973_v57, %v839_v20 }
 0x33a   : > { %v9696_v59 = vadd.f32 %v975_v58, %v843_v25 }
 0x33c   : > { %11846 = vst [vmem:[#allocation46_spill] sm:$0xff] %v9696_v59  ;;  %v979_v61 = vpop.f32.mrb[14].mxu1 }
 0x33d   : > { %v9700_v63 = vadd.f32 %v979_v61, %v839_v20  ;;  %1237 = vrot.lane.b32.xlu0 %v9632_v27, %s9123_s19  ;;  %v981_v1 = vpop.f32.mrb[15].mxu1 }
 0x33e   : > { %v9704_v2 = vadd.f32 %v981_v1, %v843_v25 }
 0x33f   : > { %v9708_v3 = vpack.i.bf16 %v9700_v63, %v9698_v62 }
 0x340   : > { %11847 = vst [vmem:[#allocation47_spill] sm:$0xff] %v9704_v2  ;;  %v9714_v6 = vpack.c.bf16 %v9704_v2, %v9696_v59 }
 0x341   : > { %8207 = vrot.lane.b32.xlu0 %v9640_v31, %s9124_s30  ;;  %8202 = vrot.lane.b32.xlu1 %v9708_v3, %s9121_s18 }
 0x345   : > { %8212 = vrot.lane.b32.xlu0 %v9708_v3, %s9122_s26  ;;  %1235 = vrot.lane.b32.xlu1 %v9626_v23, %s9123_s19 }
 0x349   : > { %1245 = vrot.lane.b32.xlu0 %v9678_v50, %s9123_s19  ;;  %1239 = vrot.lane.b32.xlu1 %v9652_v38, %s9123_s19 }
 0x34d   : > { %8217 = vrot.lane.b32.xlu0 %v9662_v42, %s9124_s30  ;;  %1241 = vrot.lane.b32.xlu1 %v9654_v39, %s9123_s19 }
 0x351   : > { %8222 = vrot.lane.b32.xlu0 %v9684_v53, %s9124_s30  ;;  %1243 = vrot.lane.b32.xlu1 %v9676_v49, %s9123_s19 }
 0x355   : > { %1798 = vrot.lane.b32.xlu0 %v9626_v23, %s9125_s17  ;;  %1247 = vrot.lane.b32.xlu1 %v9698_v62, %s9123_s19 }
 0x359   : > { %1802 = vrot.lane.b32.xlu0 %v9652_v38, %s9125_s17  ;;  %1249 = vrot.lane.b32.xlu1 %v9700_v63, %s9123_s19 }
 0x35d   : > { %1806 = vrot.lane.b32.xlu0 %v9676_v49, %s9125_s17  ;;  %8227 = vrot.lane.b32.xlu1 %v9708_v3, %s9124_s30 }
 0x361   : > { %1810 = vrot.lane.b32.xlu0 %v9698_v62, %s9125_s17  ;;  %1800 = vrot.lane.b32.xlu1 %v9632_v27, %s9125_s17 }
 0x365   : > { %8237 = vrot.lane.b32.xlu0 %v9662_v42, %s9126_s21  ;;  %1804 = vrot.lane.b32.xlu1 %v9654_v39, %s9125_s17 }
 0x369   : > { %8247 = vrot.lane.b32.xlu0 %v9708_v3, %s9126_s21  ;;  %1808 = vrot.lane.b32.xlu1 %v9678_v50, %s9125_s17 }
 0x36d   : > { %1812 = vrot.lane.b32.xlu1 %v9700_v63, %s9125_s17 }
 0x371   : > { %8232 = vrot.lane.b32.xlu1 %v9640_v31, %s9126_s21 }
 0x375   : > { %8242 = vrot.lane.b32.xlu1 %v9684_v53, %s9126_s21 }
 0x39b   : > { %v8173_v7 = vpop.permute.xlu0 %8172 }
 0x39c   : > { %v8175_v9 = vunpack.i.h.bf16 %v8173_v7  ;;  %v8174_v11 = vunpack.i.l.bf16 %v8173_v7 }
 0x39e   : > { %v7607_v15 = vpack.c.bf16 %v8175_v9, %v8174_v11 }
 0x39f   : > { %v8183_v19 = vpop.permute.xlu0 %8182 }
 0x3a0   : > { %v8185_v20 = vunpack.i.h.bf16 %v8183_v19  ;;  %v8184_v22 = vunpack.i.l.bf16 %v8183_v19  ;;  %7609 = vmatprep.subr.msk.bf16.mxu0 %vm9768_vm10, %v7607_v15 }
 0x3a1   : > { %7612 = vmatpush3.bf16.xpose.msk.msra.mxu0 %vm9768_vm10, %v7607_v15 }
 0x3a2   : > { %v7583_v24 = vpack.c.bf16 %v8185_v20, %v8184_v22 }
 0x3a3   : > { %v8178_v25 = vpop.permute.xlu1 %8177  ;;  %v8193_v26 = vpop.permute.xlu0 %8192 }
 0x3a4   : > { %v8180_v28 = vunpack.i.h.bf16 %v8178_v25  ;;  %v8179_v34 = vunpack.i.l.bf16 %v8178_v25  ;;  %v8195_v35 = vunpack.i.h.bf16 %v8193_v26  ;;  %v8194_v37 = vunpack.i.l.bf16 %v8193_v26  ;;  %7585 = vmatprep.subr.msk.bf16.mxu1 %vm9768_vm10, %v7583_v24 }
 0x3a5   : > { %7588 = vmatpush3.bf16.xpose.msk.msra.mxu1 %vm9768_vm10, %v7583_v24 }
 0x3a6   : > { %v7613_v40 = vpack.c.bf16 %v8180_v28, %v8179_v34  ;;  %v7589_v45 = vpack.c.bf16 %v8195_v35, %v8194_v37 }
 0x3a8   : > { %7591 = vmatprep.subr.msk.bf16.mxu1 %vm9768_vm10, %v7589_v45  ;;  %7615 = vmatprep.subr.msk.bf16.mxu0 %vm9768_vm10, %v7613_v40 }
 0x3a9   : > { %7618 = vmatpush3.bf16.xpose.msk.msra.mxu0 %vm9768_vm10, %v7613_v40 }
 0x3ab   : > { %v8188_v46 = vpop.permute.xlu1 %8187  ;;  %v8198_v48 = vpop.permute.xlu0 %8197 }
 0x3ac   : > { %v8190_v51 = vunpack.i.h.bf16 %v8188_v46  ;;  %v8189_v57 = vunpack.i.l.bf16 %v8188_v46  ;;  %v8200_v58 = vunpack.i.h.bf16 %v8198_v48  ;;  %v8199_v61 = vunpack.i.l.bf16 %v8198_v48 }
 0x3ad   : > { %7594 = vmatpush3.bf16.xpose.msk.msra.mxu1 %vm9768_vm10, %v7589_v45 }
 0x3ae   : > { %v7619_v1 = vpack.c.bf16 %v8190_v51, %v8189_v57  ;;  %v7595_v7 = vpack.c.bf16 %v8200_v58, %v8199_v61 }
 0x3af   : > { %v1238_v9 = vpop.permute.xlu0 %1237 }
 0x3b0   : > { %7597 = vmatprep.subr.msk.bf16.mxu1 %vm9768_vm10, %v7595_v7  ;;  %7621 = vmatprep.subr.msk.bf16.mxu0 %vm9768_vm10, %v7619_v1 }
 0x3b1   : > { %7624 = vmatpush3.bf16.xpose.msk.msra.mxu0 %vm9768_vm10, %v7619_v1 }
 0x3b3   : > { %v8203_v11 = vpop.permute.xlu1 %8202  ;;  %v8208_v15 = vpop.permute.xlu0 %8207 }
 0x3b4   : > { %v8205_v19 = vunpack.i.h.bf16 %v8203_v11  ;;  %v8204_v20 = vunpack.i.l.bf16 %v8203_v11  ;;  %v8210_v22 = vunpack.i.h.bf16 %v8208_v15  ;;  %v8209_v24 = vunpack.i.l.bf16 %v8208_v15 }
 0x3b5   : > { %7600 = vmatpush3.bf16.xpose.msk.msra.mxu1 %vm9768_vm10, %v7595_v7 }
 0x3b6   : > { %v7625_v25 = vpack.c.bf16 %v8205_v19, %v8204_v20  ;;  %v7663_v34 = vpack.c.bf16 %v8210_v22, %v8209_v24 }
 0x3b7   : > { %v1236_v26 = vpop.permute.xlu1 %1235  ;;  %v8213_v28 = vpop.permute.xlu0 %8212 }
 0x3b8   : > { %v8215_v35 = vunpack.i.h.bf16 %v8213_v28  ;;  %v8214_v37 = vunpack.i.l.bf16 %v8213_v28  ;;  %7627 = vmatprep.subr.msk.bf16.mxu0 %vm9768_vm10, %v7625_v25  ;;  %7059 = vmatprep.mubr.msk.f32.mxu0 %vm1008_vm9, %v1236_v26 }
 0x3b9   : > { %7630 = vmatpush3.bf16.xpose.msk.msra.mxu0 %vm9768_vm10, %v7625_v25 }
 0x3ba   : > { %v7601_v40 = vpack.c.bf16 %v8215_v35, %v8214_v37  ;;  %7665 = vmatprep.subr.msk.bf16.mxu0 %vm9768_vm10, %v7663_v34 }
 0x3bb   : > { %v1240_v45 = vpop.permute.xlu1 %1239  ;;  %v1246_v46 = vpop.permute.xlu0 %1245 }
 0x3bc   : > { %7603 = vmatprep.subr.msk.bf16.mxu1 %vm9768_vm10, %v7601_v40 }
 0x3bd   : > { %7606 = vmatpush3.bf16.xpose.msk.msra.mxu1 %vm9768_vm10, %v7601_v40 }
 0x3bf   : > { %v1242_v48 = vpop.permute.xlu1 %1241  ;;  %v8218_v51 = vpop.permute.xlu0 %8217 }
 0x3c0   : > { %v8220_v57 = vunpack.i.h.bf16 %v8218_v51  ;;  %v8219_v58 = vunpack.i.l.bf16 %v8218_v51  ;;  %7060 = vmatmul.mubr.msk.f32.vlgmr.msra.gmra.mrb[8].mxu0 %vm1008_vm9, %v1238_v9 }
 0x3c1   : > { %7062 = vmatprep.mubr.msk.f32.mxu0 %vm1008_vm9, %v1240_v45  ;;  %7668 = vmatpush3.bf16.xpose.msk.msra.mxu0 %vm9768_vm10, %v7663_v34 }
 0x3c2   : > { %v7669_v61 = vpack.c.bf16 %v8220_v57, %v8219_v58 }
 0x3c3   : > { %v1244_v1 = vpop.permute.xlu1 %1243  ;;  %v8223_v7 = vpop.permute.xlu0 %8222 }
 0x3c4   : > { %7032 = vmatmul.mubr.msk.f32.vlgmr.msra.gmra.mrb[16].mxu1 %vm1008_vm9, %v9632_v27  ;;  %7063 = vmatmul.mubr.msk.f32.gmra.mrb[10].mxu0 %vm1008_vm9, %v1242_v48  ;;  %v8225_v11 = vunpack.i.h.bf16 %v8223_v7  ;;  %v8224_v15 = vunpack.i.l.bf16 %v8223_v7 }
 0x3c5   : > { %7671 = vmatprep.subr.msk.bf16.mxu0 %vm9768_vm10, %v7669_v61  ;;  %7034 = vmatprep.mubr.msk.f32.mxu1 %vm1008_vm9, %v9652_v38 }
 0x3c6   : > { %7065 = vmatprep.mubr.msk.f32.mxu0 %vm1008_vm9, %v1244_v1  ;;  %v7675_v19 = vpack.c.bf16 %v8225_v11, %v8224_v15 }
 0x3c7   : > { %v1248_v9 = vpop.permute.xlu1 %1247  ;;  %v1799_v20 = vpop.permute.xlu0 %1798 }
 0x3c8   : > { %7035 = vmatmul.mubr.msk.f32.gmra.mrb[18].mxu1 %vm1008_vm9, %v9654_v39  ;;  %7066 = vmatmul.mubr.msk.f32.gmra.mrb[12].mxu0 %vm1008_vm9, %v1246_v46 }
 0x3c9   : > { %7037 = vmatprep.mubr.msk.f32.mxu1 %vm1008_vm9, %v9676_v49  ;;  %7068 = vmatprep.mubr.msk.f32.mxu0 %vm1008_vm9, %v1248_v9 }
 0x3ca   : > { %7674 = vmatpush3.bf16.xpose.msk.msra.mxu0 %vm9768_vm10, %v7669_v61 }
 0x3cb   : > { %7677 = vmatprep.subr.msk.bf16.mxu0 %vm9768_vm10, %v7675_v19  ;;  %v1250_v22 = vpop.permute.xlu1 %1249  ;;  %v1803_v24 = vpop.permute.xlu0 %1802 }
 0x3cc   : > { %7038 = vmatmul.mubr.msk.f32.gmra.mrb[20].mxu1 %vm1008_vm9, %v9678_v50  ;;  %7069 = vmatmul.mubr.msk.f32.gmra.mrb[14].mxu0 %vm1008_vm9, %v1250_v22 }
 0x3cd   : > { %7040 = vmatprep.mubr.msk.f32.mxu1 %vm1008_vm9, %v9698_v62  ;;  %7143 = vmatprep.mubr.msk.f32.mxu0 %vm1008_vm9, %v1799_v20 }
 0x3cf   : > { %v8228_v25 = vpop.permute.xlu1 %8227  ;;  %v1807_v37 = vpop.permute.xlu0 %1806 }
 0x3d0   : > { %v8230_v26 = vunpack.i.h.bf16 %v8228_v25  ;;  %v8229_v28 = vunpack.i.l.bf16 %v8228_v25  ;;  %7041 = vmatmul.mubr.msk.f32.gmra.mrb[22].mxu1 %vm1008_vm9, %v9700_v63 }
 0x3d2   : > { %v7681_v34 = vpack.c.bf16 %v8230_v26, %v8229_v28  ;;  %7680 = vmatpush3.bf16.xpose.msk.msra.mxu0 %vm9768_vm10, %v7675_v19 }
 0x3d3   : > { %v1801_v35 = vpop.permute.xlu1 %1800  ;;  %v1811_v45 = vpop.permute.xlu0 %1810 }
 0x3d4   : > { %7683 = vmatprep.subr.msk.bf16.mxu0 %vm9768_vm10, %v7681_v34 }
 0x3d7   : > { %v1805_v40 = vpop.permute.xlu1 %1804  ;;  %v8238_v51 = vpop.permute.xlu0 %8237 }
 0x3d8   : > { %v8240_v58 = vunpack.i.h.bf16 %v8238_v51  ;;  %v8239_v61 = vunpack.i.l.bf16 %v8238_v51 }
 0x3da   : > { %7686 = vmatpush3.bf16.xpose.msk.msra.mxu0 %vm9768_vm10, %v7681_v34  ;;  %v7635_v20 = vpack.c.bf16 %v8240_v58, %v8239_v61  ;;  %v9853_v34 = vld [vmem:[%s11850_s24 + $0x8] sm:$0xff] }
 0x3db   : > { %v1809_v46 = vpop.permute.xlu1 %1808  ;;  %v8248_v22 = vpop.permute.xlu0 %8247 }
 0x3dc   : > { %v8249_v25 = vunpack.i.l.bf16 %v8248_v22 }
 0x3df   : > { %v1813_v48 = vpop.permute.xlu1 %1812 }
 0x3e1   : > { %7144 = vmatmul.mubr.msk.f32.vlgmr.msra.gmra.mrb[16].mxu0 %vm1008_vm9, %v1801_v35 }
 0x3e2   : > { %7146 = vmatprep.mubr.msk.f32.mxu0 %vm1008_vm9, %v1803_v24  ;;  %v8250_v24 = vunpack.i.h.bf16 %v8248_v22  ;;  %v9886_v22 = vld [vmem:[%s11851_s28 + $0x10] sm:$0xff] }
 0x3e3   : > { %v8233_v57 = vpop.permute.xlu1 %8232 }
 0x3e4   : > { %v8235_v1 = vunpack.i.h.bf16 %v8233_v57  ;;  %v8234_v7 = vunpack.i.l.bf16 %v8233_v57  ;;  %v7643_v28 = vpack.c.bf16 %v8250_v24, %v8249_v25  ;;  %v9891_v25 = vld [vmem:[%s11851_s28 + $0x20] sm:$0xff] }
 0x3e5   : > { %7147 = vmatmul.mubr.msk.f32.gmra.mrb[18].mxu0 %vm1008_vm9, %v1805_v40 }
 0x3e6   : > { %7149 = vmatprep.mubr.msk.f32.mxu0 %vm1008_vm9, %v1807_v37  ;;  %v7631_v11 = vpack.c.bf16 %v8235_v1, %v8234_v7 }
 0x3e7   : > { %v8243_v15 = vpop.permute.xlu1 %8242 }
 0x3e8   : > { %v8245_v9 = vunpack.i.h.bf16 %v8243_v15  ;;  %v8244_v19 = vunpack.i.l.bf16 %v8243_v15  ;;  %7632 = vmatprep.subr.bf16.mxu1 %v7631_v11  ;;  %v9879_v15 = vld [vmem:[%s11851_s28 + $0x18] sm:$0xff] }
 0x3e9   : > { %7150 = vmatmul.mubr.msk.f32.gmra.mrb[20].mxu0 %vm1008_vm9, %v1809_v46  ;;  %7634 = vmatpush3.bf16.msra.mxu1 %v7631_v11  ;;  %v9863_v46 = vld [vmem:[%s11851_s28] sm:$0xff] }
 0x3ea   : > { %7152 = vmatprep.mubr.msk.f32.mxu0 %vm1008_vm9, %v1811_v45  ;;  %7636 = vmatprep.subr.bf16.mxu1 %v7635_v20  ;;  %v7639_v26 = vpack.c.bf16 %v8245_v9, %v8244_v19 }
 0x3ed   : > { %7153 = vmatmul.mubr.msk.f32.gmra.mrb[22].mxu0 %vm1008_vm9, %v1813_v48  ;;  %7638 = vmatpush3.bf16.msra.mxu1 %v7635_v20 }
 0x3ee   : > { %7640 = vmatprep.subr.bf16.mxu1 %v7639_v26 }
 0x3f1   : > { %7642 = vmatpush3.bf16.msra.mxu1 %v7639_v26 }
 0x3f2   : > { %7644 = vmatprep.subr.bf16.mxu1 %v7643_v28 }
 0x3f5   : > { %7646 = vmatpush3.bf16.msra.mxu1 %v7643_v28 }
 0x493   : > { %v7061_v35 = vpop.f32.mrb[8].mxu0 }
 0x494   : > { %v9856_v37 = vadd.f32 %v7061_v35, %v9853_v34  ;;  %v1365_v40 = vpop.f32.mrb[9].mxu0 }
 0x495   : > { %v9872_v7 = vadd.f32 %v1365_v40, %v9863_v46 }
 0x496   : > { %v1407_v45 = vsel %vm1146_vm11, %v9856_v37, -inf }
 0x497   : > { %v7033_v48 = vpop.f32.mrb[16].mxu1  ;;  %1408 = vmax.xlane.f32.xlu1 %v1407_v45  ;;  %v7064_v51 = vpop.f32.mrb[10].mxu0  ;;  %v1404_v40 = vsel %vm1146_vm11, %v9872_v7, -inf }
 0x498   : > { %v9866_v57 = vadd.f32 %v7033_v48, %v9853_v34  ;;  %v1107_v58 = vpop.f32.mrb[17].mxu1  ;;  %v1375_v61 = vpop.f32.mrb[11].mxu0  ;;  %v9897_v35 = vadd.f32 %v7064_v51, %v9879_v15 }
 0x499   : > { %v9869_v1 = vadd.f32 %v1107_v58, %v9863_v46  ;;  %v9917_v5 = vadd.f32 %v1375_v61, %v9886_v22 }
 0x49a   : > { %v1150_v11 = vsel %vm1146_vm11, %v9866_v57, -inf  ;;  %v1413_v51 = vsel %vm1146_vm11, %v9897_v35, -inf }
 0x49b   : > { %1151 = vmax.xlane.f32.xlu0 %v1150_v11  ;;  %v7036_v9 = vpop.f32.mrb[18].mxu1  ;;  %v7067_v19 = vpop.f32.mrb[12].mxu0  ;;  %v1147_v20 = vsel %vm1146_vm11, %v9869_v1, -inf  ;;  %v1410_v61 = vsel %vm1146_vm11, %v9917_v5, -inf }
 0x49c   : > { %v1117_v24 = vpop.f32.mrb[19].mxu1  ;;  %1148 = vmax.xlane.f32.xlu1 %v1147_v20  ;;  %v1385_v26 = vpop.f32.mrb[13].mxu0 }
 0x49d   : > { %v9894_v28 = vadd.f32 %v1117_v24, %v9886_v22  ;;  %v9902_v45 = vadd.f32 %v1385_v26, %v9891_v25  ;;  %v9907_v24 = vadd.f32 %v7036_v9, %v9879_v15 }
 0x49f   : > { %v7039_v48 = vpop.f32.mrb[20].mxu1  ;;  %v7070_v58 = vpop.f32.mrb[14].mxu0  ;;  %1405 = vmax.xlane.f32.xlu0 %v1404_v40  ;;  %v1153_v11 = vsel %vm1146_vm11, %v9894_v28, -inf  ;;  %v1416_v40 = vsel %vm1146_vm11, %v9902_v45, -inf  ;;  %v1156_v9 = vsel %vm1146_vm11, %v9907_v24, -inf }
 0x4a0   : > { %v1127_v20 = vpop.f32.mrb[21].mxu1  ;;  %1154 = vmax.xlane.f32.xlu1 %v1153_v11  ;;  %v1395_v21 = vpop.f32.mrb[15].mxu0  ;;  %v9924_v11 = vld [vmem:[%s11851_s28 + $0x28] sm:$0xff] }
 0x4a1   : > { %v9912_v18 = vadd.f32 %v1127_v20, %v9891_v25  ;;  %11852 = vst [vmem:[#allocation48_spill] sm:$0xff] %v9924_v11 }
 0x4a3   : > { %v7042_v26 = vpop.f32.mrb[22].mxu1  ;;  %1414 = vmax.xlane.f32.xlu0 %v1413_v51  ;;  %v1159_v20 = vsel %vm1146_vm11, %v9912_v18, -inf  ;;  %v9929_v51 = vadd.f32 %v7067_v19, %v9924_v11 }
 0x4a4   : > { %v1137_v56 = vpop.f32.mrb[23].mxu1  ;;  %1417 = vmax.xlane.f32.xlu1 %v1416_v40  ;;  %v9934_v40 = vadd.f32 %v7039_v48, %v9924_v11 }
 0x4a5   : > { %v1419_v54 = vsel %vm1146_vm11, %v9929_v51, -inf }
 0x4a6   : > { %v1162_v19 = vsel %vm1146_vm11, %v9934_v40, -inf }
 0x4a7   : > { %1157 = vmax.xlane.f32.xlu0 %v1156_v9  ;;  %v9941_v9 = vld [vmem:[%s11851_s28 + $0x38] sm:$0xff] }
 0x4a8   : > { %1160 = vmax.xlane.f32.xlu1 %v1159_v20  ;;  %11853 = vst [vmem:[#allocation49_spill] sm:$0xff] %v9941_v9  ;;  %v9944_v20 = vadd.f32 %v7070_v58, %v9941_v9  ;;  %v9975_v60 = vadd.f32 %v7042_v26, %v9941_v9 }
 0x4aa   : > { %v1425_v48 = vsel %vm1146_vm11, %v9944_v20, -inf }
 0x4ab   : > { %1411 = vmax.xlane.f32.xlu0 %v1410_v61 }
 0x4af   : > { %1420 = vmax.xlane.f32.xlu0 %v1419_v54 }
 0x4b3   : > { %1163 = vmax.xlane.f32.xlu0 %v1162_v19  ;;  %v9959_v19 = vld [vmem:[%s11851_s28 + $0x30] sm:$0xff] }
 0x4b4   : > { %v7145_v61 = vpop.f32.mrb[16].mxu0  ;;  %11854 = vst [vmem:[#allocation50_spill] sm:$0xff] %v9959_v19  ;;  %v9965_v10 = vadd.f32 %v1137_v56, %v9959_v19 }
 0x4b5   : > { %v1928_v43 = vpop.f32.mrb[17].mxu0  ;;  %v9980_v56 = vadd.f32 %v7145_v61, %v9853_v34 }
 0x4b6   : > { %v9970_v4 = vadd.f32 %v1928_v43, %v9863_v46  ;;  %v1165_v8 = vsel %vm1146_vm11, %v9965_v10, -inf }
 0x4b7   : > { %1426 = vmax.xlane.f32.xlu0 %v1425_v48  ;;  %v9962_v48 = vadd.f32 %v1395_v21, %v9959_v19 }
 0x4b8   : > { %v7148_v32 = vpop.f32.mrb[18].mxu0  ;;  %v1967_v21 = vsel %vm1146_vm11, %v9970_v4, -inf }
 0x4b9   : > { %v1938_v17 = vpop.f32.mrb[19].mxu0  ;;  %8257 = vrot.lane.b32.xlu1 %v9662_v42, %s9127_s23  ;;  %v1422_v12 = vsel %vm1146_vm11, %v9962_v48, -inf  ;;  %v9985_v43 = vadd.f32 %v7148_v32, %v9879_v15 }
 0x4bc   : > { %v7151_v54 = vpop.f32.mrb[20].mxu0 }
 0x4bd   : > { %v1948_v14 = vpop.f32.mrb[21].mxu0  ;;  %8262 = vrot.lane.b32.xlu1 %v9684_v53, %s9127_s23  ;;  %v9990_v26 = vadd.f32 %v7151_v54, %v9924_v11  ;;  %v10004_v54 = vadd.f32 %v1938_v17, %v9886_v22 }
 0x4c0   : > { %v7154_v58 = vpop.f32.mrb[22].mxu0 }
 0x4c1   : > { %v1958_v16 = vpop.f32.mrb[23].mxu0  ;;  %v9995_v61 = vadd.f32 %v7154_v58, %v9941_v9  ;;  %v1973_v58 = vsel %vm1146_vm11, %v10004_v54, -inf }
 0x4c3   : > { %v1988_v32 = vsel %vm1146_vm11, %v9995_v61, -inf }
 0x4cd   : > { %8252 = vrot.lane.b32.xlu0 %v9640_v31, %s9127_s23 }
 0x4e1   : > { %1423 = vmax.xlane.f32.xlu1 %v1422_v12  ;;  %v1168_v12 = vsel %vm1146_vm11, %v9975_v60, -inf }
 0x4e5   : > { %1166 = vmax.xlane.f32.xlu1 %v1165_v8  ;;  %v1970_v8 = vsel %vm1146_vm11, %v9980_v56, -inf }
 0x4e9   : > { %1968 = vmax.xlane.f32.xlu1 %v1967_v21  ;;  %v1976_v21 = vsel %vm1146_vm11, %v9985_v43, -inf }
 0x4ec   : > { %1169 = vmax.xlane.f32.xlu0 %v1168_v12  ;;  %v1982_v12 = vsel %vm1146_vm11, %v9990_v26, -inf }
 0x4f0   : > { %1971 = vmax.xlane.f32.xlu0 %v1970_v8  ;;  %v10007_v8 = vadd.f32 %v1948_v14, %v9891_v25 }
 0x4f4   : > { %1977 = vmax.xlane.f32.xlu0 %v1976_v21  ;;  %v10012_v21 = vadd.f32 %v1958_v16, %v9959_v19 }
 0x4f6   : > { %v1985_v17 = vsel %vm1146_vm11, %v10012_v21, -inf }
 0x4f8   : > { %1983 = vmax.xlane.f32.xlu0 %v1982_v12  ;;  %v1979_v12 = vsel %vm1146_vm11, %v10007_v8, -inf }
 0x4fa   : > { %8267 = vrot.lane.b32.xlu1 %v9708_v3, %s9127_s23 }
 0x4fc   : > { %1989 = vmax.xlane.f32.xlu0 %v1988_v32 }
 0x51e   : > { %1974 = vmax.xlane.f32.xlu1 %v1973_v58 }
 0x522   : > { %1980 = vmax.xlane.f32.xlu1 %v1979_v12 }
 0x524   : > { %v1409_v0 = vpop.xlane.xlu1 %1408 }
 0x525   : > { %v1429_v32 = vsub.f32 %v9856_v37, %v1409_v0 }
 0x526   : > { %1986 = vmax.xlane.f32.xlu1 %v1985_v17 }
 0x527   : > { %v1438_v14 = vmul.f32 1.442695, %v1429_v32 }
 0x528   : > { %v1152_v59 = vpop.xlane.xlu0 %1151 }
 0x529   : > { %8466 = vpow2.f32 %v1438_v14  ;;  %v1172_v2 = vsub.f32 %v9866_v57, %v1152_v59  ;;  %v1149_v58 = vpop.xlane.xlu1 %1148 }
 0x52a   : > { %v1171_v16 = vsub.f32 %v9869_v1, %v1149_v58 }
 0x52b   : > { %v1181_v47 = vmul.f32 1.442695, %v1172_v2 }
 0x52c   : > { %v1406_v52 = vpop.xlane.xlu0 %1405  ;;  %v1179_v36 = vmul.f32 1.442695, %v1171_v16 }
 0x52d   : > { %8468 = vpow2.f32 %v1181_v47  ;;  %v1428_v12 = vsub.f32 %v9872_v7, %v1406_v52  ;;  %v1155_v0 = vpop.xlane.xlu1 %1154 }
 0x52e   : > { %v1173_v1 = vsub.f32 %v9894_v28, %v1155_v0 }
 0x52f   : > { %v1436_v41 = vmul.f32 1.442695, %v1428_v12 }
 0x530   : > { %v1415_v37 = vpop.xlane.xlu0 %1414  ;;  %v1183_v16 = vmul.f32 1.442695, %v1173_v1 }
 0x531   : > { %8470 = vpow2.f32 %v1436_v41  ;;  %v1431_v17 = vsub.f32 %v9897_v35, %v1415_v37  ;;  %v1418_v52 = vpop.xlane.xlu1 %1417 }
 0x532   : > { %8472 = vpow2.f32 %v1179_v36 }
 0x533   : > { %v10023_v32 = vpop.eup %8466  ;;  %v1442_v14 = vmul.f32 1.442695, %v1431_v17 }
 0x534   : > { %v1158_v59 = vpop.xlane.xlu0 %1157  ;;  %v1455_v2 = vsel %vm1146_vm11, %v10023_v32, 0.0 }
 0x535   : > { %8474 = vpow2.f32 %v1442_v14  ;;  %v1174_v47 = vsub.f32 %v9907_v24, %v1158_v59  ;;  %1456 = vadd.xlane.f32.xlu0 %v1455_v2  ;;  %v1432_v24 = vsub.f32 %v9902_v45, %v1418_v52  ;;  %v1161_v37 = vpop.xlane.xlu1 %1160 }
 0x536   : > { %v1175_v2 = vsub.f32 %v9912_v18, %v1161_v37 }
 0x537   : > { %v10028_v57 = vpop.eup %8468  ;;  %v1185_v41 = vmul.f32 1.442695, %v1174_v47 }
 0x538   : > { %v1412_v7 = vpop.xlane.xlu0 %1411  ;;  %v1198_v35 = vsel %vm1146_vm11, %v10028_v57, 0.0 }
 0x539   : > { %8476 = vpow2.f32 %v1185_v41  ;;  %v1430_v36 = vsub.f32 %v9917_v5, %v1412_v7  ;;  %1199 = vadd.xlane.f32.xlu0 %v1198_v35  ;;  %v1444_v5 = vmul.f32 1.442695, %v1432_v24  ;;  %v1187_v7 = vmul.f32 1.442695, %v1175_v2 }
 0x53b   : > { %v10034_v58 = vpop.eup %8470  ;;  %v1440_v12 = vmul.f32 1.442695, %v1430_v36 }
 0x53c   : > { %v1421_v17 = vpop.xlane.xlu0 %1420  ;;  %v1452_v28 = vsel %vm1146_vm11, %v10034_v58, 0.0  ;;  %v10039_v0 = vpop.eup %8472 }
 0x53d   : > { %8478 = vpow2.f32 %v1440_v12  ;;  %v1433_v14 = vsub.f32 %v9929_v51, %v1421_v17  ;;  %1453 = vadd.xlane.f32.xlu1 %v1452_v28  ;;  %v1195_v52 = vsel %vm1146_vm11, %v10039_v0, 0.0 }
 0x53e   : > { %8480 = vpow2.f32 %v1183_v16 }
 0x53f   : > { %v10042_v59 = vpop.eup %8474  ;;  %v1446_v47 = vmul.f32 1.442695, %v1433_v14 }
 0x540   : > { %v1164_v45 = vpop.xlane.xlu0 %1163  ;;  %v1461_v1 = vsel %vm1146_vm11, %v10042_v59, 0.0 }
 0x541   : > { %8482 = vpow2.f32 %v1446_v47  ;;  %v1176_v41 = vsub.f32 %v9934_v40, %v1164_v45  ;;  %1196 = vadd.xlane.f32.xlu1 %v1195_v52  ;;  %1462 = vadd.xlane.f32.xlu0 %v1461_v1 }
 0x542   : > { %8484 = vpow2.f32 %v1444_v5 }
 0x543   : > { %v10050_v51 = vpop.eup %8476  ;;  %v1189_v35 = vmul.f32 1.442695, %v1176_v41 }
 0x544   : > { %v1427_v36 = vpop.xlane.xlu0 %1426  ;;  %v1204_v18 = vsel %vm1146_vm11, %v10050_v51, 0.0 }
 0x545   : > { %8486 = vpow2.f32 %v1189_v35  ;;  %v1435_v16 = vsub.f32 %v9944_v20, %v1427_v36  ;;  %1205 = vadd.xlane.f32.xlu0 %v1204_v18 }
 0x546   : > { %8488 = vpow2.f32 %v1187_v7 }
 0x547   : > { %v10055_v24 = vpop.eup %8478  ;;  %v1450_v12 = vmul.f32 1.442695, %v1435_v16  ;;  %v10086_v16 = vpop.permute.xlu1 %8257 }
 0x548   : > { %v8253_v40 = vpop.permute.xlu0 %8252  ;;  %v1458_v37 = vsel %vm1146_vm11, %v10055_v24, 0.0  ;;  %v10059_v17 = vpop.eup %8480 }
 0x549   : > { %8490 = vpow2.f32 %v1450_v12  ;;  %v8255_v28 = vunpack.i.h.bf16 %v8253_v40  ;;  %v8254_v14 = vunpack.i.l.bf16 %v8253_v40  ;;  %1459 = vadd.xlane.f32.xlu1 %v1458_v37  ;;  %v1201_v20 = vsel %vm1146_vm11, %v10059_v17, 0.0 }
 0x54b   : > { %v10061_v5 = vpop.eup %8482  ;;  %v10063_v2 = vpack.c.bf16 %v8255_v28, %v8254_v14  ;;  %v10088_v12 = vpop.permute.xlu1 %8262 }
 0x54c   : > { %v1467_v47 = vsel %vm1146_vm11, %v10061_v5, 0.0  ;;  %v10069_v45 = vpop.eup %8484 }
 0x54d   : > { %1202 = vadd.xlane.f32.xlu1 %v1201_v20  ;;  %1468 = vadd.xlane.f32.xlu0 %v1467_v47  ;;  %v1464_v1 = vsel %vm1146_vm11, %v10069_v45, 0.0 }
 0x54e   : > { %7648 = vmatprep.subr.bf16.mxu1 %v10063_v2 }
 0x54f   : > { %v10072_v52 = vpop.eup %8486 }
 0x550   : > { %v1210_v41 = vsel %vm1146_vm11, %v10072_v52, 0.0  ;;  %v10078_v7 = vpop.eup %8488 }
 0x551   : > { %1465 = vadd.xlane.f32.xlu1 %v1464_v1  ;;  %1211 = vadd.xlane.f32.xlu0 %v1210_v41  ;;  %v1207_v36 = vsel %vm1146_vm11, %v10078_v7, 0.0 }
 0x553   : > { %v10080_v35 = vpop.eup %8490 }
 0x554   : > { %v1473_v18 = vsel %vm1146_vm11, %v10080_v35, 0.0 }
 0x555   : > { %1208 = vadd.xlane.f32.xlu1 %v1207_v36  ;;  %1474 = vadd.xlane.f32.xlu0 %v1473_v18 }
 0x56e   : > { %v1424_v40 = vpop.xlane.xlu1 %1423 }
 0x56f   : > { %v1434_v28 = vsub.f32 %v9962_v48, %v1424_v40 }
 0x571   : > { %v1448_v47 = vmul.f32 1.442695, %v1434_v28 }
 0x572   : > { %v1167_v37 = vpop.xlane.xlu1 %1166 }
 0x573   : > { %v1177_v1 = vsub.f32 %v9965_v10, %v1167_v37 }
 0x575   : > { %v1191_v18 = vmul.f32 1.442695, %v1177_v1 }
 0x576   : > { %v1969_v29 = vpop.xlane.xlu1 %1968 }
 0x577   : > { %v1991_v9 = vsub.f32 %v9970_v4, %v1969_v29 }
 0x579   : > { %v1170_v14 = vpop.xlane.xlu0 %1169  ;;  %v1999_v48 = vmul.f32 1.442695, %v1991_v9 }
 0x57a   : > { %v1178_v20 = vsub.f32 %v9975_v60, %v1170_v14 }
 0x57c   : > { %v1193_v41 = vmul.f32 1.442695, %v1178_v20  ;;  %v10124_v20 = vpop.permute.xlu1 %8267 }
 0x57d   : > { %v1972_v30 = vpop.xlane.xlu0 %1971 }
 0x57e   : > { %8492 = vpow2.f32 %v1193_v41  ;;  %v1992_v36 = vsub.f32 %v9980_v56, %v1972_v30 }
 0x57f   : > { %8494 = vpow2.f32 %v1448_v47 }
 0x580   : > { %v2001_v19 = vmul.f32 1.442695, %v1992_v36 }
 0x581   : > { %v1978_v11 = vpop.xlane.xlu0 %1977 }
 0x582   : > { %8496 = vpow2.f32 %v2001_v19  ;;  %v1994_v60 = vsub.f32 %v9985_v43, %v1978_v11 }
 0x583   : > { %8498 = vpow2.f32 %v1191_v18 }
 0x584   : > { %8500 = vpow2.f32 %v1999_v48  ;;  %v2005_v10 = vmul.f32 1.442695, %v1994_v60 }
 0x585   : > { %v1984_v47 = vpop.xlane.xlu0 %1983 }
 0x586   : > { %8502 = vpow2.f32 %v2005_v10  ;;  %v1996_v1 = vsub.f32 %v9990_v26, %v1984_v47 }
 0x588   : > { %v10096_v40 = vpop.eup %8492  ;;  %v2009_v18 = vmul.f32 1.442695, %v1996_v1 }
 0x589   : > { %v1216_v37 = vsel %vm1146_vm11, %v10096_v40, 0.0  ;;  %v10100_v28 = vpop.eup %8494 }
 0x58a   : > { %1217 = vadd.xlane.f32.xlu0 %v1216_v37  ;;  %v1470_v4 = vsel %vm1146_vm11, %v10100_v28, 0.0 }
 0x58c   : > { %v10102_v30 = vpop.eup %8496 }
 0x58d   : > { %v2018_v29 = vsel %vm1146_vm11, %v10102_v30, 0.0  ;;  %v10108_v11 = vpop.eup %8498 }
 0x58e   : > { %1471 = vadd.xlane.f32.xlu0 %v1470_v4  ;;  %2019 = vadd.xlane.f32.xlu1 %v2018_v29  ;;  %v1213_v9 = vsel %vm1146_vm11, %v10108_v11, 0.0  ;;  %v10112_v19 = vpop.eup %8500 }
 0x58f   : > { %v2015_v56 = vsel %vm1146_vm11, %v10112_v19, 0.0 }
 0x590   : > { %v10116_v43 = vpop.eup %8502 }
 0x591   : > { %v2024_v14 = vsel %vm1146_vm11, %v10116_v43, 0.0 }
 0x592   : > { %1214 = vadd.xlane.f32.xlu0 %v1213_v9 }
 0x596   : > { %2016 = vadd.xlane.f32.xlu0 %v2015_v56 }
 0x59a   : > { %2025 = vadd.xlane.f32.xlu0 %v2024_v14 }
 0x59f   : > { %8277 = vrot.lane.b32.xlu1 %v9662_v42, %s9128_s29 }
 0x5a3   : > { %8282 = vrot.lane.b32.xlu1 %v9684_v53, %s9128_s29 }
 0x5a7   : > { %8287 = vrot.lane.b32.xlu1 %v9708_v3, %s9128_s29 }
 0x5ab   : > { %v1975_v41 = vpop.xlane.xlu1 %1974  ;;  %2192 = vrot.lane.b32.xlu1 %v9626_v23, %s9129_s0 }
 0x5ac   : > { %v1993_v36 = vsub.f32 %v10004_v54, %v1975_v41 }
 0x5ae   : > { %v2003_v42 = vmul.f32 1.442695, %v1993_v36 }
 0x5af   : > { %v1981_v48 = vpop.xlane.xlu1 %1980 }
 0x5b0   : > { %8504 = vpow2.f32 %v2003_v42  ;;  %v1995_v53 = vsub.f32 %v10007_v8, %v1981_v48  ;;  %v1990_v8 = vpop.xlane.xlu0 %1989  ;;  %v8260_v48 = vunpack.i.h.bf16 %v10086_v16 }
 0x5b1   : > { %8506 = vpow2.f32 %v2009_v18 }
 0x5b2   : > { %v2007_v60 = vmul.f32 1.442695, %v1995_v53  ;;  %v8259_v53 = vunpack.i.l.bf16 %v10086_v16 }
 0x5b3   : > { %v1987_v10 = vpop.xlane.xlu1 %1986 }
 0x5b4   : > { %8508 = vpow2.f32 %v2007_v60  ;;  %v1997_v3 = vsub.f32 %v10012_v21, %v1987_v10 }
 0x5b6   : > { %v2011_v54 = vmul.f32 1.442695, %v1997_v3 }
 0x5b8   : > { %8510 = vpow2.f32 %v2011_v54  ;;  %v8265_v54 = vunpack.i.h.bf16 %v10088_v12 }
 0x5ba   : > { %v10134_v26 = vpop.eup %8504 }
 0x5bb   : > { %v2021_v37 = vsel %vm1146_vm11, %v10134_v26, 0.0  ;;  %v10138_v23 = vpop.eup %8506 }
 0x5bc   : > { %2022 = vadd.xlane.f32.xlu0 %v2021_v37  ;;  %v2030_v4 = vsel %vm1146_vm11, %v10138_v23, 0.0 }
 0x5be   : > { %v10142_v29 = vpop.eup %8508 }
 0x5bf   : > { %v2027_v21 = vsel %vm1146_vm11, %v10142_v29, 0.0 }
 0x5c0   : > { %2031 = vadd.xlane.f32.xlu0 %v2030_v4  ;;  %v8264_v4 = vunpack.i.l.bf16 %v10088_v12 }
 0x5c2   : > { %v1457_v9 = vpop.xlane.xlu0 %1456  ;;  %v10146_v14 = vpop.eup %8510 }
 0x5c3   : > { %8512 = vrcp.f32 %v1457_v9  ;;  %v2033_v1 = vsel %vm1146_vm11, %v10146_v14, 0.0  ;;  %v8269_v9 = vunpack.i.l.bf16 %v10124_v20 }
 0x5c4   : > { %2028 = vadd.xlane.f32.xlu0 %v2027_v21  ;;  %v7651_v21 = vpack.c.bf16 %v8260_v48, %v8259_v53 }
 0x5c6   : > { %v10148_v47 = vpop.xlane.xlu0 %1199 }
 0x5ca   : > { %v1454_v56 = vpop.xlane.xlu1 %1453 }
 0x5cb   : > { %8514 = vrcp.f32 %v1454_v56  ;;  %v7655_v56 = vpack.c.bf16 %v8265_v54, %v8264_v4 }
 0x5cd   : > { %v8513_v18 = vpop.eup %8512 }
 0x5ce   : > { %v1463_v41 = vpop.xlane.xlu0 %1462  ;;  %v1197_v36 = vpop.xlane.xlu1 %1196  ;;  %v1485_v3 = vmul.f32 %v8513_v18, %v10023_v32  ;;  %v8270_v32 = vunpack.i.h.bf16 %v10124_v20  ;;  %v1998_v18 = vsub.f32 %v9995_v61, %v1990_v8 }
 0x5cf   : > { %2034 = vadd.xlane.f32.xlu1 %v2033_v1  ;;  %8516 = vrcp.f32 %v1463_v41 }
 0x5d0   : > { %v7659_v41 = vpack.c.bf16 %v8270_v32, %v8269_v9 }
 0x5d2   : > { %v1206_v37 = vpop.xlane.xlu0 %1205 }
 0x5d5   : > { %v8515_v42 = vpop.eup %8514 }
 0x5d6   : > { %v1460_v60 = vpop.xlane.xlu1 %1459  ;;  %v1484_v10 = vmul.f32 %v8515_v42, %v10034_v58  ;;  %v2013_v42 = vmul.f32 1.442695, %v1998_v18 }
 0x5d7   : > { %8518 = vrcp.f32 %v1460_v60 }
 0x5d8   : > { %7087 = vmatprep.mubr.msk.f32.mxu1 %vm1146_vm11, %v1484_v10 }
 0x5d9   : > { %7088 = vmatmul.mubr.msk.f32.vlgmr.msra.gmra.mrb[24].mxu1 %vm1146_vm11, %v1485_v3  ;;  %v8517_v12 = vpop.eup %8516 }
 0x5da   : > { %7650 = vmatpush3.bf16.msra.mxu1 %v10063_v2  ;;  %v1203_v16 = vpop.xlane.xlu1 %1202  ;;  %8272 = vrot.lane.b32.xlu0 %v9640_v31, %s9128_s29  ;;  %v1469_v58 = vpop.xlane.xlu0 %1468  ;;  %v1487_v20 = vmul.f32 %v8517_v12, %v10042_v59 }
 0x5db   : > { %7652 = vmatprep.subr.bf16.mxu1 %v7651_v21  ;;  %8520 = vrcp.f32 %v1469_v58 }
 0x5de   : > { %7654 = vmatpush3.bf16.msra.mxu1 %v7651_v21  ;;  %v1466_v1 = vpop.xlane.xlu1 %1465 }
 0x5df   : > { %8522 = vrcp.f32 %v1466_v1  ;;  %7656 = vmatprep.subr.bf16.mxu1 %v7655_v56 }
 0x5e0   : > { %2194 = vrot.lane.b32.xlu1 %v9632_v27, %s9129_s0  ;;  %8524 = vpow2.f32 %v2013_v42 }
 0x5e1   : > { %v8519_v2 = vpop.eup %8518  ;;  %8526 = vrcp.f32 %v1197_v36 }
 0x5e2   : > { %7658 = vmatpush3.bf16.msra.mxu1 %v7655_v56  ;;  %v1486_v31 = vmul.f32 %v8519_v2, %v10055_v24 }
 0x5e3   : > { %7660 = vmatprep.subr.bf16.mxu1 %v7659_v41 }
 0x5e4   : > { %2198 = vrot.lane.b32.xlu1 %v9654_v39, %s9129_s0  ;;  %7090 = vmatprep.mubr.msk.f32.mxu1 %vm1146_vm11, %v1486_v31 }
 0x5e5   : > { %7091 = vmatmul.mubr.msk.f32.gmra.mrb[26].mxu1 %vm1146_vm11, %v1487_v20  ;;  %v8521_v27 = vpop.eup %8520 }
 0x5e6   : > { %7662 = vmatpush3.bf16.msra.mxu1 %v7659_v41  ;;  %v1489_v59 = vmul.f32 %v8521_v27, %v10061_v5  ;;  %v1212_v5 = vpop.xlane.xlu0 %1211 }
 0x5e7   : > { %7688 = vmatprep.subr.bf16.mxu1 %v9646_v33 }
 0x5e8   : > { %2200 = vrot.lane.b32.xlu1 %v9676_v49, %s9129_s0 }
 0x5e9   : > { %v8523_v24 = vpop.eup %8522 }
 0x5ea   : > { %v1488_v61 = vmul.f32 %v8523_v24, %v10069_v45  ;;  %v10187_v39 = vpop.eup %8524 }
 0x5eb   : > { %v2036_v49 = vsel %vm1146_vm11, %v10187_v39, 0.0  ;;  %v8527_v48 = vpop.eup %8526 }
 0x5ec   : > { %2202 = vrot.lane.b32.xlu1 %v9678_v50, %s9129_s0  ;;  %7093 = vmatprep.mubr.msk.f32.mxu1 %vm1146_vm11, %v1488_v61  ;;  %v1475_v50 = vpop.xlane.xlu0 %1474 }
 0x5ed   : > { %7094 = vmatmul.mubr.msk.f32.gmra.mrb[28].mxu1 %vm1146_vm11, %v1489_v59  ;;  %8528 = vrcp.f32 %v1475_v50 }
 0x5f0   : > { %2204 = vrot.lane.b32.xlu1 %v9698_v62, %s9129_s0  ;;  %v1209_v62 = vpop.xlane.xlu1 %1208 }
 0x5f4   : > { %2206 = vrot.lane.b32.xlu1 %v9700_v63, %s9129_s0 }
 0x5f7   : > { %v8529_v53 = vpop.eup %8528 }
 0x5f9   : > { %2037 = vadd.xlane.f32.xlu0 %v2036_v49 }
 0x60f   : > { %2196 = vrot.lane.b32.xlu0 %v9652_v38, %s9129_s0  ;;  %v1491_v38 = vmul.f32 %v8529_v53, %v10080_v35 }
 0x617   : > { %v1218_v45 = vpop.xlane.xlu0 %1217 }
 0x61b   : > { %v1472_v8 = vpop.xlane.xlu0 %1471  ;;  %v2020_v4 = vpop.xlane.xlu1 %2019 }
 0x61c   : > { %8530 = vrcp.f32 %v1472_v8 }
 0x61d   : > { %8532 = vrcp.f32 %v10148_v47  ;;  %v1227_v47 = vmul.f32 %v8527_v48, %v10039_v0 }
 0x61e   : > { %8534 = vrcp.f32 %v1203_v16 }
 0x61f   : > { %8536 = vrcp.f32 %v1206_v37  ;;  %v1215_v63 = vpop.xlane.xlu0 %1214 }
 0x620   : > { %8538 = vrcp.f32 %v1209_v62 }
 0x621   : > { %8540 = vrcp.f32 %v1212_v5 }
 0x622   : > { %8542 = vrcp.f32 %v1215_v63 }
 0x623   : > { %v2017_v3 = vpop.xlane.xlu0 %2016  ;;  %8544 = vrcp.f32 %v1218_v45 }
 0x624   : > { %8546 = vrcp.f32 %v2017_v3 }
 0x625   : > { %8548 = vrcp.f32 %v2020_v4 }
 0x626   : > { %v8531_v60 = vpop.eup %8530 }
 0x627   : > { %v1490_v10 = vmul.f32 %v8531_v60, %v10100_v28  ;;  %v8533_v36 = vpop.eup %8532 }
 0x628   : > { %v8535_v54 = vpop.eup %8534  ;;  %v1228_v37 = vmul.f32 %v8533_v36, %v10028_v57 }
 0x629   : > { %7096 = vmatprep.mubr.msk.f32.mxu1 %vm1146_vm11, %v1490_v10  ;;  %v8537_v28 = vpop.eup %8536  ;;  %v1229_v21 = vmul.f32 %v8535_v54, %v10059_v17 }
 0x62a   : > { %7097 = vmatmul.mubr.msk.f32.gmra.mrb[30].mxu1 %vm1146_vm11, %v1491_v38  ;;  %v8539_v35 = vpop.eup %8538  ;;  %v1230_v0 = vmul.f32 %v8537_v28, %v10050_v51 }
 0x62b   : > { %7115 = vmatprep.mubr.msk.f32.mxu1 %vm1146_vm11, %v1227_v47  ;;  %v8541_v16 = vpop.eup %8540  ;;  %v1231_v57 = vmul.f32 %v8539_v35, %v10078_v7 }
 0x62c   : > { %v8543_v58 = vpop.eup %8542 }
 0x62d   : > { %v8545_v17 = vpop.eup %8544  ;;  %v1233_v32 = vmul.f32 %v8543_v58, %v10108_v11  ;;  %v8278_v11 = vpop.permute.xlu1 %8277 }
 0x62e   : > { %7116 = vmatmul.mubr.msk.f32.vlgmr.msra.gmra.mrb[24].mxu1 %vm1146_vm11, %v1228_v37  ;;  %v8547_v9 = vpop.eup %8546 }
 0x62f   : > { %7690 = vmatpush3.bf16.msra.mxu1 %v9646_v33  ;;  %7118 = vmatprep.mubr.msk.f32.mxu1 %vm1146_vm11, %v1229_v21  ;;  %v1232_v33 = vmul.f32 %v8541_v16, %v10072_v52  ;;  %v8549_v51 = vpop.eup %8548  ;;  %v2047_v7 = vmul.f32 %v8547_v9, %v10112_v19 }
 0x630   : > { %7692 = vmatprep.subr.bf16.mxu1 %v9668_v44  ;;  %v2048_v52 = vmul.f32 %v8549_v51, %v10102_v30  ;;  %v8279_v30 = vunpack.i.l.bf16 %v8278_v11 }
 0x631   : > { %v8283_v1 = vpop.permute.xlu1 %8282 }
 0x632   : > { %7119 = vmatmul.mubr.msk.f32.gmra.mrb[26].mxu1 %vm1146_vm11, %v1230_v0  ;;  %v8285_v50 = vunpack.i.h.bf16 %v8283_v1  ;;  %v8284_v45 = vunpack.i.l.bf16 %v8283_v1  ;;  %v11857_v1 = vld [vmem:[#allocation49_spill] sm:$0xff] }
 0x633   : > { %7694 = vmatpush3.bf16.msra.mxu1 %v9668_v44  ;;  %7121 = vmatprep.mubr.msk.f32.mxu1 %vm1146_vm11, %v1231_v57  ;;  %v1234_v44 = vmul.f32 %v8545_v17, %v10096_v40 }
 0x634   : > { %7696 = vmatprep.subr.bf16.mxu1 %v9690_v55  ;;  %v7715_v62 = vpack.c.bf16 %v8285_v50, %v8284_v45 }
 0x635   : > { %v8288_v19 = vpop.permute.xlu1 %8287 }
 0x636   : > { %7122 = vmatmul.mubr.msk.f32.gmra.mrb[28].mxu1 %vm1146_vm11, %v1232_v33  ;;  %v8290_v63 = vunpack.i.h.bf16 %v8288_v19  ;;  %v8289_v48 = vunpack.i.l.bf16 %v8288_v19  ;;  %v11858_v19 = vld [vmem:[#allocation41_spill] sm:$0xff] }
 0x637   : > { %7698 = vmatpush3.bf16.msra.mxu1 %v9690_v55  ;;  %7124 = vmatprep.mubr.msk.f32.mxu1 %vm1146_vm11, %v1233_v32  ;;  %v2026_v55 = vpop.xlane.xlu0 %2025 }
 0x638   : > { %7700 = vmatprep.subr.bf16.mxu1 %v9714_v6  ;;  %8550 = vrcp.f32 %v2026_v55  ;;  %v7721_v60 = vpack.c.bf16 %v8290_v63, %v8289_v48 }
 0x639   : > { %v2193_v24 = vpop.permute.xlu1 %2192 }
 0x63a   : > { %7125 = vmatmul.mubr.msk.f32.gmra.mrb[30].mxu1 %vm1146_vm11, %v1234_v44 }
 0x63b   : > { %7702 = vmatpush3.bf16.msra.mxu1 %v9714_v6  ;;  %7171 = vmatprep.mubr.msk.f32.mxu1 %vm1146_vm11, %v2047_v7  ;;  %v8280_v6 = vunpack.i.h.bf16 %v8278_v11 }
 0x63d   : > { %v7709_v59 = vpack.c.bf16 %v8280_v6, %v8279_v30  ;;  %v11861_v6 = vld [vmem:[#allocation43_spill] sm:$0xff] }
 0x63e   : > { %7172 = vmatmul.mubr.msk.f32.vlgmr.msra.gmra.mrb[24].mxu1 %vm1146_vm11, %v2048_v52 }
 0x642   : > { %v8551_v2 = vpop.eup %8550 }
 0x643   : > { %v2050_v27 = vmul.f32 %v8551_v2, %v10116_v43  ;;  %v11859_v2 = vld [vmem:[#allocation40_spill] sm:$0xff] }
 0x649   : > { %v2023_v56 = vpop.xlane.xlu0 %2022 }
 0x64a   : > { %8552 = vrcp.f32 %v2023_v56 }
 0x64d   : > { %v2032_v40 = vpop.xlane.xlu0 %2031 }
 0x64e   : > { %8554 = vrcp.f32 %v2032_v40 }
 0x651   : > { %v2029_v12 = vpop.xlane.xlu0 %2028 }
 0x652   : > { %8556 = vrcp.f32 %v2029_v12 }
 0x654   : > { %v8553_v41 = vpop.eup %8552 }
 0x655   : > { %v8273_v31 = vpop.permute.xlu0 %8272  ;;  %v2049_v18 = vmul.f32 %v8553_v41, %v10134_v26  ;;  %v11860_v41 = vpack.i.bf16 %v11858_v19, %v11859_v2  ;;  %v2620_v19 = vld [vmem:[#allocation2 + $0x10] sm:$0xff]  ;;  %v2621_v2 = vld [vmem:[#allocation2 + $0x18] sm:$0xff] }
 0x656   : > { %v8275_v20 = vunpack.i.h.bf16 %v8273_v31  ;;  %v8274_v42 = vunpack.i.l.bf16 %v8273_v31  ;;  %v11862_v31 = vld [vmem:[#allocation42_spill] sm:$0xff] }
 0x657   : > { %7174 = vmatprep.mubr.msk.f32.mxu1 %vm1146_vm11, %v2049_v18  ;;  %v11863_v18 = vpack.i.bf16 %v11861_v6, %v11862_v31 }
 0x658   : > { %v7703_v61 = vpack.c.bf16 %v8275_v20, %v8274_v42  ;;  %7175 = vmatmul.mubr.msk.f32.gmra.mrb[26].mxu1 %vm1146_vm11, %v2050_v27  ;;  %v8555_v49 = vpop.eup %8554 }
 0x659   : > { %v2052_v8 = vmul.f32 %v8555_v49, %v10138_v23 }
 0x65a   : > { %7705 = vmatprep.subr.msk.bf16.mxu1 %vm9768_vm10, %v7703_v61 }
 0x65b   : > { %7708 = vmatpush3.bf16.xpose.msk.msra.mxu1 %vm9768_vm10, %v7703_v61 }
 0x65c   : > { %v8557_v26 = vpop.eup %8556  ;;  %v2035_v5 = vpop.xlane.xlu1 %2034  ;;  %7711 = vmatprep.subr.msk.bf16.mxu1 %vm9768_vm10, %v7709_v59 }
 0x65d   : > { %8558 = vrcp.f32 %v2035_v5  ;;  %v2051_v43 = vmul.f32 %v8557_v26, %v10142_v29 }
 0x65f   : > { %7177 = vmatprep.mubr.msk.f32.mxu1 %vm1146_vm11, %v2051_v43 }
 0x660   : > { %7178 = vmatmul.mubr.msk.f32.gmra.mrb[28].mxu1 %vm1146_vm11, %v2052_v8  ;;  %v2195_v23 = vpop.permute.xlu1 %2194 }
 0x663   : > { %7714 = vmatpush3.bf16.xpose.msk.msra.mxu1 %vm9768_vm10, %v7709_v59 }
 0x664   : > { %7717 = vmatprep.subr.msk.bf16.mxu1 %vm9768_vm10, %v7715_v62  ;;  %v2199_v38 = vpop.permute.xlu1 %2198 }
 0x667   : > { %v8559_v53 = vpop.eup %8558 }
 0x668   : > { %v2053_v29 = vmul.f32 %v8559_v53, %v10146_v14  ;;  %v2201_v3 = vpop.permute.xlu1 %2200 }
 0x66a   : > { %7180 = vmatprep.mubr.msk.f32.mxu1 %vm1146_vm11, %v2053_v29 }
 0x66b   : > { %7720 = vmatpush3.bf16.xpose.msk.msra.mxu1 %vm9768_vm10, %v7715_v62 }
 0x66c   : > { %7723 = vmatprep.subr.msk.bf16.mxu1 %vm9768_vm10, %v7721_v60  ;;  %v2203_v47 = vpop.permute.xlu1 %2202 }
 0x670   : > { %v2205_v37 = vpop.permute.xlu1 %2204 }
 0x673   : > { %7726 = vmatpush3.bf16.xpose.msk.msra.mxu1 %vm9768_vm10, %v7721_v60 }
 0x686   : > { %v2038_v10 = vpop.xlane.xlu0 %2037 }
 0x687   : > { %8560 = vrcp.f32 %v2038_v10 }
 0x68a   : > { %v2197_v54 = vpop.permute.xlu0 %2196 }
 0x691   : > { %v8561_v36 = vpop.eup %8560 }
 0x692   : > { %v2054_v14 = vmul.f32 %v8561_v36, %v10187_v39  ;;  %v2207_v39 = vpop.permute.xlu1 %2206 }
 0x694   : > { %7181 = vmatmul.mubr.msk.f32.gmra.mrb[30].mxu1 %vm1146_vm11, %v2054_v14 }
 0x695   : > { %7199 = vmatprep.mubr.msk.f32.mxu1 %vm1008_vm9, %v2193_v24 }
 0x698   : > { %7200 = vmatmul.mubr.msk.f32.vlgmr.msra.gmra.mrb[32].mxu1 %vm1008_vm9, %v2195_v23 }
 0x699   : > { %7202 = vmatprep.mubr.msk.f32.mxu1 %vm1008_vm9, %v2197_v54 }
 0x69c   : > { %7203 = vmatmul.mubr.msk.f32.gmra.mrb[34].mxu1 %vm1008_vm9, %v2199_v38 }
 0x69d   : > { %7205 = vmatprep.mubr.msk.f32.mxu1 %vm1008_vm9, %v2201_v3 }
 0x6a0   : > { %7206 = vmatmul.mubr.msk.f32.gmra.mrb[36].mxu1 %vm1008_vm9, %v2203_v47 }
 0x6a1   : > { %7208 = vmatprep.mubr.msk.f32.mxu1 %vm1008_vm9, %v2205_v37 }
 0x6a4   : > { %7209 = vmatmul.mubr.msk.f32.gmra.mrb[38].mxu1 %vm1008_vm9, %v2207_v39 }
 0x76b   : > { %v7201_v4 = vpop.f32.mrb[32].mxu1 }
 0x76c   : > { %v2328_v28 = vadd.f32 %v7201_v4, %v9853_v34  ;;  %v2322_v21 = vpop.f32.mrb[33].mxu1 }
 0x76d   : > { %v2323_v35 = vadd.f32 %v2322_v21, %v9863_v46  ;;  %v11855_v46 = vld [vmem:[#allocation48_spill] sm:$0xff] }
 0x76e   : > { %v2364_v0 = vsel %vm1146_vm11, %v2328_v28, -inf }
 0x76f   : > { %2365 = vmax.xlane.f32.xlu1 %v2364_v0  ;;  %v7204_v16 = vpop.f32.mrb[34].mxu1  ;;  %v2361_v57 = vsel %vm1146_vm11, %v2323_v35, -inf }
 0x770   : > { %v2338_v58 = vadd.f32 %v7204_v16, %v9879_v15  ;;  %v2332_v33 = vpop.f32.mrb[35].mxu1  ;;  %2362 = vmax.xlane.f32.xlu0 %v2361_v57  ;;  %v11856_v15 = vld [vmem:[#allocation50_spill] sm:$0xff] }
 0x771   : > { %v2333_v32 = vadd.f32 %v2332_v33, %v9886_v22 }
 0x772   : > { %v2370_v17 = vsel %vm1146_vm11, %v2338_v58, -inf }
 0x773   : > { %v7207_v9 = vpop.f32.mrb[36].mxu1  ;;  %v2367_v55 = vsel %vm1146_vm11, %v2333_v32, -inf }
 0x774   : > { %v2342_v44 = vpop.f32.mrb[37].mxu1  ;;  %2371 = vmax.xlane.f32.xlu0 %v2370_v17  ;;  %v2348_v51 = vadd.f32 %v7207_v9, %v11855_v46  ;;  %v11865_v9 = vld [vmem:[#allocation44_spill] sm:$0xff]  ;;  %v11868_v46 = vld [vmem:[#allocation46_spill] sm:$0xff] }
 0x775   : > { %v2343_v34 = vadd.f32 %v2342_v44, %v9891_v25 }
 0x776   : > { %v2376_v25 = vsel %vm1146_vm11, %v2348_v51, -inf }
 0x777   : > { %v7210_v7 = vpop.f32.mrb[38].mxu1  ;;  %v2373_v52 = vsel %vm1146_vm11, %v2343_v34, -inf }
 0x778   : > { %v2352_v11 = vpop.f32.mrb[39].mxu1  ;;  %2374 = vmax.xlane.f32.xlu1 %v2373_v52  ;;  %2368 = vmax.xlane.f32.xlu0 %v2367_v55  ;;  %v10276_v22 = vadd.f32 %v7210_v7, %v11857_v1 }
 0x779   : > { %v10273_v56 = vadd.f32 %v2352_v11, %v11856_v15 }
 0x77a   : > { %v2382_v12 = vsel %vm1146_vm11, %v10276_v22, -inf }
 0x77b   : > { %v2379_v40 = vsel %vm1146_vm11, %v10273_v56, -inf }
 0x77c   : > { %2380 = vmax.xlane.f32.xlu1 %v2379_v40  ;;  %2377 = vmax.xlane.f32.xlu0 %v2376_v25 }
 0x780   : > { %2383 = vmax.xlane.f32.xlu0 %v2382_v12  ;;  %v2618_v12 = vld [vmem:[#allocation2] sm:$0xff] }
 0x78d   : > { %8292 = vrot.lane.b32.xlu1 %v11860_v41, %s9122_s26  ;;  %v7747_v41 = vpack.c.bf16 %v2621_v2, %v2620_v19 }
 0x796   : > { %8297 = vrot.lane.b32.xlu0 %v11863_v18, %s9122_s26 }
 0x7fc   : > { %v2366_v30 = vpop.xlane.xlu1 %2365 }
 0x7fd   : > { %v2386_v20 = vsub.f32 %v2328_v28, %v2366_v30  ;;  %v2363_v42 = vpop.xlane.xlu0 %2362 }
 0x7fe   : > { %v2385_v27 = vsub.f32 %v2323_v35, %v2363_v42 }
 0x7ff   : > { %v2395_v24 = vmul.f32 1.442695, %v2386_v20 }
 0x800   : > { %v2393_v61 = vmul.f32 1.442695, %v2385_v27 }
 0x801   : > { %8562 = vpow2.f32 %v2395_v24  ;;  %v2372_v59 = vpop.xlane.xlu0 %2371 }
 0x802   : > { %8564 = vpow2.f32 %v2393_v61  ;;  %v2388_v49 = vsub.f32 %v2338_v58, %v2372_v59 }
 0x804   : > { %v2399_v26 = vmul.f32 1.442695, %v2388_v49 }
 0x805   : > { %v2375_v5 = vpop.xlane.xlu1 %2374  ;;  %v2369_v43 = vpop.xlane.xlu0 %2368 }
 0x806   : > { %8566 = vpow2.f32 %v2399_v26  ;;  %v2389_v50 = vsub.f32 %v2343_v34, %v2375_v5  ;;  %v2387_v45 = vsub.f32 %v2333_v32, %v2369_v43  ;;  %v11864_v32 = vld [vmem:[#allocation45_spill] sm:$0xff]  ;;  %v11867_v34 = vld [vmem:[#allocation47_spill] sm:$0xff] }
 0x807   : > { %v11866_v44 = vpack.i.bf16 %v11864_v32, %v11865_v9 }
 0x808   : > { %v2397_v8 = vmul.f32 1.442695, %v2387_v45  ;;  %v2401_v62 = vmul.f32 1.442695, %v2389_v50 }
 0x809   : > { %v2381_v63 = vpop.xlane.xlu1 %2380  ;;  %v2378_v48 = vpop.xlane.xlu0 %2377 }
 0x80a   : > { %v2390_v53 = vsub.f32 %v2348_v51, %v2378_v48  ;;  %8568 = vpow2.f32 %v2397_v8  ;;  %v11869_v51 = vpack.i.bf16 %v11867_v34, %v11868_v46  ;;  %v2391_v7 = vsub.f32 %v10273_v56, %v2381_v63  ;;  %v2619_v56 = vld [vmem:[#allocation2 + $0x8] sm:$0xff]  ;;  %v11871_v46 = vld [vmem:[#allocation31_spill] sm:$0xff] }
 0x80b   : > { %v10291_v29 = vpop.eup %8562  ;;  %8570 = vpow2.f32 %v2401_v62 }
 0x80c   : > { %v10293_v60 = vpop.eup %8564  ;;  %v2403_v23 = vmul.f32 1.442695, %v2390_v53  ;;  %v2412_v10 = vsel %vm1146_vm11, %v10291_v29, 0.0  ;;  %v2405_v55 = vmul.f32 1.442695, %v2391_v7 }
 0x80d   : > { %v8293_v38 = vpop.permute.xlu1 %8292  ;;  %2413 = vadd.xlane.f32.xlu0 %v2412_v10  ;;  %v2384_v36 = vpop.xlane.xlu0 %2383  ;;  %v2409_v3 = vsel %vm1146_vm11, %v10293_v60, 0.0 }
 0x80e   : > { %v8295_v14 = vunpack.i.h.bf16 %v8293_v38  ;;  %v8294_v47 = vunpack.i.l.bf16 %v8293_v38  ;;  %2410 = vadd.xlane.f32.xlu1 %v2409_v3  ;;  %8572 = vpow2.f32 %v2403_v23  ;;  %v2392_v52 = vsub.f32 %v10276_v22, %v2384_v36 }
 0x80f   : > { %8574 = vpow2.f32 %v2405_v55  ;;  %v7743_v22 = vpack.c.bf16 %v2619_v56, %v2618_v12  ;;  %v11873_v12 = vld [vmem:[#allocation33_spill] sm:$0xff] }
 0x810   : > { %v10299_v54 = vpop.eup %8566  ;;  %v7727_v37 = vpack.c.bf16 %v8295_v14, %v8294_v47  ;;  %v2407_v11 = vmul.f32 1.442695, %v2392_v52 }
 0x811   : > { %v8298_v39 = vpop.permute.xlu0 %8297  ;;  %v2418_v4 = vsel %vm1146_vm11, %v10299_v54, 0.0  ;;  %7744 = vmatprep.subr.bf16.mxu0 %v7743_v22 }
 0x812   : > { %v8300_v28 = vunpack.i.h.bf16 %v8298_v39  ;;  %v8299_v21 = vunpack.i.l.bf16 %v8298_v39  ;;  %7728 = vmatprep.subr.bf16.mxu1 %v7727_v37  ;;  %2419 = vadd.xlane.f32.xlu0 %v2418_v4  ;;  %8576 = vpow2.f32 %v2407_v11 }
 0x813   : > { %7730 = vmatpush3.bf16.msra.mxu1 %v7727_v37  ;;  %7746 = vmatpush3.bf16.msra.mxu0 %v7743_v22 }
 0x814   : > { %v7731_v35 = vpack.c.bf16 %v8300_v28, %v8299_v21  ;;  %v10303_v0 = vpop.eup %8568  ;;  %7748 = vmatprep.subr.bf16.mxu0 %v7747_v41 }
 0x815   : > { %v2415_v16 = vsel %vm1146_vm11, %v10303_v0, 0.0  ;;  %v10307_v57 = vpop.eup %8570 }
 0x816   : > { %7732 = vmatprep.subr.bf16.mxu1 %v7731_v35  ;;  %2416 = vadd.xlane.f32.xlu1 %v2415_v16  ;;  %v2421_v33 = vsel %vm1146_vm11, %v10307_v57, 0.0 }
 0x817   : > { %7734 = vmatpush3.bf16.msra.mxu1 %v7731_v35  ;;  %7750 = vmatpush3.bf16.msra.mxu0 %v7747_v41 }
 0x818   : > { %v10309_v58 = vpop.eup %8572 }
 0x819   : > { %v2424_v17 = vsel %vm1146_vm11, %v10309_v58, 0.0  ;;  %v10325_v15 = vpop.eup %8574 }
 0x81a   : > { %2422 = vadd.xlane.f32.xlu1 %v2421_v33  ;;  %2425 = vadd.xlane.f32.xlu0 %v2424_v17  ;;  %v2427_v40 = vsel %vm1146_vm11, %v10325_v15, 0.0 }
 0x81c   : > { %v10327_v1 = vpop.eup %8576 }
 0x81d   : > { %v2430_v25 = vsel %vm1146_vm11, %v10327_v1, 0.0 }
 0x82b   : > { %8302 = vrot.lane.b32.xlu1 %v11866_v44, %s9122_s26  ;;  %v11870_v44 = vld [vmem:[#allocation32_spill] sm:$0xff] }
 0x830   : > { %8307 = vrot.lane.b32.xlu0 %v11869_v51, %s9122_s26 }
 0x84f   : > { %2428 = vadd.xlane.f32.xlu1 %v2427_v40  ;;  %2431 = vadd.xlane.f32.xlu0 %v2430_v25  ;;  %v11872_v40 = vld [vmem:[#allocation34_spill] sm:$0xff] }
 0x89a   : > { %v2414_v31 = vpop.xlane.xlu0 %2413 }
 0x89b   : > { %v2411_v6 = vpop.xlane.xlu1 %2410 }
 0x89c   : > { %8578 = vrcp.f32 %v2411_v6 }
 0x89d   : > { %8580 = vrcp.f32 %v2414_v31 }
 0x89f   : > { %v2420_v18 = vpop.xlane.xlu0 %2419 }
 0x8a3   : > { %v2417_v30 = vpop.xlane.xlu1 %2416 }
 0x8a4   : > { %8582 = vrcp.f32 %v2417_v30 }
 0x8a5   : > { %8584 = vrcp.f32 %v2420_v18  ;;  %v11874_v18 = vld [vmem:[#allocation36_spill] sm:$0xff] }
 0x8a6   : > { %v8579_v20 = vpop.eup %8578 }
 0x8a7   : > { %v2441_v42 = vmul.f32 %v8579_v20, %v10293_v60  ;;  %v2423_v27 = vpop.xlane.xlu1 %2422  ;;  %v2426_v24 = vpop.xlane.xlu0 %2425  ;;  %v11875_v20 = vld [vmem:[#allocation35_spill] sm:$0xff] }
 0x8a8   : > { %8586 = vrcp.f32 %v2423_v27  ;;  %v8581_v8 = vpop.eup %8580 }
 0x8a9   : > { %7227 = vmatprep.mubr.msk.f32.mxu1 %vm1146_vm11, %v2441_v42  ;;  %8588 = vrcp.f32 %v2426_v24  ;;  %v2442_v63 = vmul.f32 %v8581_v8, %v10291_v29 }
 0x8ab   : > { %v8303_v61 = vpop.permute.xlu1 %8302  ;;  %v8308_v59 = vpop.permute.xlu0 %8307 }
 0x8ac   : > { %v8305_v49 = vunpack.i.h.bf16 %v8303_v61  ;;  %v8304_v26 = vunpack.i.l.bf16 %v8303_v61  ;;  %v8310_v5 = vunpack.i.h.bf16 %v8308_v59  ;;  %v8309_v43 = vunpack.i.l.bf16 %v8308_v59 }
 0x8ae   : > { %v7735_v50 = vpack.c.bf16 %v8305_v49, %v8304_v26  ;;  %v7739_v45 = vpack.c.bf16 %v8310_v5, %v8309_v43  ;;  %v8583_v62 = vpop.eup %8582  ;;  %v11876_v5 = vld [vmem:[#allocation38_spill] sm:$0xff] }
 0x8af   : > { %v8585_v48 = vpop.eup %8584  ;;  %v2443_v53 = vmul.f32 %v8583_v62, %v10303_v0 }
 0x8b0   : > { %7736 = vmatprep.subr.bf16.mxu1 %v7735_v50  ;;  %v2444_v23 = vmul.f32 %v8585_v48, %v10299_v54 }
 0x8b1   : > { %7738 = vmatpush3.bf16.msra.mxu1 %v7735_v50  ;;  %v11877_v50 = vld [vmem:[#allocation37_spill] sm:$0xff] }
 0x8b2   : > { %7740 = vmatprep.subr.bf16.mxu1 %v7739_v45  ;;  %v8587_v60 = vpop.eup %8586 }
 0x8b3   : > { %v8589_v10 = vpop.eup %8588  ;;  %v2445_v38 = vmul.f32 %v8587_v60, %v10307_v57 }
 0x8b4   : > { %v2446_v36 = vmul.f32 %v8589_v10, %v10309_v58  ;;  %v6454_v58 = vld [vmem:[#allocation5] ss:$0 sm:$0xff] }
 0x8b5   : > { %7742 = vmatpush3.bf16.msra.mxu1 %v7739_v45 }
 0x8b8   : > { %7228 = vmatmul.mubr.msk.f32.vlgmr.msra.gmra.mrb[24].mxu1 %vm1146_vm11, %v2442_v63 }
 0x8b9   : > { %7230 = vmatprep.mubr.msk.f32.mxu1 %vm1146_vm11, %v2443_v53 }
 0x8bc   : > { %7231 = vmatmul.mubr.msk.f32.gmra.mrb[26].mxu1 %vm1146_vm11, %v2444_v23 }
 0x8bd   : > { %7233 = vmatprep.mubr.msk.f32.mxu1 %vm1146_vm11, %v2445_v38 }
 0x8c0   : > { %7234 = vmatmul.mubr.msk.f32.gmra.mrb[28].mxu1 %vm1146_vm11, %v2446_v36 }
 0x8dc   : > { %v2429_v29 = vpop.xlane.xlu1 %2428  ;;  %v2432_v3 = vpop.xlane.xlu0 %2431 }
 0x8dd   : > { %8590 = vrcp.f32 %v2429_v29 }
 0x8de   : > { %8592 = vrcp.f32 %v2432_v3 }
 0x8e7   : > { %v8591_v14 = vpop.eup %8590 }
 0x8e8   : > { %v8593_v47 = vpop.eup %8592  ;;  %v2447_v37 = vmul.f32 %v8591_v14, %v10325_v15 }
 0x8e9   : > { %v2448_v54 = vmul.f32 %v8593_v47, %v10327_v1 }
 0x8ea   : > { %7236 = vmatprep.mubr.msk.f32.mxu1 %vm1146_vm11, %v2447_v37 }
 0x8eb   : > { %7237 = vmatmul.mubr.msk.f32.gmra.mrb[30].mxu1 %vm1146_vm11, %v2448_v54 }
 0x98b   : > { %v7229_v39 = vpop.f32.mrb[24].mxu1 }
 0x98c   : > { %v2571_v4 = vpop.f32.mrb[25].mxu1 }
 0x98d   : > { %7247 = vmatprep.mubr.msk.f32.mxu0 %vm846_vm8, %v2571_v4 }
 0x98e   : > { %7248 = vmatmul.mubr.msk.f32.vlgmr.msra.gmra.mrb[24].mxu0 %vm846_vm8, %v7229_v39 }
 0x98f   : > { %v7232_v28 = vpop.f32.mrb[26].mxu1 }
 0x990   : > { %v2581_v21 = vpop.f32.mrb[27].mxu1 }
 0x991   : > { %7250 = vmatprep.mubr.msk.f32.mxu0 %vm846_vm8, %v2581_v21 }
 0x992   : > { %7251 = vmatmul.mubr.msk.f32.gmra.mrb[26].mxu0 %vm846_vm8, %v7232_v28 }
 0x993   : > { %v7235_v35 = vpop.f32.mrb[28].mxu1 }
 0x994   : > { %v2591_v0 = vpop.f32.mrb[29].mxu1 }
 0x995   : > { %7253 = vmatprep.mubr.msk.f32.mxu0 %vm846_vm8, %v2591_v0 }
 0x996   : > { %7254 = vmatmul.mubr.msk.f32.gmra.mrb[28].mxu0 %vm846_vm8, %v7235_v35 }
 0x9be   : > { %v7238_v16 = vpop.f32.mrb[30].mxu1 }
 0x9bf   : > { %v2601_v57 = vpop.f32.mrb[31].mxu1 }
 0x9c0   : > { %7256 = vmatprep.mubr.msk.f32.mxu0 %vm846_vm8, %v2601_v57 }
 0x9c1   : > { %7257 = vmatmul.mubr.msk.f32.gmra.mrb[30].mxu0 %vm846_vm8, %v7238_v16 }
 0xa61   : > { %v7249_v33 = vpop.f32.mrb[24].mxu0 }
 0xa62   : > { %v2725_v17 = vadd.f32 %v7249_v33, %v6454_v58  ;;  %v2719_v32 = vpop.f32.mrb[25].mxu0 }
 0xa63   : > { %v2720_v9 = vadd.f32 %v6454_v58, %v2719_v32 }
 0xa64   : > { %v10358_v34 = vadd.f32 %v2725_v17, %v11870_v44 }
 0xa65   : > { %v10361_v51 = vadd.f32 %v2720_v9, %v11871_v46  ;;  %v7252_v7 = vpop.f32.mrb[26].mxu0 }
 0xa66   : > { %v2735_v52 = vadd.f32 %v7252_v7, %v6454_v58  ;;  %v2729_v55 = vpop.f32.mrb[27].mxu0  ;;  %v2771_v11 = vsel %vm846_vm8, %v10358_v34, 0.0 }
 0xa67   : > { %v2730_v15 = vadd.f32 %v6454_v58, %v2729_v55  ;;  %2772 = vadd.xlane.f32.xlu0 %v2771_v11  ;;  %v2768_v1 = vsel %vm846_vm8, %v10361_v51, 0.0 }
 0xa68   : > { %v10368_v25 = vadd.f32 %v2735_v52, %v11872_v40  ;;  %2769 = vadd.xlane.f32.xlu1 %v2768_v1 }
 0xa69   : > { %v10371_v56 = vadd.f32 %v2730_v15, %v11873_v12  ;;  %v7255_v19 = vpop.f32.mrb[28].mxu0 }
 0xa6a   : > { %v2745_v22 = vadd.f32 %v7255_v19, %v6454_v58  ;;  %v2739_v2 = vpop.f32.mrb[29].mxu0  ;;  %v2777_v41 = vsel %vm846_vm8, %v10368_v25, 0.0 }
 0xa6b   : > { %v2740_v6 = vadd.f32 %v6454_v58, %v2739_v2  ;;  %2778 = vadd.xlane.f32.xlu0 %v2777_v41  ;;  %v2774_v31 = vsel %vm846_vm8, %v10371_v56, 0.0 }
 0xa6c   : > { %v10378_v30 = vadd.f32 %v2745_v22, %v11874_v18  ;;  %2775 = vadd.xlane.f32.xlu1 %v2774_v31 }
 0xa6d   : > { %v10381_v42 = vadd.f32 %v2740_v6, %v11875_v20 }
 0xa6e   : > { %v2783_v27 = vsel %vm846_vm8, %v10378_v30, 0.0 }
 0xa6f   : > { %2784 = vadd.xlane.f32.xlu0 %v2783_v27  ;;  %v2780_v24 = vsel %vm846_vm8, %v10381_v42, 0.0 }
 0xa70   : > { %2781 = vadd.xlane.f32.xlu1 %v2780_v24 }
 0xa94   : > { %v7258_v61 = vpop.f32.mrb[30].mxu0 }
 0xa95   : > { %v2755_v59 = vadd.f32 %v7258_v61, %v6454_v58  ;;  %v2749_v49 = vpop.f32.mrb[31].mxu0 }
 0xa96   : > { %v2750_v26 = vadd.f32 %v6454_v58, %v2749_v49 }
 0xa97   : > { %v10388_v43 = vadd.f32 %v2755_v59, %v11876_v5 }
 0xa98   : > { %v10391_v45 = vadd.f32 %v2750_v26, %v11877_v50 }
 0xa99   : > { %v2789_v8 = vsel %vm846_vm8, %v10388_v43, 0.0 }
 0xa9a   : > { %2790 = vadd.xlane.f32.xlu0 %v2789_v8  ;;  %v2786_v62 = vsel %vm846_vm8, %v10391_v45, 0.0 }
 0xa9b   : > { %2787 = vadd.xlane.f32.xlu1 %v2786_v62 }
 0xaf4   : > { %v2773_v63 = vpop.xlane.xlu0 %2772 }
 0xaf5   : > { %v2798_v48 = vrot.slane %v2773_v63, 4  ;;  %v2770_v53 = vpop.xlane.xlu1 %2769 }
 0xaf6   : > { %v2792_v60 = vrot.slane %v2770_v53, 4 }
 0xaf7   : > { %v2799_v23 = vadd.f32 %v2798_v48, %v2773_v63 }
 0xaf8   : > { %v2793_v10 = vadd.f32 %v2792_v60, %v2770_v53  ;;  %v2779_v38 = vpop.xlane.xlu0 %2778 }
 0xaf9   : > { %v2800_v36 = vrot.slane %v2799_v23, 2  ;;  %v2810_v29 = vrot.slane %v2779_v38, 4  ;;  %v2776_v3 = vpop.xlane.xlu1 %2775 }
 0xafa   : > { %v2794_v14 = vrot.slane %v2793_v10, 2  ;;  %v2804_v47 = vrot.slane %v2776_v3, 4 }
 0xafb   : > { %v2801_v37 = vadd.f32 %v2800_v36, %v2799_v23  ;;  %v2811_v54 = vadd.f32 %v2810_v29, %v2779_v38 }
 0xafc   : > { %v2795_v39 = vadd.f32 %v2794_v14, %v2793_v10  ;;  %v2805_v4 = vadd.f32 %v2804_v47, %v2776_v3  ;;  %v2785_v28 = vpop.xlane.xlu0 %2784 }
 0xafd   : > { %v2802_v21 = vrot.slane %v2801_v37, 1  ;;  %v2812_v35 = vrot.slane %v2811_v54, 2  ;;  %v2822_v0 = vrot.slane %v2785_v28, 4  ;;  %v2782_v16 = vpop.xlane.xlu1 %2781 }
 0xafe   : > { %v2796_v57 = vrot.slane %v2795_v39, 1  ;;  %v2806_v58 = vrot.slane %v2805_v4, 2  ;;  %v2816_v33 = vrot.slane %v2782_v16, 4 }
 0xaff   : > { %v2803_v17 = vadd.f32 %v2802_v21, %v2801_v37  ;;  %v2813_v32 = vadd.f32 %v2812_v35, %v2811_v54  ;;  %v2823_v9 = vadd.f32 %v2822_v0, %v2785_v28  ;;  %v2985_v28 = vld [vmem:[#allocation10 + $0x8] sm:$0xff] }
 0xb00   : > { %v2797_v44 = vadd.f32 %v2796_v57, %v2795_v39  ;;  %v2807_v46 = vadd.f32 %v2806_v58, %v2805_v4  ;;  %v2817_v7 = vadd.f32 %v2816_v33, %v2782_v16  ;;  %v2984_v4 = vld [vmem:[#allocation10] sm:$0xff]  ;;  %v2986_v16 = vld [vmem:[#allocation10 + $0x10] sm:$0xff]  ;;  %v2987_v57 = vld [vmem:[#allocation10 + $0x18] sm:$0xff] }
 0xb01   : > { %v2814_v52 = vrot.slane %v2813_v32, 1  ;;  %v2824_v55 = vrot.slane %v2823_v9, 2  ;;  %v2841_v11 = vmul.f32 0.00390625, %v2803_v17  ;;  %v7751_v35 = vpack.c.bf16 %v2985_v28, %v2984_v4 }
 0xb02   : > { %v2808_v15 = vrot.slane %v2807_v46, 1  ;;  %v2818_v1 = vrot.slane %v2817_v7, 2  ;;  %v2840_v40 = vmul.f32 0.00390625, %v2797_v44  ;;  %v7755_v33 = vpack.c.bf16 %v2987_v57, %v2986_v16 }
 0xb03   : > { %v2815_v12 = vadd.f32 %v2814_v52, %v2813_v32  ;;  %v2825_v19 = vadd.f32 %v2824_v55, %v2823_v9  ;;  %v10398_v22 = vsub.f32 %v10358_v34, %v2841_v11  ;;  %7752 = vmatprep.subr.bf16.mxu0 %v7751_v35 }
 0xb04   : > { %v2809_v2 = vadd.f32 %v2808_v15, %v2807_v46  ;;  %v2819_v41 = vadd.f32 %v2818_v1, %v2817_v7  ;;  %v10401_v6 = vsub.f32 %v10361_v51, %v2840_v40  ;;  %7754 = vmatpush3.bf16.msra.mxu0 %v7751_v35 }
 0xb05   : > { %v2826_v31 = vrot.slane %v2825_v19, 1  ;;  %v2857_v18 = vmul.f32 %v10398_v22, %v10398_v22  ;;  %v2843_v20 = vmul.f32 0.00390625, %v2815_v12  ;;  %7756 = vmatprep.subr.bf16.mxu0 %v7755_v33 }
 0xb06   : > { %v2820_v27 = vrot.slane %v2819_v41, 1  ;;  %v2856_v24 = vmul.f32 %v10401_v6, %v10401_v6  ;;  %v2842_v61 = vmul.f32 0.00390625, %v2809_v2 }
 0xb07   : > { %v2827_v59 = vadd.f32 %v2826_v31, %v2825_v19  ;;  %v2867_v49 = vsel %vm846_vm8, %v2857_v18, 0.0  ;;  %v10409_v34 = vsub.f32 %v10368_v25, %v2843_v20 }
 0xb08   : > { %v2821_v26 = vadd.f32 %v2820_v27, %v2819_v41  ;;  %2868 = vadd.xlane.f32.xlu0 %v2867_v49  ;;  %v2864_v51 = vsel %vm846_vm8, %v2856_v24, 0.0  ;;  %v10413_v5 = vsub.f32 %v10371_v56, %v2842_v61  ;;  %7758 = vmatpush3.bf16.msra.mxu0 %v7755_v33 }
 0xb09   : > { %2865 = vadd.xlane.f32.xlu1 %v2864_v51  ;;  %v2859_v50 = vmul.f32 %v10409_v34, %v10409_v34  ;;  %v2845_v8 = vmul.f32 0.00390625, %v2827_v59 }
 0xb0a   : > { %v2858_v62 = vmul.f32 %v10413_v5, %v10413_v5  ;;  %v2844_v63 = vmul.f32 0.00390625, %v2821_v26 }
 0xb0b   : > { %v2873_v48 = vsel %vm846_vm8, %v2859_v50, 0.0  ;;  %v10421_v25 = vsub.f32 %v10378_v30, %v2845_v8 }
 0xb0c   : > { %2874 = vadd.xlane.f32.xlu0 %v2873_v48  ;;  %v2870_v53 = vsel %vm846_vm8, %v2858_v62, 0.0  ;;  %v10425_v56 = vsub.f32 %v10381_v42, %v2844_v63 }
 0xb0d   : > { %2871 = vadd.xlane.f32.xlu1 %v2870_v53  ;;  %v2861_v60 = vmul.f32 %v10421_v25, %v10421_v25 }
 0xb0e   : > { %v2860_v23 = vmul.f32 %v10425_v56, %v10425_v56 }
 0xb0f   : > { %v2879_v10 = vsel %vm846_vm8, %v2861_v60, 0.0 }
 0xb10   : > { %2880 = vadd.xlane.f32.xlu0 %v2879_v10  ;;  %v2876_v38 = vsel %vm846_vm8, %v2860_v23, 0.0 }
 0xb11   : > { %2877 = vadd.xlane.f32.xlu1 %v2876_v38 }
 0xb27   : > { %v2791_v30 = vpop.xlane.xlu0 %2790 }
 0xb28   : > { %v2834_v36 = vrot.slane %v2791_v30, 4  ;;  %v2788_v29 = vpop.xlane.xlu1 %2787 }
 0xb29   : > { %v2828_v3 = vrot.slane %v2788_v29, 4 }
 0xb2a   : > { %v2835_v14 = vadd.f32 %v2834_v36, %v2791_v30 }
 0xb2b   : > { %v2829_v42 = vadd.f32 %v2828_v3, %v2788_v29 }
 0xb2c   : > { %v2836_v47 = vrot.slane %v2835_v14, 2 }
 0xb2d   : > { %v2830_v37 = vrot.slane %v2829_v42, 2 }
 0xb2e   : > { %v2837_v54 = vadd.f32 %v2836_v47, %v2835_v14 }
 0xb2f   : > { %v2831_v39 = vadd.f32 %v2830_v37, %v2829_v42 }
 0xb30   : > { %v2838_v21 = vrot.slane %v2837_v54, 1 }
 0xb31   : > { %v2832_v0 = vrot.slane %v2831_v39, 1 }
 0xb32   : > { %v2839_v58 = vadd.f32 %v2838_v21, %v2837_v54 }
 0xb33   : > { %v2833_v17 = vadd.f32 %v2832_v0, %v2831_v39 }
 0xb34   : > { %v2847_v32 = vmul.f32 0.00390625, %v2839_v58 }
 0xb35   : > { %v2846_v9 = vmul.f32 0.00390625, %v2833_v17 }
 0xb36   : > { %v10434_v44 = vsub.f32 %v10388_v43, %v2847_v32 }
 0xb37   : > { %v10437_v46 = vsub.f32 %v10391_v45, %v2846_v9 }
 0xb38   : > { %v2863_v7 = vmul.f32 %v10434_v44, %v10434_v44 }
 0xb39   : > { %v2862_v52 = vmul.f32 %v10437_v46, %v10437_v46 }
 0xb3a   : > { %v2885_v55 = vsel %vm846_vm8, %v2863_v7, 0.0 }
 0xb3b   : > { %2886 = vadd.xlane.f32.xlu0 %v2885_v55  ;;  %v2882_v11 = vsel %vm846_vm8, %v2862_v52, 0.0 }
 0xb3c   : > { %2883 = vadd.xlane.f32.xlu1 %v2882_v11 }
 0xb95   : > { %v2869_v15 = vpop.xlane.xlu0 %2868 }
 0xb96   : > { %v2894_v1 = vrot.slane %v2869_v15, 4  ;;  %v2866_v43 = vpop.xlane.xlu1 %2865 }
 0xb97   : > { %v2888_v40 = vrot.slane %v2866_v43, 4 }
 0xb98   : > { %v2895_v12 = vadd.f32 %v2894_v1, %v2869_v15  ;;  %v2766_v15 = vld [vmem:[#allocation7] sm:$0xff] }
 0xb99   : > { %v2889_v45 = vadd.f32 %v2888_v40, %v2866_v43  ;;  %v2875_v19 = vpop.xlane.xlu0 %2874 }
 0xb9a   : > { %v2896_v2 = vrot.slane %v2895_v12, 2  ;;  %v2906_v41 = vrot.slane %v2875_v19, 4  ;;  %v2872_v31 = vpop.xlane.xlu1 %2871 }
 0xb9b   : > { %v2890_v18 = vrot.slane %v2889_v45, 2  ;;  %v2900_v20 = vrot.slane %v2872_v31, 4 }
 0xb9c   : > { %v2897_v27 = vadd.f32 %v2896_v2, %v2895_v12  ;;  %v2907_v24 = vadd.f32 %v2906_v41, %v2875_v19  ;;  %v2767_v12 = vld [vmem:[#allocation8] sm:$0xff] }
 0xb9d   : > { %v2891_v61 = vadd.f32 %v2890_v18, %v2889_v45  ;;  %v2901_v59 = vadd.f32 %v2900_v20, %v2872_v31  ;;  %v2881_v49 = vpop.xlane.xlu0 %2880 }
 0xb9e   : > { %v2898_v26 = vrot.slane %v2897_v27, 1  ;;  %v2908_v51 = vrot.slane %v2907_v24, 2  ;;  %v2918_v50 = vrot.slane %v2881_v49, 4  ;;  %v2878_v8 = vpop.xlane.xlu1 %2877 }
 0xb9f   : > { %v2892_v62 = vrot.slane %v2891_v61, 1  ;;  %v2902_v63 = vrot.slane %v2901_v59, 2  ;;  %v2912_v48 = vrot.slane %v2878_v8, 4 }
 0xba0   : > { %v2899_v53 = vadd.f32 %v2898_v26, %v2897_v27  ;;  %v2909_v60 = vadd.f32 %v2908_v51, %v2907_v24  ;;  %v2919_v23 = vadd.f32 %v2918_v50, %v2881_v49 }
 0xba1   : > { %v2893_v10 = vadd.f32 %v2892_v62, %v2891_v61  ;;  %v2903_v38 = vadd.f32 %v2902_v63, %v2901_v59  ;;  %v2913_v30 = vadd.f32 %v2912_v48, %v2878_v8 }
 0xba2   : > { %v2937_v36 = vmul.f32 0.00390625, %v2899_v53  ;;  %v2910_v29 = vrot.slane %v2909_v60, 1  ;;  %v2920_v3 = vrot.slane %v2919_v23, 2 }
 0xba3   : > { %v2936_v14 = vmul.f32 0.00390625, %v2893_v10  ;;  %v2904_v42 = vrot.slane %v2903_v38, 1  ;;  %v2914_v47 = vrot.slane %v2913_v30, 2 }
 0xba4   : > { %v2945_v37 = vadd.f32 1e-05, %v2937_v36  ;;  %v2911_v54 = vadd.f32 %v2910_v29, %v2909_v60  ;;  %v2921_v39 = vadd.f32 %v2920_v3, %v2919_v23 }
 0xba5   : > { %v2944_v4 = vadd.f32 1e-05, %v2936_v14  ;;  %v2905_v28 = vadd.f32 %v2904_v42, %v2903_v38  ;;  %v2915_v21 = vadd.f32 %v2914_v47, %v2913_v30 }
 0xba6   : > { %8594 = vrsqrt.f32 %v2945_v37  ;;  %v2939_v35 = vmul.f32 0.00390625, %v2911_v54  ;;  %v2922_v0 = vrot.slane %v2921_v39, 1 }
 0xba7   : > { %8596 = vrsqrt.f32 %v2944_v4  ;;  %v2938_v16 = vmul.f32 0.00390625, %v2905_v28  ;;  %v2916_v57 = vrot.slane %v2915_v21, 1 }
 0xba8   : > { %v2947_v58 = vadd.f32 1e-05, %v2939_v35  ;;  %v2923_v33 = vadd.f32 %v2922_v0, %v2921_v39 }
 0xba9   : > { %v2946_v17 = vadd.f32 1e-05, %v2938_v16  ;;  %v2917_v32 = vadd.f32 %v2916_v57, %v2915_v21  ;;  %v11878_v57 = vmov 0.0  }
 0xbaa   : > { %8598 = vrsqrt.f32 %v2947_v58  ;;  %v2941_v9 = vmul.f32 0.00390625, %v2923_v33  ;;  %v6463_v58 = vld [vmem:[#allocation11] ss:$0 sm:$0xff] }
 0xbab   : > { %8600 = vrsqrt.f32 %v2946_v17  ;;  %v2940_v7 = vmul.f32 0.00390625, %v2917_v32 }
 0xbac   : > { %v2949_v52 = vadd.f32 1e-05, %v2941_v9 }
 0xbad   : > { %v2948_v55 = vadd.f32 1e-05, %v2940_v7 }
 0xbae   : > { %8602 = vrsqrt.f32 %v2949_v52 }
 0xbaf   : > { %8604 = vrsqrt.f32 %v2948_v55 }
 0xbb0   : > { %v8595_v11 = vpop.eup %8594 }
 0xbb1   : > { %v8597_v1 = vpop.eup %8596  ;;  %v2961_v43 = vmul.f32 %v8595_v11, %v10398_v22 }
 0xbb2   : > { %v2960_v40 = vmul.f32 %v8597_v1, %v10401_v6 }
 0xbb3   : > { %v2969_v45 = vmul.f32 %v2961_v43, %v2766_v15 }
 0xbb4   : > { %v8599_v19 = vpop.eup %8598  ;;  %v2968_v2 = vmul.f32 %v2960_v40, %v2766_v15 }
 0xbb5   : > { %v8601_v41 = vpop.eup %8600  ;;  %v2963_v31 = vmul.f32 %v8599_v19, %v10409_v34  ;;  %v2977_v27 = vadd.f32 %v2969_v45, %v2767_v12 }
 0xbb6   : > { %v2976_v18 = vadd.f32 %v2968_v2, %v2767_v12  ;;  %v2962_v20 = vmul.f32 %v8601_v41, %v10413_v5 }
 0xbb7   : > { %v2971_v24 = vmul.f32 %v2963_v31, %v2766_v15 }
 0xbb8   : > { %v8603_v61 = vpop.eup %8602  ;;  %7267 = vmatprep.mubr.msk.f32.mxu0 %vm846_vm8, %v2976_v18  ;;  %v2970_v59 = vmul.f32 %v2962_v20, %v2766_v15 }
 0xbb9   : > { %v8605_v49 = vpop.eup %8604  ;;  %7268 = vmatmul.mubr.msk.f32.vlgmr.msra.gmra.mrb[32].mxu0 %vm846_vm8, %v2977_v27  ;;  %v2965_v22 = vmul.f32 %v8603_v61, %v10421_v25  ;;  %v2979_v51 = vadd.f32 %v2971_v24, %v2767_v12 }
 0xbba   : > { %v2978_v6 = vadd.f32 %v2970_v59, %v2767_v12  ;;  %v2964_v26 = vmul.f32 %v8605_v49, %v10425_v56 }
 0xbbb   : > { %v2973_v50 = vmul.f32 %v2965_v22, %v2766_v15 }
 0xbbc   : > { %7270 = vmatprep.mubr.msk.f32.mxu0 %vm846_vm8, %v2978_v6  ;;  %v2972_v34 = vmul.f32 %v2964_v26, %v2766_v15 }
 0xbbd   : > { %7271 = vmatmul.mubr.msk.f32.gmra.mrb[34].mxu0 %vm846_vm8, %v2979_v51  ;;  %v2981_v8 = vadd.f32 %v2973_v50, %v2767_v12 }
 0xbbe   : > { %v2980_v5 = vadd.f32 %v2972_v34, %v2767_v12 }
 0xbc0   : > { %7273 = vmatprep.mubr.msk.f32.mxu0 %vm846_vm8, %v2980_v5 }
 0xbc1   : > { %7274 = vmatmul.mubr.msk.f32.gmra.mrb[36].mxu0 %vm846_vm8, %v2981_v8 }
 0xbc8   : > { %v2887_v62 = vpop.xlane.xlu0 %2886 }
 0xbc9   : > { %v2930_v63 = vrot.slane %v2887_v62, 4  ;;  %v2884_v48 = vpop.xlane.xlu1 %2883 }
 0xbca   : > { %v2924_v25 = vrot.slane %v2884_v48, 4 }
 0xbcb   : > { %v2931_v53 = vadd.f32 %v2930_v63, %v2887_v62 }
 0xbcc   : > { %v2925_v60 = vadd.f32 %v2924_v25, %v2884_v48 }
 0xbcd   : > { %v2932_v56 = vrot.slane %v2931_v53, 2 }
 0xbce   : > { %v2926_v23 = vrot.slane %v2925_v60, 2 }
 0xbcf   : > { %v2933_v10 = vadd.f32 %v2932_v56, %v2931_v53 }
 0xbd0   : > { %v2927_v38 = vadd.f32 %v2926_v23, %v2925_v60 }
 0xbd1   : > { %v2934_v30 = vrot.slane %v2933_v10, 1 }
 0xbd2   : > { %v2928_v36 = vrot.slane %v2927_v38, 1 }
 0xbd3   : > { %v2935_v29 = vadd.f32 %v2934_v30, %v2933_v10 }
 0xbd4   : > { %v2929_v3 = vadd.f32 %v2928_v36, %v2927_v38 }
 0xbd5   : > { %v2943_v14 = vmul.f32 0.00390625, %v2935_v29 }
 0xbd6   : > { %v2942_v42 = vmul.f32 0.00390625, %v2929_v3 }
 0xbd7   : > { %v2951_v47 = vadd.f32 1e-05, %v2943_v14 }
 0xbd8   : > { %v2950_v37 = vadd.f32 1e-05, %v2942_v42 }
 0xbd9   : > { %8606 = vrsqrt.f32 %v2951_v47 }
 0xbda   : > { %8608 = vrsqrt.f32 %v2950_v37 }
 0xbe3   : > { %v8607_v54 = vpop.eup %8606 }
 0xbe4   : > { %v8609_v39 = vpop.eup %8608  ;;  %v2967_v4 = vmul.f32 %v8607_v54, %v10434_v44 }
 0xbe5   : > { %v2966_v28 = vmul.f32 %v8609_v39, %v10437_v46 }
 0xbe6   : > { %v2975_v21 = vmul.f32 %v2967_v4, %v2766_v15 }
 0xbe7   : > { %v2974_v35 = vmul.f32 %v2966_v28, %v2766_v15 }
 0xbe8   : > { %v2983_v16 = vadd.f32 %v2975_v21, %v2767_v12 }
 0xbe9   : > { %v2982_v0 = vadd.f32 %v2974_v35, %v2767_v12 }
 0xbeb   : > { %7276 = vmatprep.mubr.msk.f32.mxu0 %vm846_vm8, %v2982_v0 }
 0xbec   : > { %7277 = vmatmul.mubr.msk.f32.gmra.mrb[38].mxu0 %vm846_vm8, %v2983_v16 }
 0xbed   : > { %3460 = vmatprep.mubr.f32.mxu0 %v11878_v57 }
 0xc8c   : > { %v7269_v33 = vpop.f32.mrb[32].mxu0 }
 0xc8d   : > { %v3091_v17 = vadd.f32 %v7269_v33, %v6463_v58  ;;  %v3085_v32 = vpop.f32.mrb[33].mxu0 }
 0xc8e   : > { %v3086_v9 = vadd.f32 %v6463_v58, %v3085_v32 }
 0xc8f   : > { %v10462_v7 = vadd.f32 %v3091_v17, %v2977_v27 }
 0xc90   : > { %v10464_v44 = vadd.f32 %v3086_v9, %v2976_v18  ;;  %v7272_v46 = vpop.f32.mrb[34].mxu0 }
 0xc91   : > { %v3101_v52 = vadd.f32 %v7272_v46, %v6463_v58  ;;  %v3095_v55 = vpop.f32.mrb[35].mxu0  ;;  %v3137_v11 = vsel %vm846_vm8, %v10462_v7, 0.0 }
 0xc92   : > { %v3096_v15 = vadd.f32 %v6463_v58, %v3095_v55  ;;  %3138 = vadd.xlane.f32.xlu0 %v3137_v11  ;;  %v3134_v1 = vsel %vm846_vm8, %v10464_v44, 0.0 }
 0xc93   : > { %v10470_v43 = vadd.f32 %v3101_v52, %v2979_v51  ;;  %3135 = vadd.xlane.f32.xlu1 %v3134_v1 }
 0xc94   : > { %v10472_v40 = vadd.f32 %v3096_v15, %v2978_v6  ;;  %v7275_v12 = vpop.f32.mrb[36].mxu0 }
 0xc95   : > { %v3111_v45 = vadd.f32 %v7275_v12, %v6463_v58  ;;  %v3105_v19 = vpop.f32.mrb[37].mxu0  ;;  %v3143_v2 = vsel %vm846_vm8, %v10470_v43, 0.0 }
 0xc96   : > { %v3106_v41 = vadd.f32 %v6463_v58, %v3105_v19  ;;  %3144 = vadd.xlane.f32.xlu0 %v3143_v2  ;;  %v3140_v31 = vsel %vm846_vm8, %v10472_v40, 0.0 }
 0xc97   : > { %v10478_v18 = vadd.f32 %v3111_v45, %v2981_v8  ;;  %3141 = vadd.xlane.f32.xlu1 %v3140_v31 }
 0xc98   : > { %v10480_v20 = vadd.f32 %v3106_v41, %v2980_v5 }
 0xc99   : > { %v3149_v27 = vsel %vm846_vm8, %v10478_v18, 0.0 }
 0xc9a   : > { %3150 = vadd.xlane.f32.xlu0 %v3149_v27  ;;  %v3146_v24 = vsel %vm846_vm8, %v10480_v20, 0.0 }
 0xc9b   : > { %3147 = vadd.xlane.f32.xlu1 %v3146_v24 }
 0xcbf   : > { %v7278_v61 = vpop.f32.mrb[38].mxu0 }
 0xcc0   : > { %v3121_v59 = vadd.f32 %v7278_v61, %v6463_v58  ;;  %v3115_v49 = vpop.f32.mrb[39].mxu0 }
 0xcc1   : > { %v3116_v22 = vadd.f32 %v6463_v58, %v3115_v49 }
 0xcc2   : > { %v10486_v6 = vadd.f32 %v3121_v59, %v2983_v16 }
 0xcc3   : > { %v10488_v26 = vadd.f32 %v3116_v22, %v2982_v0 }
 0xcc4   : > { %v3155_v51 = vsel %vm846_vm8, %v10486_v6, 0.0 }
 0xcc5   : > { %3156 = vadd.xlane.f32.xlu0 %v3155_v51  ;;  %v3152_v50 = vsel %vm846_vm8, %v10488_v26, 0.0 }
 0xcc6   : > { %3153 = vadd.xlane.f32.xlu1 %v3152_v50 }
 0xd1f   : > { %v3139_v34 = vpop.xlane.xlu0 %3138 }
 0xd20   : > { %v3164_v5 = vrot.slane %v3139_v34, 4  ;;  %v3136_v8 = vpop.xlane.xlu1 %3135 }
 0xd21   : > { %v3158_v62 = vrot.slane %v3136_v8, 4 }
 0xd22   : > { %v3165_v63 = vadd.f32 %v3164_v5, %v3139_v34 }
 0xd23   : > { %v3159_v48 = vadd.f32 %v3158_v62, %v3136_v8  ;;  %v3145_v25 = vpop.xlane.xlu0 %3144 }
 0xd24   : > { %v3166_v53 = vrot.slane %v3165_v63, 2  ;;  %v3176_v60 = vrot.slane %v3145_v25, 4  ;;  %v3142_v56 = vpop.xlane.xlu1 %3141 }
 0xd25   : > { %v3160_v23 = vrot.slane %v3159_v48, 2  ;;  %v3170_v10 = vrot.slane %v3142_v56, 4 }
 0xd26   : > { %v3167_v38 = vadd.f32 %v3166_v53, %v3165_v63  ;;  %v3177_v30 = vadd.f32 %v3176_v60, %v3145_v25 }
 0xd27   : > { %v3161_v36 = vadd.f32 %v3160_v23, %v3159_v48  ;;  %v3171_v29 = vadd.f32 %v3170_v10, %v3142_v56  ;;  %v3151_v3 = vpop.xlane.xlu0 %3150 }
 0xd28   : > { %v3168_v14 = vrot.slane %v3167_v38, 1  ;;  %v3178_v42 = vrot.slane %v3177_v30, 2  ;;  %v3188_v47 = vrot.slane %v3151_v3, 4  ;;  %v3148_v37 = vpop.xlane.xlu1 %3147 }
 0xd29   : > { %v3162_v54 = vrot.slane %v3161_v36, 1  ;;  %v3172_v39 = vrot.slane %v3171_v29, 2  ;;  %v3182_v4 = vrot.slane %v3148_v37, 4 }
 0xd2a   : > { %v3169_v28 = vadd.f32 %v3168_v14, %v3167_v38  ;;  %v3179_v21 = vadd.f32 %v3178_v42, %v3177_v30  ;;  %v3189_v35 = vadd.f32 %v3188_v47, %v3151_v3  ;;  %v6475_v3 = vld [vmem:[%s11735_s4 + $0x58] sm:$0xff]  ;;  %v6472_v47 = vld [vmem:[%s11735_s4 + $0x40] sm:$0xff] }
 0xd2b   : > { %v3163_v0 = vadd.f32 %v3162_v54, %v3161_v36  ;;  %v3173_v16 = vadd.f32 %v3172_v39, %v3171_v29  ;;  %v3183_v58 = vadd.f32 %v3182_v4, %v3148_v37  ;;  %v6473_v29 = vld [vmem:[%s11735_s4 + $0x48] sm:$0xff]  ;;  %v6474_v37 = vld [vmem:[%s11735_s4 + $0x50] sm:$0xff] }
 0xd2c   : > { %v3180_v33 = vrot.slane %v3179_v21, 1  ;;  %v3190_v17 = vrot.slane %v3189_v35, 2  ;;  %v3207_v32 = vmul.f32 0.00390625, %v3169_v28  ;;  %v7759_v42 = vpack.c.bf16 %v6475_v3, %v6473_v29 }
 0xd2d   : > { %v3174_v9 = vrot.slane %v3173_v16, 1  ;;  %v3184_v46 = vrot.slane %v3183_v58, 2  ;;  %v3206_v52 = vmul.f32 0.00390625, %v3163_v0  ;;  %v7761_v39 = vpack.c.bf16 %v6474_v37, %v6472_v47  ;;  %v6476_v0 = vld [vmem:[%s11735_s4 + $0x60] sm:$0xff] }
 0xd2e   : > { %v3181_v55 = vadd.f32 %v3180_v33, %v3179_v21  ;;  %v3191_v11 = vadd.f32 %v3190_v17, %v3189_v35  ;;  %v10495_v15 = vsub.f32 %v10462_v7, %v3207_v32  ;;  %7760 = vmatprep.subr.bf16.mxu0 %v7759_v42  ;;  %v6477_v21 = vld [vmem:[%s11735_s4 + $0x68] sm:$0xff]  ;;  %v6479_v35 = vld [vmem:[%s11735_s4 + $0x78] sm:$0xff]  ;;  %v6478_v33 = vld [vmem:[%s11735_s4 + $0x70] sm:$0xff] }
 0xd2f   : > { %v3175_v1 = vadd.f32 %v3174_v9, %v3173_v16  ;;  %v3185_v12 = vadd.f32 %v3184_v46, %v3183_v58  ;;  %v10498_v45 = vsub.f32 %v10464_v44, %v3206_v52  ;;  %7762 = vmatpush1.bf16.msra.mxu0 %v7761_v39  ;;  %v7763_v58 = vpack.c.bf16 %v6479_v35, %v6477_v21 }
 0xd30   : > { %v3192_v19 = vrot.slane %v3191_v11, 1  ;;  %v3223_v2 = vmul.f32 %v10495_v15, %v10495_v15  ;;  %v3209_v41 = vmul.f32 0.00390625, %v3181_v55  ;;  %v7765_v32 = vpack.c.bf16 %v6478_v33, %v6476_v0 }
 0xd31   : > { %v3186_v31 = vrot.slane %v3185_v12, 1  ;;  %v3222_v27 = vmul.f32 %v10498_v45, %v10498_v45  ;;  %v3208_v24 = vmul.f32 0.00390625, %v3175_v1  ;;  %7764 = vmatprep.subr.bf16.mxu0 %v7763_v58 }
 0xd32   : > { %v3193_v61 = vadd.f32 %v3192_v19, %v3191_v11  ;;  %v3233_v59 = vsel %vm846_vm8, %v3223_v2, 0.0  ;;  %v10506_v7 = vsub.f32 %v10470_v43, %v3209_v41 }
 0xd33   : > { %v3187_v49 = vadd.f32 %v3186_v31, %v3185_v12  ;;  %3234 = vadd.xlane.f32.xlu0 %v3233_v59  ;;  %v3230_v44 = vsel %vm846_vm8, %v3222_v27, 0.0  ;;  %v10510_v22 = vsub.f32 %v10472_v40, %v3208_v24  ;;  %7766 = vmatpush1.bf16.msra.mxu0 %v7765_v32 }
 0xd34   : > { %3231 = vadd.xlane.f32.xlu1 %v3230_v44  ;;  %v3225_v51 = vmul.f32 %v10506_v7, %v10506_v7  ;;  %v3211_v50 = vmul.f32 0.00390625, %v3193_v61 }
 0xd35   : > { %v3224_v34 = vmul.f32 %v10510_v22, %v10510_v22  ;;  %v3210_v5 = vmul.f32 0.00390625, %v3187_v49 }
 0xd36   : > { %v3239_v8 = vsel %vm846_vm8, %v3225_v51, 0.0  ;;  %v10518_v43 = vsub.f32 %v10478_v18, %v3211_v50 }
 0xd37   : > { %3240 = vadd.xlane.f32.xlu0 %v3239_v8  ;;  %v3236_v62 = vsel %vm846_vm8, %v3224_v34, 0.0  ;;  %v10522_v40 = vsub.f32 %v10480_v20, %v3210_v5 }
 0xd38   : > { %3237 = vadd.xlane.f32.xlu1 %v3236_v62  ;;  %v3227_v63 = vmul.f32 %v10518_v43, %v10518_v43 }
 0xd39   : > { %v3226_v48 = vmul.f32 %v10522_v40, %v10522_v40 }
 0xd3a   : > { %v3245_v25 = vsel %vm846_vm8, %v3227_v63, 0.0 }
 0xd3b   : > { %3246 = vadd.xlane.f32.xlu0 %v3245_v25  ;;  %v3242_v53 = vsel %vm846_vm8, %v3226_v48, 0.0 }
 0xd3c   : > { %3243 = vadd.xlane.f32.xlu1 %v3242_v53 }
 0xd52   : > { %v3157_v18 = vpop.xlane.xlu0 %3156 }
 0xd53   : > { %v3200_v60 = vrot.slane %v3157_v18, 4  ;;  %v3154_v56 = vpop.xlane.xlu1 %3153 }
 0xd54   : > { %v3194_v23 = vrot.slane %v3154_v56, 4 }
 0xd55   : > { %v3201_v10 = vadd.f32 %v3200_v60, %v3157_v18 }
 0xd56   : > { %v3195_v20 = vadd.f32 %v3194_v23, %v3154_v56 }
 0xd57   : > { %v3202_v38 = vrot.slane %v3201_v10, 2 }
 0xd58   : > { %v3196_v30 = vrot.slane %v3195_v20, 2 }
 0xd59   : > { %v3203_v36 = vadd.f32 %v3202_v38, %v3201_v10 }
 0xd5a   : > { %v3197_v14 = vadd.f32 %v3196_v30, %v3195_v20 }
 0xd5b   : > { %v3204_v54 = vrot.slane %v3203_v36, 1 }
 0xd5c   : > { %v3198_v4 = vrot.slane %v3197_v14, 1 }
 0xd5d   : > { %v3205_v28 = vadd.f32 %v3204_v54, %v3203_v36 }
 0xd5e   : > { %v3199_v16 = vadd.f32 %v3198_v4, %v3197_v14 }
 0xd5f   : > { %v3213_v17 = vmul.f32 0.00390625, %v3205_v28 }
 0xd60   : > { %v3212_v9 = vmul.f32 0.00390625, %v3199_v16 }
 0xd61   : > { %v10555_v46 = vsub.f32 %v10486_v6, %v3213_v17 }
 0xd62   : > { %v10558_v52 = vsub.f32 %v10488_v26, %v3212_v9 }
 0xd63   : > { %v3229_v55 = vmul.f32 %v10555_v46, %v10555_v46 }
 0xd64   : > { %v3228_v11 = vmul.f32 %v10558_v52, %v10558_v52 }
 0xd65   : > { %v3251_v1 = vsel %vm846_vm8, %v3229_v55, 0.0 }
 0xd66   : > { %3252 = vadd.xlane.f32.xlu0 %v3251_v1  ;;  %v3248_v12 = vsel %vm846_vm8, %v3228_v11, 0.0 }
 0xd67   : > { %3249 = vadd.xlane.f32.xlu1 %v3248_v12 }
 0xdc0   : > { %v3235_v19 = vpop.xlane.xlu0 %3234 }
 0xdc1   : > { %v3260_v2 = vrot.slane %v3235_v19, 4  ;;  %v3232_v6 = vpop.xlane.xlu1 %3231 }
 0xdc2   : > { %v3254_v41 = vrot.slane %v3232_v6, 4 }
 0xdc3   : > { %v3261_v31 = vadd.f32 %v3260_v2, %v3235_v19 }
 0xdc4   : > { %v3255_v27 = vadd.f32 %v3254_v41, %v3232_v6  ;;  %v3241_v26 = vpop.xlane.xlu0 %3240  ;;  %v10566_v6 = vld [vmem:[#allocation13] sm:$0xff] }
 0xdc5   : > { %v3262_v24 = vrot.slane %v3261_v31, 2  ;;  %v3272_v61 = vrot.slane %v3241_v26, 4  ;;  %v3238_v59 = vpop.xlane.xlu1 %3237 }
 0xdc6   : > { %v3256_v49 = vrot.slane %v3255_v27, 2  ;;  %v3266_v44 = vrot.slane %v3238_v59, 4 }
 0xdc7   : > { %v3263_v51 = vadd.f32 %v3262_v24, %v3261_v31  ;;  %v3273_v50 = vadd.f32 %v3272_v61, %v3241_v26 }
 0xdc8   : > { %v3257_v34 = vadd.f32 %v3256_v49, %v3255_v27  ;;  %v3267_v5 = vadd.f32 %v3266_v44, %v3238_v59  ;;  %v3247_v8 = vpop.xlane.xlu0 %3246  ;;  %v10570_v27 = vld [vmem:[#allocation14] sm:$0xff] }
 0xdc9   : > { %v3264_v62 = vrot.slane %v3263_v51, 1  ;;  %v3274_v63 = vrot.slane %v3273_v50, 2  ;;  %v3284_v48 = vrot.slane %v3247_v8, 4  ;;  %v3244_v25 = vpop.xlane.xlu1 %3243 }
 0xdca   : > { %v3258_v53 = vrot.slane %v3257_v34, 1  ;;  %v3268_v18 = vrot.slane %v3267_v5, 2  ;;  %v3278_v60 = vrot.slane %v3244_v25, 4 }
 0xdcb   : > { %v3265_v56 = vadd.f32 %v3264_v62, %v3263_v51  ;;  %v3275_v23 = vadd.f32 %v3274_v63, %v3273_v50  ;;  %v3285_v10 = vadd.f32 %v3284_v48, %v3247_v8 }
 0xdcc   : > { %v3259_v20 = vadd.f32 %v3258_v53, %v3257_v34  ;;  %v3269_v38 = vadd.f32 %v3268_v18, %v3267_v5  ;;  %v3279_v30 = vadd.f32 %v3278_v60, %v3244_v25 }
 0xdcd   : > { %v3303_v36 = vmul.f32 0.00390625, %v3265_v56  ;;  %v3276_v29 = vrot.slane %v3275_v23, 1  ;;  %v3286_v3 = vrot.slane %v3285_v10, 2 }
 0xdce   : > { %v3302_v14 = vmul.f32 0.00390625, %v3259_v20  ;;  %v3270_v42 = vrot.slane %v3269_v38, 1  ;;  %v3280_v47 = vrot.slane %v3279_v30, 2 }
 0xdcf   : > { %v3311_v37 = vadd.f32 1e-05, %v3303_v36  ;;  %v3277_v54 = vadd.f32 %v3276_v29, %v3275_v23  ;;  %v3287_v39 = vadd.f32 %v3286_v3, %v3285_v10 }
 0xdd0   : > { %v3310_v4 = vadd.f32 1e-05, %v3302_v14  ;;  %v3271_v28 = vadd.f32 %v3270_v42, %v3269_v38  ;;  %v3281_v21 = vadd.f32 %v3280_v47, %v3279_v30 }
 0xdd1   : > { %8610 = vrsqrt.f32 %v3311_v37  ;;  %v3305_v35 = vmul.f32 0.00390625, %v3277_v54  ;;  %v3288_v0 = vrot.slane %v3287_v39, 1 }
 0xdd2   : > { %8612 = vrsqrt.f32 %v3310_v4  ;;  %v3304_v16 = vmul.f32 0.00390625, %v3271_v28  ;;  %v3282_v58 = vrot.slane %v3281_v21, 1 }
 0xdd3   : > { %v3313_v33 = vadd.f32 1e-05, %v3305_v35  ;;  %v3289_v32 = vadd.f32 %v3288_v0, %v3287_v39 }
 0xdd4   : > { %v3312_v17 = vadd.f32 1e-05, %v3304_v16  ;;  %v3283_v9 = vadd.f32 %v3282_v58, %v3281_v21 }
 0xdd5   : > { %v3307_v11 = vmul.f32 0.00390625, %v3289_v32 }
 0xdd6   : > { %8614 = vrsqrt.f32 %v3312_v17  ;;  %v3306_v55 = vmul.f32 0.00390625, %v3283_v9 }
 0xdd7   : > { %8616 = vrsqrt.f32 %v3313_v33  ;;  %v3315_v2 = vadd.f32 1e-05, %v3307_v11 }
 0xdd8   : > { %v3314_v1 = vadd.f32 1e-05, %v3306_v55 }
 0xdda   : > { %8618 = vrsqrt.f32 %v3314_v1 }
 0xddb   : > { %v8611_v12 = vpop.eup %8610  ;;  %8620 = vrsqrt.f32 %v3315_v2 }
 0xddc   : > { %v8613_v19 = vpop.eup %8612  ;;  %v3327_v31 = vmul.f32 %v8611_v12, %v10495_v15 }
 0xddd   : > { %v3326_v41 = vmul.f32 %v8613_v19, %v10498_v45 }
 0xdde   : > { %v3335_v59 = vmul.f32 %v3327_v31, %v10566_v6 }
 0xddf   : > { %v3334_v26 = vmul.f32 %v3326_v41, %v10566_v6 }
 0xde0   : > { %v8615_v24 = vpop.eup %8614  ;;  %v10582_v15 = vadd.f32 %v3335_v59, %v10570_v27 }
 0xde1   : > { %v10574_v61 = vadd.f32 %v3334_v26, %v10570_v27  ;;  %v3328_v49 = vmul.f32 %v8615_v24, %v10510_v22  ;;  %v8617_v44 = vpop.eup %8616 }
 0xde2   : > { %v3329_v51 = vmul.f32 %v8617_v44, %v10506_v7 }
 0xde3   : > { %6481 = vmatmul.mubr.msk.f32.vlgmr.msra.gmra.mrb[40].mxu0 %vm846_vm8, %v10574_v61  ;;  %v3336_v45 = vmul.f32 %v3328_v49, %v10566_v6 }
 0xde4   : > { %3466 = vmatprep.mubr.f32.mxu0 %v11878_v57  ;;  %v8619_v50 = vpop.eup %8618  ;;  %v3337_v34 = vmul.f32 %v3329_v51, %v10566_v6 }
 0xde5   : > { %v10590_v22 = vadd.f32 %v3336_v45, %v10570_v27  ;;  %v3330_v5 = vmul.f32 %v8619_v50, %v10522_v40  ;;  %v8621_v8 = vpop.eup %8620 }
 0xde6   : > { %v10598_v7 = vadd.f32 %v3337_v34, %v10570_v27  ;;  %v3331_v63 = vmul.f32 %v8621_v8, %v10518_v43 }
 0xde7   : > { %6482 = vmatmul.mubr.msk.f32.gmra.mrb[42].mxu0 %vm846_vm8, %v10582_v15  ;;  %11879 = vst [vmem:[#allocation48_spill] sm:$0xff] %v10590_v22  ;;  %v3338_v62 = vmul.f32 %v3330_v5, %v10566_v6 }
 0xde8   : > { %3472 = vmatprep.mubr.f32.mxu0 %v11878_v57  ;;  %11880 = vst [vmem:[#allocation50_spill] sm:$0xff] %v10598_v7  ;;  %v3339_v48 = vmul.f32 %v3331_v63, %v10566_v6 }
 0xde9   : > { %v10606_v40 = vadd.f32 %v3338_v62, %v10570_v27 }
 0xdea   : > { %v10613_v43 = vadd.f32 %v3339_v48, %v10570_v27 }
 0xdeb   : > { %6483 = vmatmul.mubr.msk.f32.gmra.mrb[44].mxu0 %vm846_vm8, %v10590_v22  ;;  %11881 = vst [vmem:[#allocation49_spill] sm:$0xff] %v10606_v40 }
 0xdec   : > { %3478 = vmatprep.mubr.f32.mxu0 %v11878_v57  ;;  %11882 = vst [vmem:[#allocation41_spill] sm:$0xff] %v10613_v43 }
 0xdef   : > { %6484 = vmatmul.mubr.msk.f32.gmra.mrb[46].mxu0 %vm846_vm8, %v10598_v7 }
 0xdf0   : > { %3484 = vmatprep.mubr.f32.mxu0 %v11878_v57 }
 0xdf3   : > { %v3253_v25 = vpop.xlane.xlu0 %3252  ;;  %6485 = vmatmul.mubr.msk.f32.gmra.mrb[48].mxu0 %vm846_vm8, %v10606_v40 }
 0xdf4   : > { %v3296_v53 = vrot.slane %v3253_v25, 4  ;;  %v3250_v18 = vpop.xlane.xlu1 %3249  ;;  %3490 = vmatprep.mubr.f32.mxu0 %v11878_v57 }
 0xdf5   : > { %v3290_v60 = vrot.slane %v3250_v18, 4 }
 0xdf6   : > { %v3297_v56 = vadd.f32 %v3296_v53, %v3253_v25 }
 0xdf7   : > { %v3291_v23 = vadd.f32 %v3290_v60, %v3250_v18  ;;  %6486 = vmatmul.mubr.msk.f32.gmra.mrb[50].mxu0 %vm846_vm8, %v10613_v43 }
 0xdf8   : > { %v3298_v10 = vrot.slane %v3297_v56, 2  ;;  %3496 = vmatprep.mubr.f32.mxu0 %v11878_v57 }
 0xdf9   : > { %v3292_v20 = vrot.slane %v3291_v23, 2 }
 0xdfa   : > { %v3299_v38 = vadd.f32 %v3298_v10, %v3297_v56 }
 0xdfb   : > { %v3293_v30 = vadd.f32 %v3292_v20, %v3291_v23 }
 0xdfc   : > { %v3300_v36 = vrot.slane %v3299_v38, 1 }
 0xdfd   : > { %v3294_v29 = vrot.slane %v3293_v30, 1 }
 0xdfe   : > { %v3301_v3 = vadd.f32 %v3300_v36, %v3299_v38 }
 0xdff   : > { %v3295_v14 = vadd.f32 %v3294_v29, %v3293_v30 }
 0xe00   : > { %v3309_v42 = vmul.f32 0.00390625, %v3301_v3 }
 0xe01   : > { %v3308_v47 = vmul.f32 0.00390625, %v3295_v14 }
 0xe02   : > { %v3317_v37 = vadd.f32 1e-05, %v3309_v42 }
 0xe03   : > { %v3316_v54 = vadd.f32 1e-05, %v3308_v47 }
 0xe04   : > { %8622 = vrsqrt.f32 %v3317_v37 }
 0xe05   : > { %8624 = vrsqrt.f32 %v3316_v54 }
 0xe0e   : > { %v8623_v39 = vpop.eup %8622 }
 0xe0f   : > { %v8625_v4 = vpop.eup %8624  ;;  %v3333_v21 = vmul.f32 %v8623_v39, %v10555_v46  ;;  %v6480_v46 = vld [vmem:[%s11736_s5 + $0x2] sm:$0x3] }
 0xe10   : > { %v3332_v28 = vmul.f32 %v8625_v4, %v10558_v52  ;;  %v11885_v52 = vld [vmem:[#allocation39_spill] sm:$0xff] }
 0xe11   : > { %v3341_v16 = vmul.f32 %v3333_v21, %v10566_v6  ;;  %v11886_v33 = vsub.s32 0, %v11885_v52  ;;  %v11887_v11 = vsub.s32 1, %v11885_v52 }
 0xe12   : > { %v3340_v35 = vmul.f32 %v3332_v28, %v10566_v6 }
 0xe13   : > { %v10629_v58 = vadd.f32 %v3341_v16, %v10570_v27  ;;  %v3365_v17 = vrot.slane %v6480_v46, %v11886_v33 }
 0xe14   : > { %v10622_v0 = vadd.f32 %v3340_v35, %v10570_v27 }
 0xe15   : > { %11884 = vst [vmem:[#allocation43_spill] sm:$0xff] %v10629_v58 }
 0xe16   : > { %11883 = vst [vmem:[#allocation40_spill] sm:$0xff] %v10622_v0  ;;  %6487 = vmatmul.mubr.msk.f32.gmra.mrb[52].mxu0 %vm846_vm8, %v10622_v0 }
 0xe17   : > { %3502 = vmatprep.mubr.f32.mxu0 %v11878_v57  ;;  %v3369_v57 = vrot.slane %v6480_v46, %v11887_v11 }
 0xe1a   : > { %6488 = vmatmul.mubr.msk.f32.gmra.mrb[54].mxu0 %vm846_vm8, %v10629_v58 }
 0xeb6   : > { %v3462_v32 = vpop.f32.mrb[40].mxu0 }
 0xeb7   : > { %v10638_v9 = vadd.f32 %v3462_v32, %v3365_v17  ;;  %v3464_v55 = vpop.f32.mrb[41].mxu0 }
 0xeb8   : > { %v10646_v2 = vadd.f32 %v3464_v55, %v3369_v57 }
 0xeb9   : > { %7295 = vmatprep.mubr.msk.f32.mxu1 %vm1008_vm9, %v10638_v9 }
 0xeba   : > { %v3468_v1 = vpop.f32.mrb[42].mxu0 }
 0xebb   : > { %v10644_v12 = vadd.f32 %v3468_v1, %v3365_v17  ;;  %v3470_v19 = vpop.f32.mrb[43].mxu0 }
 0xebc   : > { %v10648_v6 = vadd.f32 %v3470_v19, %v3369_v57 }
 0xebd   : > { %v10652_v41 = vpack.i.bf16 %v10644_v12, %v10638_v9 }
 0xebe   : > { %v10658_v27 = vpack.c.bf16 %v10648_v6, %v10646_v2  ;;  %v3474_v26 = vpop.f32.mrb[44].mxu0 }
 0xebf   : > { %8312 = vrot.lane.b32.xlu1 %v10652_v41, %s9121_s18  ;;  %v3476_v24 = vpop.f32.mrb[45].mxu0  ;;  %v10662_v49 = vadd.f32 %v3474_v26, %v3365_v17 }
 0xec0   : > { %v10666_v51 = vadd.f32 %v3476_v24, %v3369_v57 }
 0xec2   : > { %v3480_v59 = vpop.f32.mrb[46].mxu0 }
 0xec3   : > { %v10664_v44 = vadd.f32 %v3480_v59, %v3365_v17  ;;  %v3482_v45 = vpop.f32.mrb[47].mxu0 }
 0xec4   : > { %v10668_v50 = vadd.f32 %v3482_v45, %v3369_v57 }
 0xec5   : > { %v10672_v34 = vpack.i.bf16 %v10664_v44, %v10662_v49 }
 0xec6   : > { %v10678_v8 = vpack.c.bf16 %v10668_v50, %v10666_v51  ;;  %v3486_v62 = vpop.f32.mrb[48].mxu0 }
 0xec7   : > { %8317 = vrot.lane.b32.xlu0 %v10672_v34, %s9121_s18  ;;  %v3488_v63 = vpop.f32.mrb[49].mxu0  ;;  %v10682_v25 = vadd.f32 %v3486_v62, %v3365_v17 }
 0xec8   : > { %v10688_v60 = vadd.f32 %v3488_v63, %v3369_v57 }
 0xeca   : > { %v3492_v48 = vpop.f32.mrb[50].mxu0 }
 0xecb   : > { %v10684_v53 = vadd.f32 %v3492_v48, %v3365_v17  ;;  %8332 = vrot.lane.b32.xlu0 %v10652_v41, %s9124_s30  ;;  %v3494_v18 = vpop.f32.mrb[51].mxu0 }
 0xecc   : > { %v10690_v56 = vadd.f32 %v3494_v18, %v3369_v57 }
 0xecd   : > { %v10694_v23 = vpack.i.bf16 %v10684_v53, %v10682_v25 }
 0xece   : > { %v10700_v20 = vpack.c.bf16 %v10690_v56, %v10688_v60 }
 0xecf   : > { %3760 = vrot.lane.b32.xlu0 %v10644_v12, %s9123_s19  ;;  %8322 = vrot.lane.b32.xlu1 %v10694_v23, %s9121_s18 }
 0xed3   : > { %8342 = vrot.lane.b32.xlu0 %v10652_v41, %s9122_s26 }
 0xed7   : > { %8352 = vrot.lane.b32.xlu0 %v10672_v34, %s9122_s26 }
 0xedb   : > { %3764 = vrot.lane.b32.xlu0 %v10664_v44, %s9123_s19 }
 0xedf   : > { %8357 = vrot.lane.b32.xlu0 %v10694_v23, %s9122_s26 }
 0xee3   : > { %3768 = vrot.lane.b32.xlu0 %v10684_v53, %s9123_s19 }
 0xee9   : > { %v3498_v38 = vpop.f32.mrb[52].mxu0 }
 0xeea   : > { %v3500_v30 = vpop.f32.mrb[53].mxu0  ;;  %v10716_v29 = vadd.f32 %v3498_v38, %v3365_v17 }
 0xeeb   : > { %v10720_v42 = vadd.f32 %v3500_v30, %v3369_v57 }
 0xeed   : > { %v3504_v36 = vpop.f32.mrb[54].mxu0 }
 0xeee   : > { %v10718_v3 = vadd.f32 %v3504_v36, %v3365_v17  ;;  %v3506_v14 = vpop.f32.mrb[55].mxu0 }
 0xeef   : > { %v10722_v47 = vadd.f32 %v3506_v14, %v3369_v57 }
 0xef0   : > { %3772 = vrot.lane.b32.xlu0 %v10718_v3, %s9123_s19  ;;  %v10728_v37 = vpack.i.bf16 %v10718_v3, %v10716_v29 }
 0xef1   : > { %v10734_v39 = vpack.c.bf16 %v10722_v47, %v10720_v42 }
 0xef2   : > { %8327 = vrot.lane.b32.xlu1 %v10728_v37, %s9121_s18 }
 0xef4   : > { %8372 = vrot.lane.b32.xlu0 %v10728_v37, %s9122_s26 }
 0xef6   : > { %3758 = vrot.lane.b32.xlu1 %v10638_v9, %s9123_s19 }
 0xef8   : > { %4323 = vrot.lane.b32.xlu0 %v10644_v12, %s9125_s17 }
 0xefa   : > { %8337 = vrot.lane.b32.xlu1 %v10672_v34, %s9124_s30 }
 0xefc   : > { %8382 = vrot.lane.b32.xlu0 %v10694_v23, %s9128_s29 }
 0xefe   : > { %8347 = vrot.lane.b32.xlu1 %v10694_v23, %s9124_s30 }
 0xf00   : > { %4327 = vrot.lane.b32.xlu0 %v10664_v44, %s9125_s17 }
 0xf02   : > { %3762 = vrot.lane.b32.xlu1 %v10662_v49, %s9123_s19 }
 0xf04   : > { %4329 = vrot.lane.b32.xlu0 %v10682_v25, %s9125_s17 }
 0xf06   : > { %3766 = vrot.lane.b32.xlu1 %v10682_v25, %s9123_s19 }
 0xf08   : > { %4333 = vrot.lane.b32.xlu0 %v10716_v29, %s9125_s17 }
 0xf0a   : > { %8362 = vrot.lane.b32.xlu1 %v10728_v37, %s9124_s30  ;;  %s11902_s30 = sld [smem:[#allocation29_spill]] }
 0xf0c   : > { %4715 = vrot.lane.b32.xlu0 %v10638_v9, %s9129_s0 }
 0xf0e   : > { %3770 = vrot.lane.b32.xlu1 %v10716_v29, %s9123_s19  ;;  %s11901_s19 = sld [smem:[#allocation54_spill]] }
 0xf10   : > { %4719 = vrot.lane.b32.xlu0 %v10662_v49, %s9129_s0  ;;  %p11904_p11 = scmp.ne.s32.totalorder %s11902_s30, 0 }
 0xf12   : > { %8367 = vrot.lane.b32.xlu1 %v10652_v41, %s9128_s29 }
 0xf14   : > { %4723 = vrot.lane.b32.xlu0 %v10682_v25, %s9129_s0 }
 0xf16   : > { %4321 = vrot.lane.b32.xlu1 %v10638_v9, %s9125_s17 }
 0xf18   : > { %4727 = vrot.lane.b32.xlu0 %v10716_v29, %s9129_s0 }
 0xf1a   : > { %8377 = vrot.lane.b32.xlu1 %v10672_v34, %s9128_s29 }
 0xf1c   : > { %8397 = vrot.lane.b32.xlu0 %v10672_v34, %s9126_s21 }
 0xf1e   : > { %4325 = vrot.lane.b32.xlu1 %v10662_v49, %s9125_s17 }
 0xf20   : > { %8407 = vrot.lane.b32.xlu0 %v10652_v41, %s9127_s23 }
 0xf22   : > { %8387 = vrot.lane.b32.xlu1 %v10728_v37, %s9128_s29  ;;  %s11898_s29 = sld [smem:[#allocation53_spill]] }
 0xf24   : > { %8417 = vrot.lane.b32.xlu0 %v10694_v23, %s9127_s23 }
 0xf26   : > { %4331 = vrot.lane.b32.xlu1 %v10684_v53, %s9125_s17 }
 0xf2a   : > { %4335 = vrot.lane.b32.xlu1 %v10718_v3, %s9125_s17 }
 0xf2e   : > { %4717 = vrot.lane.b32.xlu1 %v10644_v12, %s9129_s0 }
 0xf31   : > { %v8313_v4 = vpop.permute.xlu1 %8312 }
 0xf32   : > { %v8315_v28 = vunpack.i.h.bf16 %v8313_v4  ;;  %v8314_v21 = vunpack.i.l.bf16 %v8313_v4  ;;  %4721 = vrot.lane.b32.xlu1 %v10664_v44, %s9129_s0 }
 0xf34   : > { %v7791_v35 = vpack.c.bf16 %v8315_v28, %v8314_v21 }
 0xf36   : > { %4725 = vrot.lane.b32.xlu1 %v10684_v53, %s9129_s0  ;;  %7793 = vmatprep.subr.msk.bf16.mxu0 %vm9768_vm10, %v7791_v35 }
 0xf37   : > { %7796 = vmatpush3.bf16.xpose.msk.msra.mxu0 %vm9768_vm10, %v7791_v35 }
 0xf39   : > { %v8318_v16 = vpop.permute.xlu0 %8317 }
 0xf3a   : > { %v8320_v46 = vunpack.i.h.bf16 %v8318_v16  ;;  %v8319_v33 = vunpack.i.l.bf16 %v8318_v16  ;;  %4729 = vrot.lane.b32.xlu1 %v10718_v3, %s9129_s0 }
 0xf3c   : > { %v7797_v17 = vpack.c.bf16 %v8320_v46, %v8319_v33 }
 0xf3d   : > { %v8333_v32 = vpop.permute.xlu0 %8332 }
 0xf3e   : > { %8392 = vrot.lane.b32.xlu1 %v10652_v41, %s9126_s21  ;;  %7799 = vmatprep.subr.msk.bf16.mxu0 %vm9768_vm10, %v7797_v17  ;;  %v8335_v4 = vunpack.i.h.bf16 %v8333_v32  ;;  %v8334_v28 = vunpack.i.l.bf16 %v8333_v32 }
 0xf3f   : > { %7802 = vmatpush3.bf16.xpose.msk.msra.mxu0 %vm9768_vm10, %v7797_v17 }
 0xf41   : > { %v3761_v9 = vpop.permute.xlu0 %3760  ;;  %v8323_v55 = vpop.permute.xlu1 %8322 }
 0xf42   : > { %v8325_v11 = vunpack.i.h.bf16 %v8323_v55  ;;  %v8324_v57 = vunpack.i.l.bf16 %v8323_v55  ;;  %8402 = vrot.lane.b32.xlu1 %v10694_v23, %s9126_s21  ;;  %v7847_v55 = vpack.c.bf16 %v8335_v4, %v8334_v28 }
 0xf44   : > { %v7803_v1 = vpack.c.bf16 %v8325_v11, %v8324_v57 }
 0xf45   : > { %v8343_v19 = vpop.permute.xlu0 %8342 }
 0xf46   : > { %v8345_v26 = vunpack.i.h.bf16 %v8343_v19  ;;  %v8344_v24 = vunpack.i.l.bf16 %v8343_v19  ;;  %8412 = vrot.lane.b32.xlu1 %v10672_v34, %s9127_s23  ;;  %7805 = vmatprep.subr.msk.bf16.mxu0 %vm9768_vm10, %v7803_v1 }
 0xf47   : > { %7808 = vmatpush3.bf16.xpose.msk.msra.mxu0 %vm9768_vm10, %v7803_v1 }
 0xf48   : > { %v7767_v41 = vpack.c.bf16 %v8345_v26, %v8344_v24 }
 0xf49   : > { %v8353_v59 = vpop.permute.xlu0 %8352 }
 0xf4a   : > { %v8355_v45 = vunpack.i.h.bf16 %v8353_v59  ;;  %v8354_v62 = vunpack.i.l.bf16 %v8353_v59  ;;  %7769 = vmatprep.subr.msk.bf16.mxu1 %vm9768_vm10, %v7767_v41  ;;  %8422 = vrot.lane.b32.xlu1 %v10728_v37, %s9126_s21 }
 0xf4b   : > { %7772 = vmatpush3.bf16.xpose.msk.msra.mxu1 %vm9768_vm10, %v7767_v41 }
 0xf4c   : > { %v7773_v34 = vpack.c.bf16 %v8355_v45, %v8354_v62 }
 0xf4d   : > { %v3765_v63 = vpop.permute.xlu0 %3764 }
 0xf4e   : > { %7775 = vmatprep.subr.msk.bf16.mxu1 %vm9768_vm10, %v7773_v34  ;;  %8427 = vrot.lane.b32.xlu1 %v10728_v37, %s9127_s23 }
 0xf51   : > { %v8358_v48 = vpop.permute.xlu0 %8357 }
 0xf52   : > { %v8360_v18 = vunpack.i.h.bf16 %v8358_v48  ;;  %v8359_v23 = vunpack.i.l.bf16 %v8358_v48 }
 0xf53   : > { %7778 = vmatpush3.bf16.xpose.msk.msra.mxu1 %vm9768_vm10, %v7773_v34 }
 0xf54   : > { %v7779_v38 = vpack.c.bf16 %v8360_v18, %v8359_v23 }
 0xf55   : > { %v3769_v30 = vpop.permute.xlu0 %3768 }
 0xf56   : > { %7781 = vmatprep.subr.msk.bf16.mxu1 %vm9768_vm10, %v7779_v38 }
 0xf5b   : > { %7784 = vmatpush3.bf16.xpose.msk.msra.mxu1 %vm9768_vm10, %v7779_v38 }
 0xf62   : > { %v3773_v36 = vpop.permute.xlu0 %3772 }
 0xf64   : > { %v8328_v14 = vpop.permute.xlu1 %8327 }
 0xf65   : > { %v8330_v21 = vunpack.i.h.bf16 %v8328_v14  ;;  %v8329_v37 = vunpack.i.l.bf16 %v8328_v14 }
 0xf66   : > { %v8373_v35 = vpop.permute.xlu0 %8372 }
 0xf67   : > { %v7809_v16 = vpack.c.bf16 %v8330_v21, %v8329_v37  ;;  %v8375_v46 = vunpack.i.h.bf16 %v8373_v35  ;;  %v8374_v33 = vunpack.i.l.bf16 %v8373_v35 }
 0xf68   : > { %v3759_v17 = vpop.permute.xlu1 %3758 }
 0xf69   : > { %v7785_v11 = vpack.c.bf16 %v8375_v46, %v8374_v33  ;;  %7811 = vmatprep.subr.msk.bf16.mxu0 %vm9768_vm10, %v7809_v16  ;;  %7323 = vmatprep.mubr.msk.f32.mxu0 %vm1008_vm9, %v3759_v17 }
 0xf6a   : > { %7814 = vmatpush3.bf16.xpose.msk.msra.mxu0 %vm9768_vm10, %v7809_v16 }
 0xf6b   : > { %7787 = vmatprep.subr.msk.bf16.mxu1 %vm9768_vm10, %v7785_v11  ;;  %7849 = vmatprep.subr.msk.bf16.mxu0 %vm9768_vm10, %v7847_v55 }
 0xf6c   : > { %7790 = vmatpush3.bf16.xpose.msk.msra.mxu1 %vm9768_vm10, %v7785_v11  ;;  %v8338_v32 = vpop.permute.xlu1 %8337 }
 0xf6d   : > { %v8340_v57 = vunpack.i.h.bf16 %v8338_v32  ;;  %v8339_v1 = vunpack.i.l.bf16 %v8338_v32 }
 0xf6f   : > { %v7853_v26 = vpack.c.bf16 %v8340_v57, %v8339_v1 }
 0xf70   : > { %v8348_v19 = vpop.permute.xlu1 %8347 }
 0xf71   : > { %7324 = vmatmul.mubr.msk.f32.vlgmr.msra.gmra.mrb[56].mxu0 %vm1008_vm9, %v3761_v9  ;;  %v8350_v41 = vunpack.i.h.bf16 %v8348_v19  ;;  %v8349_v59 = vunpack.i.l.bf16 %v8348_v19  ;;  %v4324_v9 = vpop.permute.xlu0 %4323 }
 0xf72   : > { %7852 = vmatpush3.bf16.xpose.msk.msra.mxu0 %vm9768_vm10, %v7847_v55 }
 0xf73   : > { %7296 = vmatmul.mubr.msk.f32.vlgmr.msra.gmra.mrb[40].mxu1 %vm1008_vm9, %v10644_v12  ;;  %7855 = vmatprep.subr.msk.bf16.mxu0 %vm9768_vm10, %v7853_v26  ;;  %v7859_v45 = vpack.c.bf16 %v8350_v41, %v8349_v59 }
 0xf74   : > { %7298 = vmatprep.mubr.msk.f32.mxu1 %vm1008_vm9, %v10662_v49  ;;  %v3763_v24 = vpop.permute.xlu1 %3762 }
 0xf75   : > { %7326 = vmatprep.mubr.msk.f32.mxu0 %vm1008_vm9, %v3763_v24 }
 0xf76   : > { %7327 = vmatmul.mubr.msk.f32.gmra.mrb[58].mxu0 %vm1008_vm9, %v3765_v63 }
 0xf77   : > { %7299 = vmatmul.mubr.msk.f32.gmra.mrb[42].mxu1 %vm1008_vm9, %v10664_v44  ;;  %v8383_v44 = vpop.permute.xlu0 %8382 }
 0xf78   : > { %7301 = vmatprep.mubr.msk.f32.mxu1 %vm1008_vm9, %v10682_v25  ;;  %v3767_v12 = vpop.permute.xlu1 %3766  ;;  %v8385_v35 = vunpack.i.h.bf16 %v8383_v44  ;;  %v8384_v16 = vunpack.i.l.bf16 %v8383_v44 }
 0xf79   : > { %7329 = vmatprep.mubr.msk.f32.mxu0 %vm1008_vm9, %v3767_v12 }
 0xf7a   : > { %7330 = vmatmul.mubr.msk.f32.gmra.mrb[60].mxu0 %vm1008_vm9, %v3769_v30  ;;  %v7899_v17 = vpack.c.bf16 %v8385_v35, %v8384_v16 }
 0xf7b   : > { %7858 = vmatpush3.bf16.xpose.msk.msra.mxu0 %vm9768_vm10, %v7853_v26  ;;  %7302 = vmatmul.mubr.msk.f32.gmra.mrb[44].mxu1 %vm1008_vm9, %v10684_v53  ;;  %v4328_v53 = vpop.permute.xlu0 %4327 }
 0xf7c   : > { %7861 = vmatprep.subr.msk.bf16.mxu0 %vm9768_vm10, %v7859_v45  ;;  %7304 = vmatprep.mubr.msk.f32.mxu1 %vm1008_vm9, %v10716_v29  ;;  %v8363_v49 = vpop.permute.xlu1 %8362 }
 0xf7d   : > { %v8365_v25 = vunpack.i.h.bf16 %v8363_v49  ;;  %v8364_v62 = vunpack.i.l.bf16 %v8363_v49 }
 0xf7f   : > { %7305 = vmatmul.mubr.msk.f32.gmra.mrb[46].mxu1 %vm1008_vm9, %v10718_v3  ;;  %v7865_v63 = vpack.c.bf16 %v8365_v25, %v8364_v62  ;;  %v4330_v3 = vpop.permute.xlu0 %4329 }
 0xf80   : > { %v3771_v34 = vpop.permute.xlu1 %3770 }
 0xf81   : > { %7332 = vmatprep.mubr.msk.f32.mxu0 %vm1008_vm9, %v3771_v34 }
 0xf82   : > { %7333 = vmatmul.mubr.msk.f32.gmra.mrb[62].mxu0 %vm1008_vm9, %v3773_v36 }
 0xf83   : > { %7864 = vmatpush3.bf16.xpose.msk.msra.mxu0 %vm9768_vm10, %v7859_v45  ;;  %v4334_v4 = vpop.permute.xlu0 %4333 }
 0xf84   : > { %7867 = vmatprep.subr.msk.bf16.mxu0 %vm9768_vm10, %v7865_v63  ;;  %v8368_v29 = vpop.permute.xlu1 %8367 }
 0xf85   : > { %v8370_v48 = vunpack.i.h.bf16 %v8368_v29  ;;  %v8369_v18 = vunpack.i.l.bf16 %v8368_v29 }
 0xf87   : > { %v7887_v38 = vpack.c.bf16 %v8370_v48, %v8369_v18  ;;  %v4716_v46 = vpop.permute.xlu0 %4715 }
 0xf88   : > { %v4322_v23 = vpop.permute.xlu1 %4321 }
 0xf89   : > { %7407 = vmatprep.mubr.msk.f32.mxu0 %vm1008_vm9, %v4322_v23 }
 0xf8b   : > { %7870 = vmatpush3.bf16.xpose.msk.msra.mxu0 %vm9768_vm10, %v7865_v63  ;;  %v4720_v55 = vpop.permute.xlu0 %4719 }
 0xf8c   : > { %7889 = vmatprep.subr.msk.bf16.mxu0 %vm9768_vm10, %v7887_v38  ;;  %v8378_v30 = vpop.permute.xlu1 %8377 }
 0xf8d   : > { %v8380_v36 = vunpack.i.h.bf16 %v8378_v30  ;;  %v8379_v14 = vunpack.i.l.bf16 %v8378_v30 }
 0xf8f   : > { %v7893_v21 = vpack.c.bf16 %v8380_v36, %v8379_v14  ;;  %v4724_v19 = vpop.permute.xlu0 %4723 }
 0xf90   : > { %v4326_v28 = vpop.permute.xlu1 %4325 }
 0xf92   : > { %7408 = vmatmul.mubr.msk.f32.vlgmr.msra.gmra.mrb[64].mxu0 %vm1008_vm9, %v4324_v9 }
 0xf93   : > { %7410 = vmatprep.mubr.msk.f32.mxu0 %vm1008_vm9, %v4326_v28  ;;  %7892 = vmatpush3.bf16.xpose.msk.msra.mxu0 %vm9768_vm10, %v7887_v38  ;;  %v4728_v41 = vpop.permute.xlu0 %4727 }
 0xf94   : > { %7895 = vmatprep.subr.msk.bf16.mxu0 %vm9768_vm10, %v7893_v21  ;;  %v8388_v37 = vpop.permute.xlu1 %8387 }
 0xf95   : > { %v8390_v32 = vunpack.i.h.bf16 %v8388_v37  ;;  %v8389_v57 = vunpack.i.l.bf16 %v8388_v37  ;;  %v10920_v37 = vld [vmem:[%s11851_s28 + $0x8] sm:$0xff] }
 0xf96   : > { %7411 = vmatmul.mubr.msk.f32.gmra.mrb[66].mxu0 %vm1008_vm9, %v4328_v53 }
 0xf97   : > { %7413 = vmatprep.mubr.msk.f32.mxu0 %vm1008_vm9, %v4330_v3  ;;  %v7905_v26 = vpack.c.bf16 %v8390_v32, %v8389_v57  ;;  %v8398_v12 = vpop.permute.xlu0 %8397 }
 0xf98   : > { %v4332_v33 = vpop.permute.xlu1 %4331  ;;  %v8400_v49 = vunpack.i.h.bf16 %v8398_v12  ;;  %v8399_v44 = vunpack.i.l.bf16 %v8398_v12 }
 0xf9a   : > { %7414 = vmatmul.mubr.msk.f32.gmra.mrb[68].mxu0 %vm1008_vm9, %v4332_v33  ;;  %v7819_v48 = vpack.c.bf16 %v8400_v49, %v8399_v44 }
 0xf9b   : > { %7416 = vmatprep.mubr.msk.f32.mxu0 %vm1008_vm9, %v4334_v4  ;;  %7898 = vmatpush3.bf16.xpose.msk.msra.mxu0 %vm9768_vm10, %v7893_v21  ;;  %v8408_v23 = vpop.permute.xlu0 %8407 }
 0xf9c   : > { %7901 = vmatprep.subr.msk.bf16.mxu0 %vm9768_vm10, %v7899_v17  ;;  %v4336_v11 = vpop.permute.xlu1 %4335  ;;  %v8410_v38 = vunpack.i.h.bf16 %v8408_v23  ;;  %v8409_v30 = vunpack.i.l.bf16 %v8408_v23 }
 0xf9e   : > { %7417 = vmatmul.mubr.msk.f32.gmra.mrb[70].mxu0 %vm1008_vm9, %v4336_v11  ;;  %v10914_v28 = vpack.c.bf16 %v8410_v38, %v8409_v30  ;;  %v10933_v11 = vld [vmem:[%s11851_s28] sm:$0xff] }
 0xf9f   : > { %7463 = vmatprep.mubr.msk.f32.mxu0 %vm1008_vm9, %v4716_v46 }
 0xfa0   : > { %v4718_v1 = vpop.permute.xlu1 %4717 }
 0xfa3   : > { %7904 = vmatpush3.bf16.xpose.msk.msra.mxu0 %vm9768_vm10, %v7899_v17 }
 0xfa4   : > { %7907 = vmatprep.subr.msk.bf16.mxu0 %vm9768_vm10, %v7905_v26  ;;  %v4722_v24 = vpop.permute.xlu1 %4721 }
 0xfa8   : > { %v4726_v59 = vpop.permute.xlu1 %4725 }
 0xfab   : > { %7910 = vmatpush3.bf16.xpose.msk.msra.mxu0 %vm9768_vm10, %v7905_v26 }
 0xfac   : > { %v4730_v9 = vpop.permute.xlu1 %4729 }
 0xfb0   : > { %v8393_v45 = vpop.permute.xlu1 %8392 }
 0xfb1   : > { %v8395_v25 = vunpack.i.h.bf16 %v8393_v45  ;;  %v8394_v62 = vunpack.i.l.bf16 %v8393_v45  ;;  %v10956_v45 = vld [vmem:[%s11851_s28 + $0x18] sm:$0xff] }
 0xfb2   : > { %7464 = vmatmul.mubr.msk.f32.vlgmr.msra.gmra.mrb[72].mxu0 %vm1008_vm9, %v4718_v1 }
 0xfb3   : > { %7466 = vmatprep.mubr.msk.f32.mxu0 %vm1008_vm9, %v4720_v55  ;;  %v7815_v34 = vpack.c.bf16 %v8395_v25, %v8394_v62 }
 0xfb4   : > { %v8403_v63 = vpop.permute.xlu1 %8402 }
 0xfb5   : > { %v8405_v53 = vunpack.i.h.bf16 %v8403_v63  ;;  %v8404_v29 = vunpack.i.l.bf16 %v8403_v63  ;;  %7816 = vmatprep.subr.bf16.mxu1 %v7815_v34 }
 0xfb6   : > { %7467 = vmatmul.mubr.msk.f32.gmra.mrb[74].mxu0 %vm1008_vm9, %v4722_v24  ;;  %7818 = vmatpush3.bf16.msra.mxu1 %v7815_v34 }
 0xfb7   : > { %7469 = vmatprep.mubr.msk.f32.mxu0 %vm1008_vm9, %v4724_v19  ;;  %7820 = vmatprep.subr.bf16.mxu1 %v7819_v48  ;;  %v7823_v18 = vpack.c.bf16 %v8405_v53, %v8404_v29  ;;  %v10968_v53 = vld [vmem:[%s11851_s28 + $0x20] sm:$0xff] }
 0xfb8   : > { %v10909_v13 = vpop.permute.xlu1 %8412 }
 0xfba   : > { %7470 = vmatmul.mubr.msk.f32.gmra.mrb[76].mxu0 %vm1008_vm9, %v4726_v59  ;;  %7822 = vmatpush3.bf16.msra.mxu1 %v7819_v48 }
 0xfbb   : > { %7472 = vmatprep.mubr.msk.f32.mxu0 %vm1008_vm9, %v4728_v41  ;;  %7824 = vmatprep.subr.bf16.mxu1 %v7823_v18 }
 0xfbc   : > { %v8423_v3 = vpop.permute.xlu1 %8422 }
 0xfbd   : > { %v8425_v36 = vunpack.i.h.bf16 %v8423_v3  ;;  %v8424_v14 = vunpack.i.l.bf16 %v8423_v3 }
 0xfbe   : > { %7473 = vmatmul.mubr.msk.f32.gmra.mrb[78].mxu0 %vm1008_vm9, %v4730_v9  ;;  %7826 = vmatpush3.bf16.msra.mxu1 %v7823_v18  ;;  %v10948_v9 = vld [vmem:[%s11851_s28 + $0x10] sm:$0xff] }
 0xfbf   : > { %v7827_v4 = vpack.c.bf16 %v8425_v36, %v8424_v14 }
 0xfc1   : > { %7828 = vmatprep.subr.bf16.mxu1 %v7827_v4 }
 0xfc2   : > { %7830 = vmatpush3.bf16.msra.mxu1 %v7827_v4 }
 0xfc3   : > { %7832 = vmatprep.subr.bf16.mxu1 %v10914_v28 }
0x1044   : > { %v7325_v21 = vpop.f32.mrb[56].mxu0 }
0x1045   : > { %v10923_v35 = vadd.f32 %v10920_v37, %v7325_v21  ;;  %v3888_v16 = vpop.f32.mrb[57].mxu0 }
0x1046   : > { %v7297_v46 = vpop.f32.mrb[40].mxu1  ;;  %v10939_v57 = vadd.f32 %v10933_v11, %v3888_v16 }
0x1047   : > { %v10926_v33 = vadd.f32 %v10920_v37, %v7297_v46  ;;  %v3631_v17 = vpop.f32.mrb[41].mxu1  ;;  %v3930_v55 = vsel %vm1146_vm11, %v10923_v35, -inf  ;;  %v10991_v46 = vld [vmem:[%s11851_s28 + $0x30] sm:$0xff] }
0x1048   : > { %v10936_v32 = vadd.f32 %v10933_v11, %v3631_v17  ;;  %3931 = vmax.xlane.f32.xlu1 %v3930_v55  ;;  %v3927_v25 = vsel %vm1146_vm11, %v10939_v57, -inf }
0x1049   : > { %v7328_v1 = vpop.f32.mrb[58].mxu0  ;;  %v3673_v19 = vsel %vm1146_vm11, %v10926_v33, -inf }
0x104a   : > { %3674 = vmax.xlane.f32.xlu0 %v3673_v19  ;;  %v7300_v26 = vpop.f32.mrb[42].mxu1  ;;  %v3898_v24 = vpop.f32.mrb[59].mxu0  ;;  %v3670_v41 = vsel %vm1146_vm11, %v10936_v32, -inf  ;;  %v10959_v49 = vadd.f32 %v10956_v45, %v7328_v1  ;;  %v11001_v1 = vld [vmem:[%s11851_s28 + $0x28] sm:$0xff] }
0x104b   : > { %v3641_v59 = vpop.f32.mrb[43].mxu1  ;;  %v10974_v18 = vadd.f32 %v10956_v45, %v7300_v26  ;;  %v10984_v14 = vadd.f32 %v10948_v9, %v3898_v24 }
0x104c   : > { %v10951_v12 = vadd.f32 %v10948_v9, %v3641_v59  ;;  %3671 = vmax.xlane.f32.xlu1 %v3670_v41  ;;  %v3936_v23 = vsel %vm1146_vm11, %v10959_v49, -inf }
0x104d   : > { %v7331_v44 = vpop.f32.mrb[60].mxu0  ;;  %v3679_v21 = vsel %vm1146_vm11, %v10974_v18, -inf  ;;  %v3933_v26 = vsel %vm1146_vm11, %v10984_v14, -inf }
0x104e   : > { %v7303_v62 = vpop.f32.mrb[44].mxu1  ;;  %v3908_v34 = vpop.f32.mrb[61].mxu0  ;;  %3928 = vmax.xlane.f32.xlu0 %v3927_v25  ;;  %v3676_v63 = vsel %vm1146_vm11, %v10951_v12, -inf  ;;  %v11004_v19 = vadd.f32 %v11001_v1, %v7331_v44 }
0x104f   : > { %v10971_v29 = vadd.f32 %v10968_v53, %v3908_v34  ;;  %v3651_v48 = vpop.f32.mrb[45].mxu1  ;;  %v11014_v59 = vadd.f32 %v11001_v1, %v7303_v62  ;;  %v11023_v34 = vld [vmem:[%s11851_s28 + $0x38] sm:$0xff] }
0x1050   : > { %3677 = vmax.xlane.f32.xlu1 %v3676_v63  ;;  %v10979_v38 = vadd.f32 %v10968_v53, %v3651_v48  ;;  %v3942_v25 = vsel %vm1146_vm11, %v11004_v19, -inf }
0x1051   : > { %v3939_v36 = vsel %vm1146_vm11, %v10971_v29, -inf  ;;  %v3685_v62 = vsel %vm1146_vm11, %v11014_v59, -inf }
0x1052   : > { %v7306_v3 = vpop.f32.mrb[46].mxu1  ;;  %3937 = vmax.xlane.f32.xlu0 %v3936_v23  ;;  %v3682_v55 = vsel %vm1146_vm11, %v10979_v38, -inf }
0x1053   : > { %v3661_v30 = vpop.f32.mrb[47].mxu1  ;;  %v11031_v48 = vadd.f32 %v11023_v34, %v7306_v3 }
0x1054   : > { %3940 = vmax.xlane.f32.xlu1 %v3939_v36  ;;  %v11009_v24 = vadd.f32 %v10991_v46, %v3661_v30 }
0x1055   : > { %v7334_v4 = vpop.f32.mrb[62].mxu0  ;;  %v3691_v3 = vsel %vm1146_vm11, %v11031_v48, -inf }
0x1056   : > { %v3918_v16 = vpop.f32.mrb[63].mxu0  ;;  %3680 = vmax.xlane.f32.xlu0 %v3679_v21  ;;  %v3688_v44 = vsel %vm1146_vm11, %v11009_v24, -inf  ;;  %v11026_v63 = vadd.f32 %v11023_v34, %v7334_v4 }
0x1057   : > { %v10994_v17 = vadd.f32 %v10991_v46, %v3918_v16 }
0x1058   : > { %3683 = vmax.xlane.f32.xlu1 %v3682_v55  ;;  %v3948_v30 = vsel %vm1146_vm11, %v11026_v63, -inf }
0x1059   : > { %v3945_v41 = vsel %vm1146_vm11, %v10994_v17, -inf }
0x105a   : > { %3934 = vmax.xlane.f32.xlu0 %v3933_v26 }
0x105c   : > { %3946 = vmax.xlane.f32.xlu1 %v3945_v41 }
0x105e   : > { %3943 = vmax.xlane.f32.xlu0 %v3942_v25 }
0x1060   : > { %3689 = vmax.xlane.f32.xlu1 %v3688_v44 }
0x1062   : > { %3686 = vmax.xlane.f32.xlu0 %v3685_v62 }
0x1065   : > { %v7409_v23 = vpop.f32.mrb[64].mxu0 }
0x1066   : > { %v4451_v36 = vpop.f32.mrb[65].mxu0  ;;  %3949 = vmax.xlane.f32.xlu0 %v3948_v30  ;;  %v11039_v16 = vadd.f32 %v10920_v37, %v7409_v23 }
0x1067   : > { %v11036_v21 = vadd.f32 %v10933_v11, %v4451_v36 }
0x1068   : > { %v4493_v23 = vsel %vm1146_vm11, %v11039_v16, -inf }
0x1069   : > { %v7412_v4 = vpop.f32.mrb[66].mxu0  ;;  %v4490_v55 = vsel %vm1146_vm11, %v11036_v21, -inf }
0x106a   : > { %v4461_v26 = vpop.f32.mrb[67].mxu0  ;;  %4491 = vmax.xlane.f32.xlu1 %v4490_v55  ;;  %3692 = vmax.xlane.f32.xlu0 %v3691_v3  ;;  %v11049_v25 = vadd.f32 %v10956_v45, %v7412_v4 }
0x106b   : > { %v11046_v41 = vadd.f32 %v10948_v9, %v4461_v26 }
0x106c   : > { %v4499_v26 = vsel %vm1146_vm11, %v11049_v25, -inf }
0x106d   : > { %v7415_v44 = vpop.f32.mrb[68].mxu0  ;;  %v4496_v62 = vsel %vm1146_vm11, %v11046_v41, -inf }
0x106e   : > { %v4471_v30 = vpop.f32.mrb[69].mxu0  ;;  %4497 = vmax.xlane.f32.xlu1 %v4496_v62  ;;  %4494 = vmax.xlane.f32.xlu0 %v4493_v23  ;;  %v11059_v55 = vadd.f32 %v11001_v1, %v7415_v44 }
0x106f   : > { %v11056_v36 = vadd.f32 %v10968_v53, %v4471_v30 }
0x1070   : > { %v4505_v23 = vsel %vm1146_vm11, %v11059_v55, -inf }
0x1071   : > { %v7418_v3 = vpop.f32.mrb[70].mxu0  ;;  %v4502_v4 = vsel %vm1146_vm11, %v11056_v36, -inf }
0x1072   : > { %v4481_v54 = vpop.f32.mrb[71].mxu0  ;;  %4503 = vmax.xlane.f32.xlu1 %v4502_v4  ;;  %4500 = vmax.xlane.f32.xlu0 %v4499_v26  ;;  %v11069_v62 = vadd.f32 %v11023_v34, %v7418_v3 }
0x1073   : > { %v11066_v31 = vadd.f32 %v10991_v46, %v4481_v54 }
0x1074   : > { %v4511_v30 = vsel %vm1146_vm11, %v11069_v62, -inf }
0x1075   : > { %v4508_v44 = vsel %vm1146_vm11, %v11066_v31, -inf }
0x1076   : > { %4509 = vmax.xlane.f32.xlu1 %v4508_v44  ;;  %4506 = vmax.xlane.f32.xlu0 %v4505_v23 }
0x107a   : > { %4512 = vmax.xlane.f32.xlu0 %v4511_v30 }
0x1085   : > { %v7465_v4 = vpop.f32.mrb[72].mxu0 }
0x1086   : > { %v11078_v26 = vadd.f32 %v10920_v37, %v7465_v4  ;;  %v4845_v54 = vpop.f32.mrb[73].mxu0 }
0x1087   : > { %v11081_v3 = vadd.f32 %v10933_v11, %v4845_v54 }
0x1088   : > { %v4887_v10 = vsel %vm1146_vm11, %v11078_v26, -inf }
0x1089   : > { %v7468_v5 = vpop.f32.mrb[74].mxu0  ;;  %4888 = vmax.xlane.f32.xlu0 %v4887_v10  ;;  %v4884_v44 = vsel %vm1146_vm11, %v11081_v3, -inf }
0x108a   : > { %v11088_v23 = vadd.f32 %v10956_v45, %v7468_v5  ;;  %v4855_v30 = vpop.f32.mrb[75].mxu0  ;;  %4885 = vmax.xlane.f32.xlu1 %v4884_v44 }
0x108b   : > { %v11091_v37 = vadd.f32 %v10948_v9, %v4855_v30 }
0x108c   : > { %v4893_v11 = vsel %vm1146_vm11, %v11088_v23, -inf }
0x108d   : > { %v7471_v4 = vpop.f32.mrb[76].mxu0  ;;  %4894 = vmax.xlane.f32.xlu0 %v4893_v11  ;;  %v4890_v54 = vsel %vm1146_vm11, %v11091_v37, -inf }
0x108e   : > { %v11098_v10 = vadd.f32 %v11001_v1, %v7471_v4  ;;  %v4865_v52 = vpop.f32.mrb[77].mxu0  ;;  %4891 = vmax.xlane.f32.xlu1 %v4890_v54  ;;  %v11117_v4 = vpop.permute.xlu1 %8427 }
0x108f   : > { %v11101_v5 = vadd.f32 %v10968_v53, %v4865_v52  ;;  %v11119_v54 = vpop.permute.xlu0 %8417 }
0x1090   : > { %v4899_v9 = vsel %vm1146_vm11, %v11098_v10, -inf }
0x1091   : > { %v7474_v45 = vpop.f32.mrb[78].mxu0  ;;  %4900 = vmax.xlane.f32.xlu0 %v4899_v9  ;;  %v4896_v44 = vsel %vm1146_vm11, %v11101_v5, -inf }
0x1092   : > { %v11108_v30 = vadd.f32 %v11023_v34, %v7474_v45  ;;  %v4875_v11 = vpop.f32.mrb[79].mxu0  ;;  %4897 = vmax.xlane.f32.xlu1 %v4896_v44 }
0x1093   : > { %v11111_v1 = vadd.f32 %v10991_v46, %v4875_v11 }
0x1094   : > { %v4905_v52 = vsel %vm1146_vm11, %v11108_v30, -inf }
0x1095   : > { %4906 = vmax.xlane.f32.xlu0 %v4905_v52  ;;  %v4902_v53 = vsel %vm1146_vm11, %v11111_v1, -inf }
0x1096   : > { %4903 = vmax.xlane.f32.xlu1 %v4902_v53 }
0x10d5   : > { %v3932_v9 = vpop.xlane.xlu1 %3931 }
0x10d6   : > { %v3952_v34 = vsub.f32 %v10923_v35, %v3932_v9 }
0x10d7   : > { %v3675_v45 = vpop.xlane.xlu0 %3674 }
0x10d8   : > { %v3961_v44 = vmul.f32 1.442695, %v3952_v34  ;;  %v3695_v46 = vsub.f32 %v10926_v33, %v3675_v45 }
0x10d9   : > { %v3672_v11 = vpop.xlane.xlu1 %3671 }
0x10da   : > { %8626 = vpow2.f32 %v3961_v44  ;;  %v3704_v0 = vmul.f32 1.442695, %v3695_v46  ;;  %v3694_v52 = vsub.f32 %v10936_v32, %v3672_v11 }
0x10db   : > { %v3929_v40 = vpop.xlane.xlu0 %3928 }
0x10dc   : > { %8628 = vpow2.f32 %v3704_v0  ;;  %v3951_v53 = vsub.f32 %v10939_v57, %v3929_v40  ;;  %v3702_v43 = vmul.f32 1.442695, %v3694_v52 }
0x10dd   : > { %v3678_v58 = vpop.xlane.xlu1 %3677 }
0x10de   : > { %v3959_v22 = vmul.f32 1.442695, %v3951_v53  ;;  %v3696_v33 = vsub.f32 %v10951_v12, %v3678_v58 }
0x10df   : > { %v3938_v7 = vpop.xlane.xlu0 %3937 }
0x10e0   : > { %8630 = vpow2.f32 %v3959_v22  ;;  %v3954_v35 = vsub.f32 %v10959_v49, %v3938_v7  ;;  %v3706_v57 = vmul.f32 1.442695, %v3696_v33 }
0x10e1   : > { %v3941_v9 = vpop.xlane.xlu1 %3940  ;;  %8632 = vpow2.f32 %v3702_v43 }
0x10e2   : > { %v3965_v34 = vmul.f32 1.442695, %v3954_v35 }
0x10e3   : > { %v3681_v45 = vpop.xlane.xlu0 %3680 }
0x10e4   : > { %v11127_v44 = vpop.eup %8626  ;;  %8634 = vpow2.f32 %v3965_v34  ;;  %v3697_v0 = vsub.f32 %v10974_v18, %v3681_v45  ;;  %v3955_v34 = vsub.f32 %v10971_v29, %v3941_v9 }
0x10e5   : > { %v3978_v40 = vsel %vm1146_vm11, %v11127_v44, 0.0  ;;  %v3684_v7 = vpop.xlane.xlu1 %3683 }
0x10e6   : > { %v11132_v32 = vpop.eup %8628  ;;  %v3708_v22 = vmul.f32 1.442695, %v3697_v0  ;;  %3979 = vadd.xlane.f32.xlu0 %v3978_v40  ;;  %v3698_v18 = vsub.f32 %v10979_v38, %v3684_v7  ;;  %v3967_v7 = vmul.f32 1.442695, %v3955_v34 }
0x10e7   : > { %v3935_v49 = vpop.xlane.xlu0 %3934  ;;  %v3721_v58 = vsel %vm1146_vm11, %v11132_v32, 0.0 }
0x10e8   : > { %8636 = vpow2.f32 %v3708_v22  ;;  %v3953_v43 = vsub.f32 %v10984_v14, %v3935_v49  ;;  %v3710_v45 = vmul.f32 1.442695, %v3698_v18 }
0x10e9   : > { %8638 = vpow2.f32 %v3706_v57  ;;  %v3947_v14 = vpop.xlane.xlu1 %3946 }
0x10ea   : > { %v11137_v12 = vpop.eup %8630  ;;  %v3963_v46 = vmul.f32 1.442695, %v3953_v43  ;;  %3722 = vadd.xlane.f32.xlu0 %v3721_v58  ;;  %v3957_v29 = vsub.f32 %v10994_v17, %v3947_v14 }
0x10eb   : > { %v3944_v11 = vpop.xlane.xlu0 %3943  ;;  %v3975_v52 = vsel %vm1146_vm11, %v11137_v12, 0.0  ;;  %v11142_v53 = vpop.eup %8632 }
0x10ec   : > { %8640 = vpow2.f32 %v3963_v46  ;;  %v3956_v35 = vsub.f32 %v11004_v19, %v3944_v11  ;;  %3976 = vadd.xlane.f32.xlu1 %v3975_v52  ;;  %v3718_v40 = vsel %vm1146_vm11, %v11142_v53, 0.0  ;;  %v3971_v11 = vmul.f32 1.442695, %v3957_v29 }
0x10ed   : > { %v3690_v49 = vpop.xlane.xlu1 %3689 }
0x10ee   : > { %v11145_v33 = vpop.eup %8634  ;;  %v3969_v0 = vmul.f32 1.442695, %v3956_v35  ;;  %v3700_v52 = vsub.f32 %v11009_v24, %v3690_v49 }
0x10ef   : > { %v3687_v38 = vpop.xlane.xlu0 %3686  ;;  %v3984_v57 = vsel %vm1146_vm11, %v11145_v33, 0.0 }
0x10f0   : > { %8642 = vpow2.f32 %v3969_v0  ;;  %v3699_v22 = vsub.f32 %v11014_v59, %v3687_v38  ;;  %3719 = vadd.xlane.f32.xlu1 %v3718_v40  ;;  %3985 = vadd.xlane.f32.xlu0 %v3984_v57  ;;  %v3714_v38 = vmul.f32 1.442695, %v3700_v52 }
0x10f1   : > { %8644 = vpow2.f32 %v3710_v45 }
0x10f2   : > { %v11153_v19 = vpop.eup %8636  ;;  %v3712_v9 = vmul.f32 1.442695, %v3699_v22 }
0x10f3   : > { %v3950_v43 = vpop.xlane.xlu0 %3949  ;;  %v3727_v58 = vsel %vm1146_vm11, %v11153_v19, 0.0  ;;  %v11158_v18 = vpop.eup %8638 }
0x10f4   : > { %8646 = vpow2.f32 %v3712_v9  ;;  %v3958_v46 = vsub.f32 %v11026_v63, %v3950_v43  ;;  %3728 = vadd.xlane.f32.xlu0 %v3727_v58  ;;  %v3724_v34 = vsel %vm1146_vm11, %v11158_v18, 0.0 }
0x10f5   : > { %8648 = vpow2.f32 %v3967_v7 }
0x10f6   : > { %v11161_v59 = vpop.eup %8640  ;;  %v3973_v35 = vmul.f32 1.442695, %v3958_v46 }
0x10f7   : > { %v4492_v17 = vpop.xlane.xlu1 %4491  ;;  %v3693_v14 = vpop.xlane.xlu0 %3692  ;;  %v3981_v45 = vsel %vm1146_vm11, %v11161_v59, 0.0 }
0x10f8   : > { %8650 = vpow2.f32 %v3973_v35  ;;  %v3701_v0 = vsub.f32 %v11031_v48, %v3693_v14  ;;  %3725 = vadd.xlane.f32.xlu0 %v3724_v34  ;;  %3982 = vadd.xlane.f32.xlu1 %v3981_v45  ;;  %v4514_v24 = vsub.f32 %v11036_v21, %v4492_v17 }
0x10f9   : > { %8652 = vpow2.f32 %v3971_v11 }
0x10fa   : > { %v11169_v63 = vpop.eup %8642  ;;  %v3716_v40 = vmul.f32 1.442695, %v3701_v0  ;;  %v4522_v49 = vmul.f32 1.442695, %v4514_v24 }
0x10fb   : > { %v4498_v57 = vpop.xlane.xlu1 %4497  ;;  %v4495_v22 = vpop.xlane.xlu0 %4494  ;;  %v3990_v7 = vsel %vm1146_vm11, %v11169_v63, 0.0 }
0x10fc   : > { %v11174_v29 = vpop.eup %8644  ;;  %v4515_v9 = vsub.f32 %v11039_v16, %v4495_v22  ;;  %3991 = vadd.xlane.f32.xlu0 %v3990_v7  ;;  %8654 = vpow2.f32 %v3716_v40  ;;  %v4516_v43 = vsub.f32 %v11046_v41, %v4498_v57 }
0x10fd   : > { %8656 = vpow2.f32 %v3714_v38  ;;  %v3730_v46 = vsel %vm1146_vm11, %v11174_v29, 0.0 }
0x10fe   : > { %v11177_v48 = vpop.eup %8646  ;;  %v4524_v58 = vmul.f32 1.442695, %v4515_v9  ;;  %v4526_v17 = vmul.f32 1.442695, %v4516_v43 }
0x10ff   : > { %v4501_v21 = vpop.xlane.xlu0 %4500  ;;  %v3733_v11 = vsel %vm1146_vm11, %v11177_v48, 0.0  ;;  %v11184_v52 = vpop.eup %8648 }
0x1100   : > { %v4517_v16 = vsub.f32 %v11049_v25, %v4501_v21  ;;  %3731 = vadd.xlane.f32.xlu0 %v3730_v46  ;;  %3734 = vadd.xlane.f32.xlu1 %v3733_v11  ;;  %8658 = vpow2.f32 %v4524_v58  ;;  %v4504_v14 = vpop.xlane.xlu1 %4503  ;;  %v3987_v45 = vsel %vm1146_vm11, %v11184_v52, 0.0 }
0x1101   : > { %8660 = vpow2.f32 %v4522_v49  ;;  %v4518_v24 = vsub.f32 %v11056_v36, %v4504_v14 }
0x1102   : > { %v11187_v35 = vpop.eup %8650  ;;  %v4528_v41 = vmul.f32 1.442695, %v4517_v16 }
0x1103   : > { %v4507_v34 = vpop.xlane.xlu0 %4506  ;;  %v3996_v0 = vsel %vm1146_vm11, %v11187_v35, 0.0  ;;  %v11193_v38 = vpop.eup %8652 }
0x1104   : > { %v4519_v25 = vsub.f32 %v11059_v55, %v4507_v34  ;;  %3988 = vadd.xlane.f32.xlu1 %v3987_v45  ;;  %3997 = vadd.xlane.f32.xlu0 %v3996_v0  ;;  %8662 = vpow2.f32 %v4528_v41  ;;  %v3993_v7 = vsel %vm1146_vm11, %v11193_v38, 0.0  ;;  %v4530_v55 = vmul.f32 1.442695, %v4518_v24  ;;  %v4510_v36 = vpop.xlane.xlu1 %4509 }
0x1105   : > { %8664 = vpow2.f32 %v4526_v17  ;;  %v4520_v16 = vsub.f32 %v11066_v31, %v4510_v36 }
0x1106   : > { %v4532_v40 = vmul.f32 1.442695, %v4519_v25  ;;  %v11197_v57 = vpop.eup %8654 }
0x1107   : > { %v4513_v22 = vpop.xlane.xlu0 %4512  ;;  %v11201_v9 = vpop.eup %8656  ;;  %v3739_v49 = vsel %vm1146_vm11, %v11197_v57, 0.0  ;;  %v4534_v45 = vmul.f32 1.442695, %v4520_v16 }
0x1108   : > { %3994 = vadd.xlane.f32.xlu0 %v3993_v7  ;;  %3740 = vadd.xlane.f32.xlu1 %v3739_v49  ;;  %8666 = vpow2.f32 %v4532_v40  ;;  %v4521_v43 = vsub.f32 %v11069_v62, %v4513_v22  ;;  %v3736_v21 = vsel %vm1146_vm11, %v11201_v9, 0.0 }
0x1109   : > { %8668 = vpow2.f32 %v4530_v55 }
0x110a   : > { %v11206_v58 = vpop.eup %8658  ;;  %v4536_v17 = vmul.f32 1.442695, %v4521_v43 }
0x110b   : > { %v11210_v46 = vpop.eup %8660  ;;  %v4541_v11 = vsel %vm1146_vm11, %v11206_v58, 0.0 }
0x110c   : > { %3737 = vadd.xlane.f32.xlu0 %v3736_v21  ;;  %4542 = vadd.xlane.f32.xlu1 %v4541_v11  ;;  %v4538_v62 = vsel %vm1146_vm11, %v11210_v46, 0.0  ;;  %8670 = vpow2.f32 %v4536_v17 }
0x110d   : > { %8672 = vpow2.f32 %v4534_v45 }
0x110e   : > { %v11215_v41 = vpop.eup %8662 }
0x110f   : > { %v11219_v14 = vpop.eup %8664  ;;  %v4547_v34 = vsel %vm1146_vm11, %v11215_v41, 0.0 }
0x1110   : > { %4539 = vadd.xlane.f32.xlu0 %v4538_v62  ;;  %4548 = vadd.xlane.f32.xlu1 %v4547_v34  ;;  %v4544_v0 = vsel %vm1146_vm11, %v11219_v14, 0.0 }
0x1112   : > { %v11225_v25 = vpop.eup %8666 }
0x1113   : > { %v4553_v22 = vsel %vm1146_vm11, %v11225_v25, 0.0  ;;  %v11230_v7 = vpop.eup %8668 }
0x1114   : > { %4545 = vadd.xlane.f32.xlu0 %v4544_v0  ;;  %v4550_v16 = vsel %vm1146_vm11, %v11230_v7, 0.0 }
0x1116   : > { %v4889_v31 = vpop.xlane.xlu0 %4888 }
0x1117   : > { %v4909_v24 = vsub.f32 %v11078_v26, %v4889_v31  ;;  %v4886_v40 = vpop.xlane.xlu1 %4885  ;;  %v11236_v26 = vpop.eup %8670 }
0x1118   : > { %v4908_v49 = vsub.f32 %v11081_v3, %v4886_v40  ;;  %4554 = vadd.xlane.f32.xlu0 %v4553_v22  ;;  %v11242_v31 = vpop.eup %8672 }
0x1119   : > { %v4918_v55 = vmul.f32 1.442695, %v4909_v24 }
0x111a   : > { %v4916_v43 = vmul.f32 1.442695, %v4908_v49  ;;  %v4895_v36 = vpop.xlane.xlu0 %4894 }
0x111b   : > { %8674 = vpow2.f32 %v4918_v55  ;;  %v4911_v21 = vsub.f32 %v11088_v23, %v4895_v36  ;;  %v4892_v11 = vpop.xlane.xlu1 %4891  ;;  %v4559_v23 = vsel %vm1146_vm11, %v11236_v26, 0.0 }
0x111c   : > { %8676 = vpow2.f32 %v4916_v43  ;;  %v4910_v17 = vsub.f32 %v11091_v37, %v4892_v11  ;;  %4551 = vadd.xlane.f32.xlu0 %v4550_v16  ;;  %v4556_v37 = vsel %vm1146_vm11, %v11242_v31, 0.0 }
0x111d   : > { %v4922_v62 = vmul.f32 1.442695, %v4911_v21 }
0x111e   : > { %v4920_v34 = vmul.f32 1.442695, %v4910_v17  ;;  %v4901_v3 = vpop.xlane.xlu0 %4900 }
0x111f   : > { %8678 = vpow2.f32 %v4922_v62  ;;  %v4913_v45 = vsub.f32 %v11098_v10, %v4901_v3  ;;  %v4898_v0 = vpop.xlane.xlu1 %4897  ;;  %v11888_v3 = vpack.i.bf16 %v10668_v50, %v10666_v51 }
0x1120   : > { %v4912_v24 = vsub.f32 %v11101_v5, %v4898_v0  ;;  %4560 = vadd.xlane.f32.xlu0 %v4559_v23  ;;  %8680 = vpow2.f32 %v4920_v34  ;;  %v11890_v0 = vpack.i.bf16 %v10648_v6, %v10646_v2 }
0x1121   : > { %v4926_v40 = vmul.f32 1.442695, %v4913_v45  ;;  %v11889_v45 = vpack.i.bf16 %v10690_v56, %v10688_v60 }
0x1122   : > { %v4924_v22 = vmul.f32 1.442695, %v4912_v24  ;;  %v4907_v24 = vpop.xlane.xlu0 %4906 }
0x1123   : > { %8682 = vpow2.f32 %v4926_v40  ;;  %v4904_v23 = vpop.xlane.xlu1 %4903 }
0x1124   : > { %4557 = vadd.xlane.f32.xlu0 %v4556_v37  ;;  %8684 = vpow2.f32 %v4924_v22  ;;  %v4914_v40 = vsub.f32 %v11111_v1, %v4904_v23  ;;  %v4915_v22 = vsub.f32 %v11108_v30, %v4907_v24  ;;  %v11891_v30 = vpack.i.bf16 %v10722_v47, %v10720_v42 }
0x1125   : > { %v11247_v49 = vpop.eup %8674  ;;  %v8420_v42 = vunpack.i.h.bf16 %v11119_v54  ;;  %v8419_v47 = vunpack.i.l.bf16 %v11119_v54 }
0x1126   : > { %v11249_v10 = vpop.eup %8676  ;;  %v4935_v55 = vsel %vm1146_vm11, %v11247_v49, 0.0  ;;  %v4928_v37 = vmul.f32 1.442695, %v4914_v40 }
0x1127   : > { %4936 = vadd.xlane.f32.xlu1 %v4935_v55  ;;  %v4932_v5 = vsel %vm1146_vm11, %v11249_v10, 0.0  ;;  %v4930_v55 = vmul.f32 1.442695, %v4915_v22 }
0x1128   : > { %4933 = vadd.xlane.f32.xlu0 %v4932_v5  ;;  %8686 = vpow2.f32 %v4928_v37  ;;  %v8430_v37 = vunpack.i.h.bf16 %v11117_v4 }
0x1129   : > { %v11255_v43 = vpop.eup %8678  ;;  %8688 = vpow2.f32 %v4930_v55  ;;  %v7839_v55 = vpack.c.bf16 %v8420_v42, %v8419_v47 }
0x112a   : > { %v4941_v36 = vsel %vm1146_vm11, %v11255_v43, 0.0  ;;  %v11259_v21 = vpop.eup %8680 }
0x112b   : > { %v4938_v17 = vsel %vm1146_vm11, %v11259_v21, 0.0 }
0x112c   : > { %4942 = vadd.xlane.f32.xlu0 %v4941_v36 }
0x112d   : > { %v11261_v11 = vpop.eup %8682 }
0x112e   : > { %v4947_v16 = vsel %vm1146_vm11, %v11261_v11, 0.0  ;;  %v11267_v62 = vpop.eup %8684 }
0x112f   : > { %4948 = vadd.xlane.f32.xlu1 %v4947_v16  ;;  %v4944_v34 = vsel %vm1146_vm11, %v11267_v62, 0.0 }
0x1130   : > { %4939 = vadd.xlane.f32.xlu0 %v4938_v17 }
0x1132   : > { %v11285_v51 = vpop.eup %8686 }
0x1133   : > { %v11287_v50 = vpop.eup %8688  ;;  %v4950_v60 = vsel %vm1146_vm11, %v11285_v51, 0.0 }
0x1134   : > { %4945 = vadd.xlane.f32.xlu0 %v4944_v34  ;;  %v4953_v2 = vsel %vm1146_vm11, %v11287_v50, 0.0 }
0x1140   : > { %8437 = vrot.lane.b32.xlu1 %v11888_v3, %s9122_s26  ;;  %v8415_v3 = vunpack.i.h.bf16 %v10909_v13 }
0x1144   : > { %8442 = vrot.lane.b32.xlu1 %v11889_v45, %s9122_s26  ;;  %v8414_v45 = vunpack.i.l.bf16 %v10909_v13 }
0x1146   : > { %v7835_v22 = vpack.c.bf16 %v8415_v3, %v8414_v45 }
0x114a   : > { %8432 = vrot.lane.b32.xlu0 %v11890_v0, %s9122_s26 }
0x1168   : > { %4951 = vadd.xlane.f32.xlu1 %v4950_v60 }
0x1169   : > { %4954 = vadd.xlane.f32.xlu0 %v4953_v2 }
0x1173   : > { %v3980_v6 = vpop.xlane.xlu0 %3979 }
0x1174   : > { %8690 = vrcp.f32 %v3980_v6 }
0x1177   : > { %v3723_v56 = vpop.xlane.xlu0 %3722 }
0x1179   : > { %8447 = vrot.lane.b32.xlu1 %v11891_v30, %s9122_s26  ;;  %v3977_v1 = vpop.xlane.xlu1 %3976 }
0x117a   : > { %8692 = vrcp.f32 %v3977_v1 }
0x117d   : > { %v3986_v5 = vpop.xlane.xlu0 %3985  ;;  %v3720_v36 = vpop.xlane.xlu1 %3719 }
0x117e   : > { %v8691_v17 = vpop.eup %8690  ;;  %8694 = vrcp.f32 %v3986_v5 }
0x117f   : > { %v4008_v40 = vmul.f32 %v8691_v17, %v11127_v44 }
0x1181   : > { %v3729_v16 = vpop.xlane.xlu0 %3728 }
0x1184   : > { %v8693_v34 = vpop.eup %8692 }
0x1185   : > { %v3983_v0 = vpop.xlane.xlu1 %3982  ;;  %v3726_v23 = vpop.xlane.xlu0 %3725  ;;  %v4007_v24 = vmul.f32 %v8693_v34, %v11137_v12  ;;  %v8429_v12 = vunpack.i.l.bf16 %v11117_v4 }
0x1186   : > { %8696 = vrcp.f32 %v3983_v0 }
0x1187   : > { %7351 = vmatprep.mubr.msk.f32.mxu1 %vm1146_vm11, %v4007_v24  ;;  %v7843_v30 = vpack.c.bf16 %v8430_v37, %v8429_v12 }
0x1188   : > { %7352 = vmatmul.mubr.msk.f32.vlgmr.msra.gmra.mrb[48].mxu1 %vm1146_vm11, %v4008_v40  ;;  %v8695_v2 = vpop.eup %8694 }
0x1189   : > { %7834 = vmatpush3.bf16.msra.mxu1 %v10914_v28  ;;  %v3992_v13 = vpop.xlane.xlu0 %3991  ;;  %v4010_v5 = vmul.f32 %v8695_v2, %v11145_v33 }
0x118a   : > { %7836 = vmatprep.subr.bf16.mxu1 %v7835_v22  ;;  %8698 = vrcp.f32 %v3992_v13 }
0x118d   : > { %7838 = vmatpush3.bf16.msra.mxu1 %v7835_v22  ;;  %v3735_v44 = vpop.xlane.xlu1 %3734  ;;  %v3732_v60 = vpop.xlane.xlu0 %3731 }
0x118e   : > { %7840 = vmatprep.subr.bf16.mxu1 %v7839_v55 }
0x1190   : > { %v8697_v6 = vpop.eup %8696 }
0x1191   : > { %7842 = vmatpush3.bf16.msra.mxu1 %v7839_v55  ;;  %v3989_v54 = vpop.xlane.xlu1 %3988  ;;  %v3998_v1 = vpop.xlane.xlu0 %3997  ;;  %v4009_v28 = vmul.f32 %v8697_v6, %v11161_v59 }
0x1192   : > { %8700 = vrcp.f32 %v3989_v54  ;;  %7844 = vmatprep.subr.bf16.mxu1 %v7843_v30 }
0x1193   : > { %7354 = vmatprep.mubr.msk.f32.mxu1 %vm1146_vm11, %v4009_v28  ;;  %8702 = vrcp.f32 %v3720_v36 }
0x1194   : > { %7355 = vmatmul.mubr.msk.f32.gmra.mrb[50].mxu1 %vm1146_vm11, %v4010_v5  ;;  %8704 = vrcp.f32 %v3998_v1  ;;  %v8699_v34 = vpop.eup %8698 }
0x1195   : > { %7846 = vmatpush3.bf16.msra.mxu1 %v7843_v30  ;;  %v3995_v4 = vpop.xlane.xlu0 %3994  ;;  %v3741_v36 = vpop.xlane.xlu1 %3740  ;;  %v4012_v0 = vmul.f32 %v8699_v34, %v11169_v63 }
0x1196   : > { %7872 = vmatprep.subr.bf16.mxu1 %v10658_v27  ;;  %8706 = vrcp.f32 %v3995_v4 }
0x1197   : > { %8708 = vrcp.f32 %v3723_v56 }
0x1198   : > { %8710 = vrcp.f32 %v3726_v23 }
0x1199   : > { %v3738_v17 = vpop.xlane.xlu0 %3737  ;;  %8712 = vrcp.f32 %v3729_v16  ;;  %v4543_v63 = vpop.xlane.xlu1 %4542 }
0x119a   : > { %8714 = vrcp.f32 %v3732_v60 }
0x119b   : > { %8716 = vrcp.f32 %v3735_v44 }
0x119c   : > { %v8701_v59 = vpop.eup %8700  ;;  %8718 = vrcp.f32 %v3738_v17 }
0x119d   : > { %v4540_v3 = vpop.xlane.xlu0 %4539  ;;  %v4011_v33 = vmul.f32 %v8701_v59, %v11184_v52  ;;  %v8703_v45 = vpop.eup %8702  ;;  %8720 = vrcp.f32 %v3741_v36 }
0x119e   : > { %v8705_v24 = vpop.eup %8704  ;;  %v3750_v52 = vmul.f32 %v8703_v45, %v11142_v53  ;;  %8722 = vrcp.f32 %v4540_v3  ;;  %v4549_v12 = vpop.xlane.xlu1 %4548 }
0x119f   : > { %7357 = vmatprep.mubr.msk.f32.mxu1 %vm1146_vm11, %v4011_v33  ;;  %v4014_v16 = vmul.f32 %v8705_v24, %v11187_v35  ;;  %8724 = vrcp.f32 %v4543_v63 }
0x11a0   : > { %v8707_v40 = vpop.eup %8706  ;;  %7358 = vmatmul.mubr.msk.f32.gmra.mrb[52].mxu1 %vm1146_vm11, %v4012_v0 }
0x11a1   : > { %v4546_v56 = vpop.xlane.xlu0 %4545  ;;  %v4013_v23 = vmul.f32 %v8707_v40, %v11193_v38  ;;  %v8709_v42 = vpop.eup %8708 }
0x11a2   : > { %v8711_v47 = vpop.eup %8710  ;;  %v3751_v13 = vmul.f32 %v8709_v42, %v11132_v32  ;;  %8726 = vrcp.f32 %v4546_v56 }
0x11a3   : > { %7360 = vmatprep.mubr.msk.f32.mxu1 %vm1146_vm11, %v4013_v23  ;;  %v8713_v38 = vpop.eup %8712  ;;  %v3752_v37 = vmul.f32 %v8711_v47, %v11158_v18  ;;  %8728 = vrcp.f32 %v4549_v12 }
0x11a4   : > { %7361 = vmatmul.mubr.msk.f32.gmra.mrb[54].mxu1 %vm1146_vm11, %v4014_v16  ;;  %v8715_v35 = vpop.eup %8714  ;;  %v3753_v55 = vmul.f32 %v8713_v38, %v11153_v19 }
0x11a5   : > { %7379 = vmatprep.mubr.msk.f32.mxu1 %vm1146_vm11, %v3750_v52  ;;  %v4555_v22 = vpop.xlane.xlu0 %4554  ;;  %v8717_v32 = vpop.eup %8716  ;;  %v3754_v44 = vmul.f32 %v8715_v35, %v11174_v29 }
0x11a6   : > { %v8719_v60 = vpop.eup %8718  ;;  %v3755_v18 = vmul.f32 %v8717_v32, %v11177_v48 }
0x11a7   : > { %v8721_v2 = vpop.eup %8720  ;;  %v3756_v19 = vmul.f32 %v8719_v60, %v11201_v9 }
0x11a8   : > { %7380 = vmatmul.mubr.msk.f32.vlgmr.msra.gmra.mrb[48].mxu1 %vm1146_vm11, %v3751_v13  ;;  %v8723_v6 = vpop.eup %8722  ;;  %v3757_v29 = vmul.f32 %v8721_v2, %v11197_v57 }
0x11a9   : > { %7874 = vmatpush3.bf16.msra.mxu1 %v10658_v27  ;;  %7382 = vmatprep.mubr.msk.f32.mxu1 %vm1146_vm11, %v3752_v37  ;;  %v4552_v53 = vpop.xlane.xlu0 %4551  ;;  %v8725_v30 = vpop.eup %8724  ;;  %v4570_v48 = vmul.f32 %v8723_v6, %v11210_v46 }
0x11aa   : > { %7876 = vmatprep.subr.bf16.mxu1 %v10678_v8  ;;  %8730 = vrcp.f32 %v4552_v53  ;;  %v4571_v9 = vmul.f32 %v8725_v30, %v11206_v58 }
0x11ab   : > { %8732 = vrcp.f32 %v4555_v22 }
0x11ac   : > { %7383 = vmatmul.mubr.msk.f32.gmra.mrb[50].mxu1 %vm1146_vm11, %v3753_v55  ;;  %v8727_v54 = vpop.eup %8726 }
0x11ad   : > { %7878 = vmatpush3.bf16.msra.mxu1 %v10678_v8  ;;  %7385 = vmatprep.mubr.msk.f32.mxu1 %vm1146_vm11, %v3754_v44  ;;  %v4561_v27 = vpop.xlane.xlu0 %4560  ;;  %v8729_v1 = vpop.eup %8728  ;;  %v4572_v28 = vmul.f32 %v8727_v54, %v11219_v14 }
0x11ae   : > { %7880 = vmatprep.subr.bf16.mxu1 %v10700_v20  ;;  %v4573_v4 = vmul.f32 %v8729_v1, %v11215_v41 }
0x11b0   : > { %7386 = vmatmul.mubr.msk.f32.gmra.mrb[52].mxu1 %vm1146_vm11, %v3755_v18 }
0x11b1   : > { %7882 = vmatpush3.bf16.msra.mxu1 %v10700_v20  ;;  %7388 = vmatprep.mubr.msk.f32.mxu1 %vm1146_vm11, %v3756_v19  ;;  %v4558_v8 = vpop.xlane.xlu0 %4557 }
0x11b2   : > { %7884 = vmatprep.subr.bf16.mxu1 %v10734_v39  ;;  %8734 = vrcp.f32 %v4558_v8 }
0x11b3   : > { %8736 = vrcp.f32 %v4561_v27 }
0x11b4   : > { %7389 = vmatmul.mubr.msk.f32.gmra.mrb[54].mxu1 %vm1146_vm11, %v3757_v29  ;;  %v8731_v5 = vpop.eup %8730  ;;  %v4937_v57 = vpop.xlane.xlu1 %4936  ;;  %v5145_v29 = vld [vmem:[#allocation2 + $0x38] sm:$0xff] }
0x11b5   : > { %7886 = vmatpush3.bf16.msra.mxu1 %v10734_v39  ;;  %7435 = vmatprep.mubr.msk.f32.mxu1 %vm1146_vm11, %v4570_v48  ;;  %v4934_v20 = vpop.xlane.xlu0 %4933  ;;  %v8733_v17 = vpop.eup %8732  ;;  %v4574_v39 = vmul.f32 %v8731_v5, %v11230_v7 }
0x11b6   : > { %8738 = vrcp.f32 %v4934_v20  ;;  %v4575_v14 = vmul.f32 %v8733_v17, %v11225_v25 }
0x11b8   : > { %7436 = vmatmul.mubr.msk.f32.vlgmr.msra.gmra.mrb[48].mxu1 %vm1146_vm11, %v4571_v9 }
0x11b9   : > { %7438 = vmatprep.mubr.msk.f32.mxu1 %vm1146_vm11, %v4572_v28  ;;  %v4943_v46 = vpop.xlane.xlu0 %4942 }
0x11bc   : > { %v8735_v34 = vpop.eup %8734  ;;  %v4949_v59 = vpop.xlane.xlu1 %4948  ;;  %7439 = vmatmul.mubr.msk.f32.gmra.mrb[50].mxu1 %vm1146_vm11, %v4573_v4 }
0x11bd   : > { %7441 = vmatprep.mubr.msk.f32.mxu1 %vm1146_vm11, %v4574_v39  ;;  %v4940_v58 = vpop.xlane.xlu0 %4939  ;;  %v8737_v3 = vpop.eup %8736  ;;  %v4576_v33 = vmul.f32 %v8735_v34, %v11242_v31 }
0x11be   : > { %v4577_v0 = vmul.f32 %v8737_v3, %v11236_v26 }
0x11c0   : > { %v8739_v45 = vpop.eup %8738  ;;  %7442 = vmatmul.mubr.msk.f32.gmra.mrb[52].mxu1 %vm1146_vm11, %v4575_v14  ;;  %v8438_v36 = vpop.permute.xlu1 %8437 }
0x11c1   : > { %7444 = vmatprep.mubr.msk.f32.mxu1 %vm1146_vm11, %v4576_v33  ;;  %v4946_v41 = vpop.xlane.xlu0 %4945  ;;  %v4964_v7 = vmul.f32 %v8739_v45, %v11249_v10  ;;  %v8440_v24 = vunpack.i.h.bf16 %v8438_v36  ;;  %v8439_v40 = vunpack.i.l.bf16 %v8438_v36 }
0x11c2   : > { %8740 = vrcp.f32 %v4946_v41 }
0x11c3   : > { %7491 = vmatprep.mubr.msk.f32.mxu0 %vm1146_vm11, %v4964_v7  ;;  %v7915_v42 = vpack.c.bf16 %v8440_v24, %v8439_v40  ;;  %8742 = vrcp.f32 %v4937_v57 }
0x11c4   : > { %7445 = vmatmul.mubr.msk.f32.gmra.mrb[54].mxu1 %vm1146_vm11, %v4577_v0  ;;  %v8443_v23 = vpop.permute.xlu1 %8442  ;;  %8744 = vrcp.f32 %v4949_v59 }
0x11c5   : > { %v8433_v25 = vpop.permute.xlu0 %8432  ;;  %v8445_v52 = vunpack.i.h.bf16 %v8443_v23  ;;  %v8444_v47 = vunpack.i.l.bf16 %v8443_v23  ;;  %8746 = vrcp.f32 %v4940_v58  ;;  %v6585_v58 = vld [vmem:[#allocation5 + $0x1] ss:$0 sm:$0xff] }
0x11c6   : > { %v8435_v31 = vunpack.i.h.bf16 %v8433_v25  ;;  %v8434_v56 = vunpack.i.l.bf16 %v8433_v25  ;;  %8748 = vrcp.f32 %v4943_v46 }
0x11c7   : > { %v7919_v63 = vpack.c.bf16 %v8445_v52, %v8444_v47 }
0x11c8   : > { %v7911_v16 = vpack.c.bf16 %v8435_v31, %v8434_v56  ;;  %v11892_v56 = vld [vmem:[#allocation50_spill] sm:$0xff] }
0x11ca   : > { %7912 = vmatprep.subr.bf16.mxu0 %v7911_v16  ;;  %7975 = vmatprep.subr.bf16.mxu1 %v7911_v16 }
0x11cb   : > { %7914 = vmatpush3.bf16.msra.mxu0 %v7911_v16  ;;  %7979 = vmatpush3.bf16.msra.mxu1 %v7911_v16  ;;  %v11893_v16 = vld [vmem:[#allocation48_spill] sm:$0xff] }
0x11cc   : > { %v8741_v10 = vpop.eup %8740  ;;  %7916 = vmatprep.subr.bf16.mxu0 %v7915_v42  ;;  %7976 = vmatprep.subr.bf16.mxu1 %v7915_v42 }
0x11cd   : > { %v4968_v26 = vmul.f32 %v8741_v10, %v11267_v62  ;;  %v8743_v35 = vpop.eup %8742 }
0x11ce   : > { %v8745_v12 = vpop.eup %8744  ;;  %v4965_v60 = vmul.f32 %v8743_v35, %v11247_v49  ;;  %v5142_v49 = vld [vmem:[#allocation2 + $0x20] sm:$0xff] }
0x11cf   : > { %7918 = vmatpush3.bf16.msra.mxu0 %v7915_v42  ;;  %7980 = vmatpush3.bf16.msra.mxu1 %v7915_v42  ;;  %v8747_v55 = vpop.eup %8746  ;;  %v4969_v27 = vmul.f32 %v8745_v12, %v11261_v11 }
0x11d0   : > { %7497 = vmatprep.mubr.msk.f32.mxu1 %vm1146_vm11, %v4968_v26  ;;  %7920 = vmatprep.subr.bf16.mxu0 %v7919_v63  ;;  %v8749_v32 = vpop.eup %8748  ;;  %v4966_v2 = vmul.f32 %v8747_v55, %v11259_v21  ;;  %v5143_v21 = vld [vmem:[#allocation2 + $0x28] sm:$0xff] }
0x11d1   : > { %7977 = vmatprep.subr.bf16.mxu1 %v7919_v63  ;;  %v4967_v8 = vmul.f32 %v8749_v32, %v11255_v43  ;;  %v7927_v11 = vpack.c.bf16 %v5143_v21, %v5142_v49  ;;  %v11894_v26 = vld [vmem:[#allocation41_spill] sm:$0xff] }
0x11d3   : > { %7922 = vmatpush3.bf16.msra.mxu0 %v7919_v63  ;;  %7981 = vmatpush3.bf16.msra.mxu1 %v7919_v63 }
0x11f5   : > { %v4952_v22 = vpop.xlane.xlu1 %4951 }
0x11f6   : > { %8750 = vrcp.f32 %v4952_v22  ;;  %v4955_v13 = vpop.xlane.xlu0 %4954 }
0x11f7   : > { %8752 = vrcp.f32 %v4955_v13 }
0x11f9   : > { %v8448_v38 = vpop.permute.xlu1 %8447 }
0x11fa   : > { %v8450_v37 = vunpack.i.h.bf16 %v8448_v38  ;;  %v8449_v62 = vunpack.i.l.bf16 %v8448_v38 }
0x11fc   : > { %v7923_v53 = vpack.c.bf16 %v8450_v37, %v8449_v62  ;;  %v11895_v62 = vld [vmem:[#allocation43_spill] sm:$0xff] }
0x11fe   : > { %7924 = vmatprep.subr.bf16.mxu0 %v7923_v53  ;;  %7978 = vmatprep.subr.bf16.mxu1 %v7923_v53 }
0x11ff   : > { %7926 = vmatpush3.bf16.msra.mxu0 %v7923_v53  ;;  %7982 = vmatpush3.bf16.msra.mxu1 %v7923_v53  ;;  %v11896_v53 = vld [vmem:[#allocation49_spill] sm:$0xff] }
0x1200   : > { %v8751_v44 = vpop.eup %8750  ;;  %7928 = vmatprep.subr.bf16.mxu1 %v7927_v11 }
0x1201   : > { %v8753_v18 = vpop.eup %8752  ;;  %v4970_v19 = vmul.f32 %v8751_v44, %v11285_v51  ;;  %v5144_v51 = vld [vmem:[#allocation2 + $0x30] sm:$0xff] }
0x1202   : > { %7492 = vmatmul.mubr.msk.f32.vlgmr.msra.gmra.mrb[80].mxu0 %vm1146_vm11, %v4965_v60  ;;  %7498 = vmatmul.mubr.msk.f32.vlgmr.msra.gmra.mrb[52].mxu1 %vm1146_vm11, %v4969_v27  ;;  %v4971_v6 = vmul.f32 %v8753_v18, %v11287_v50  ;;  %v7931_v30 = vpack.c.bf16 %v5145_v29, %v5144_v51  ;;  %v11897_v60 = vld [vmem:[#allocation40_spill] sm:$0xff] }
0x1203   : > { %7494 = vmatprep.mubr.msk.f32.mxu0 %vm1146_vm11, %v4966_v2  ;;  %7500 = vmatprep.mubr.msk.f32.mxu1 %vm1146_vm11, %v4970_v19 }
0x1204   : > { %7930 = vmatpush3.bf16.msra.mxu1 %v7927_v11 }
0x1205   : > { %7932 = vmatprep.subr.bf16.mxu1 %v7931_v30 }
0x1206   : > { %7495 = vmatmul.mubr.msk.f32.gmra.mrb[82].mxu0 %vm1146_vm11, %v4967_v8  ;;  %7501 = vmatmul.mubr.msk.f32.gmra.mrb[54].mxu1 %vm1146_vm11, %v4971_v6 }
0x1208   : > { %7934 = vmatpush3.bf16.msra.mxu1 %v7931_v30 }
0x128b   : > { %v7437_v50 = vpop.f32.mrb[48].mxu1 }
0x128c   : > { %v4668_v48 = vpop.f32.mrb[49].mxu1 }
0x128f   : > { %v7440_v54 = vpop.f32.mrb[50].mxu1 }
0x1290   : > { %v4678_v20 = vpop.f32.mrb[51].mxu1 }
0x12d5   : > { %v7493_v9 = vpop.f32.mrb[80].mxu0  ;;  %v7499_v43 = vpop.f32.mrb[52].mxu1 }
0x12d6   : > { %v7983_v1 = vadd.f32 %v7493_v9, %v7437_v50  ;;  %v5094_v28 = vpop.f32.mrb[81].mxu0  ;;  %v5114_v5 = vpop.f32.mrb[53].mxu1 }
0x12d7   : > { %v7984_v57 = vadd.f32 %v5094_v28, %v4668_v48 }
0x12d9   : > { %v7496_v46 = vpop.f32.mrb[82].mxu0  ;;  %v7502_v4 = vpop.f32.mrb[54].mxu1  ;;  %7511 = vmatprep.mubr.msk.f32.mxu1 %vm846_vm8, %v7984_v57 }
0x12da   : > { %v7985_v17 = vadd.f32 %v7496_v46, %v7440_v54  ;;  %v5104_v39 = vpop.f32.mrb[83].mxu0  ;;  %v5124_v34 = vpop.f32.mrb[55].mxu1  ;;  %7512 = vmatmul.mubr.msk.f32.vlgmr.msra.gmra.mrb[56].mxu1 %vm846_vm8, %v7983_v1 }
0x12db   : > { %v7986_v59 = vadd.f32 %v5104_v39, %v4678_v20 }
0x12dd   : > { %7514 = vmatprep.mubr.msk.f32.mxu1 %vm846_vm8, %v7986_v59 }
0x12de   : > { %7515 = vmatmul.mubr.msk.f32.gmra.mrb[58].mxu1 %vm846_vm8, %v7985_v17 }
0x12df   : > { %7517 = vmatprep.mubr.msk.f32.mxu1 %vm846_vm8, %v5114_v5 }
0x12e2   : > { %7518 = vmatmul.mubr.msk.f32.gmra.mrb[60].mxu1 %vm846_vm8, %v7499_v43 }
0x12e3   : > { %7520 = vmatprep.mubr.msk.f32.mxu1 %vm846_vm8, %v5124_v34 }
0x12e6   : > { %7521 = vmatmul.mubr.msk.f32.gmra.mrb[62].mxu1 %vm846_vm8, %v7502_v4 }
0x13ad   : > { %v7513_v14 = vpop.f32.mrb[56].mxu1 }
0x13ae   : > { %v5250_v3 = vadd.f32 %v7513_v14, %v6585_v58  ;;  %v5244_v33 = vpop.f32.mrb[57].mxu1 }
0x13af   : > { %v5245_v45 = vadd.f32 %v6585_v58, %v5244_v33 }
0x13b0   : > { %v11385_v36 = vadd.f32 %v5250_v3, %v10582_v15 }
0x13b1   : > { %v11388_v41 = vadd.f32 %v5245_v45, %v10574_v61  ;;  %v7516_v7 = vpop.f32.mrb[58].mxu1 }
0x13b2   : > { %v5260_v0 = vadd.f32 %v7516_v7, %v6585_v58  ;;  %v5254_v25 = vpop.f32.mrb[59].mxu1  ;;  %v5298_v24 = vsel %vm846_vm8, %v11385_v36, 0.0 }
0x13b3   : > { %v5255_v40 = vadd.f32 %v6585_v58, %v5254_v25  ;;  %5299 = vadd.xlane.f32.xlu0 %v5298_v24  ;;  %v5295_v31 = vsel %vm846_vm8, %v11388_v41, 0.0 }
0x13b4   : > { %v11395_v23 = vadd.f32 %v5260_v0, %v11892_v56  ;;  %5296 = vadd.xlane.f32.xlu1 %v5295_v31 }
0x13b5   : > { %v7519_v15 = vpop.f32.mrb[60].mxu1  ;;  %v11398_v42 = vadd.f32 %v5255_v40, %v11893_v16 }
0x13b6   : > { %v5270_v61 = vadd.f32 %v7519_v15, %v6585_v58  ;;  %v5264_v52 = vpop.f32.mrb[61].mxu1  ;;  %v5304_v47 = vsel %vm846_vm8, %v11395_v23, 0.0 }
0x13b7   : > { %5305 = vadd.xlane.f32.xlu0 %v5304_v47  ;;  %v5265_v22 = vadd.f32 %v6585_v58, %v5264_v52  ;;  %v5301_v37 = vsel %vm846_vm8, %v11398_v42, 0.0 }
0x13b8   : > { %v11403_v63 = vadd.f32 %v5270_v61, %v11894_v26 }
0x13b9   : > { %v7522_v10 = vpop.f32.mrb[62].mxu1  ;;  %v11411_v12 = vadd.f32 %v5265_v22, %v11896_v53 }
0x13ba   : > { %v5280_v13 = vadd.f32 %v7522_v10, %v6585_v58  ;;  %v5274_v38 = vpop.f32.mrb[63].mxu1  ;;  %v5310_v44 = vsel %vm846_vm8, %v11403_v63, 0.0 }
0x13bb   : > { %5302 = vadd.xlane.f32.xlu0 %v5301_v37  ;;  %v5275_v55 = vadd.f32 %v6585_v58, %v5274_v38  ;;  %v5307_v18 = vsel %vm846_vm8, %v11411_v12, 0.0 }
0x13bc   : > { %v11408_v35 = vadd.f32 %v5280_v13, %v11895_v62 }
0x13bd   : > { %v11418_v27 = vadd.f32 %v5275_v55, %v11897_v60 }
0x13be   : > { %v5316_v32 = vsel %vm846_vm8, %v11408_v35, 0.0 }
0x13bf   : > { %5317 = vadd.xlane.f32.xlu1 %v5316_v32  ;;  %5311 = vadd.xlane.f32.xlu0 %v5310_v44  ;;  %v5313_v2 = vsel %vm846_vm8, %v11418_v27, 0.0 }
0x13c3   : > { %5308 = vadd.xlane.f32.xlu0 %v5307_v18 }
0x13c7   : > { %5314 = vadd.xlane.f32.xlu0 %v5313_v2 }
0x1440   : > { %v5300_v19 = vpop.xlane.xlu0 %5299 }
0x1441   : > { %v5325_v6 = vrot.slane %v5300_v19, 4  ;;  %v5297_v8 = vpop.xlane.xlu1 %5296 }
0x1442   : > { %v5319_v49 = vrot.slane %v5297_v8, 4 }
0x1443   : > { %v5326_v21 = vadd.f32 %v5325_v6, %v5300_v19 }
0x1444   : > { %v5320_v11 = vadd.f32 %v5319_v49, %v5297_v8  ;;  %v5306_v51 = vpop.xlane.xlu0 %5305 }
0x1445   : > { %v5327_v29 = vrot.slane %v5326_v21, 2  ;;  %v5337_v30 = vrot.slane %v5306_v51, 4 }
0x1446   : > { %v5321_v50 = vrot.slane %v5320_v11, 2 }
0x1447   : > { %v5328_v48 = vadd.f32 %v5327_v29, %v5326_v21  ;;  %v5338_v54 = vadd.f32 %v5337_v30, %v5306_v51 }
0x1448   : > { %v5322_v20 = vadd.f32 %v5321_v50, %v5320_v11  ;;  %v5303_v9 = vpop.xlane.xlu0 %5302 }
0x1449   : > { %v5329_v43 = vrot.slane %v5328_v48, 1  ;;  %v5339_v1 = vrot.slane %v5338_v54, 2  ;;  %v5331_v28 = vrot.slane %v5303_v9, 4 }
0x144a   : > { %v5323_v5 = vrot.slane %v5322_v20, 1 }
0x144b   : > { %v5330_v57 = vadd.f32 %v5329_v43, %v5328_v48  ;;  %v5340_v46 = vadd.f32 %v5339_v1, %v5338_v54  ;;  %v5332_v4 = vadd.f32 %v5331_v28, %v5303_v9 }
0x144c   : > { %v5324_v17 = vadd.f32 %v5323_v5, %v5322_v20  ;;  %v5318_v39 = vpop.xlane.xlu1 %5317  ;;  %v5312_v34 = vpop.xlane.xlu0 %5311 }
0x144d   : > { %v5368_v59 = vmul.f32 0.00390625, %v5330_v57  ;;  %v5341_v58 = vrot.slane %v5340_v46, 1  ;;  %v5333_v14 = vrot.slane %v5332_v4, 2  ;;  %v5361_v3 = vrot.slane %v5318_v39, 4 }
0x144e   : > { %v5367_v33 = vmul.f32 0.00390625, %v5324_v17  ;;  %v5349_v45 = vrot.slane %v5312_v34, 4 }
0x144f   : > { %v5342_v7 = vadd.f32 %v5341_v58, %v5340_v46  ;;  %v5334_v0 = vadd.f32 %v5333_v14, %v5332_v4  ;;  %v5362_v25 = vadd.f32 %v5361_v3, %v5318_v39  ;;  %v11425_v24 = vsub.f32 %v11385_v36, %v5368_v59  ;;  %v5512_v58 = vld [vmem:[#allocation10 + $0x20] sm:$0xff]  ;;  %v5513_v14 = vld [vmem:[#allocation10 + $0x28] sm:$0xff] }
0x1450   : > { %v5350_v40 = vadd.f32 %v5349_v45, %v5312_v34  ;;  %v5309_v31 = vpop.xlane.xlu0 %5308  ;;  %v11428_v56 = vsub.f32 %v11388_v41, %v5367_v33  ;;  %v7935_v3 = vpack.c.bf16 %v5513_v14, %v5512_v58  ;;  %v5514_v33 = vld [vmem:[#allocation10 + $0x30] sm:$0xff]  ;;  %v5515_v45 = vld [vmem:[#allocation10 + $0x38] sm:$0xff] }
0x1451   : > { %v5370_v15 = vmul.f32 0.00390625, %v5342_v7  ;;  %v5335_v16 = vrot.slane %v5334_v0, 1  ;;  %v5363_v61 = vrot.slane %v5362_v25, 2  ;;  %v5343_v52 = vrot.slane %v5309_v31, 4 }
0x1452   : > { %v5351_v47 = vrot.slane %v5350_v40, 2  ;;  %v5384_v10 = vmul.f32 %v11425_v24, %v11425_v24  ;;  %v5383_v26 = vmul.f32 %v11428_v56, %v11428_v56  ;;  %7936 = vmatprep.subr.bf16.mxu0 %v7935_v3  ;;  %v7939_v7 = vpack.c.bf16 %v5515_v45, %v5514_v33 }
0x1453   : > { %v5336_v22 = vadd.f32 %v5335_v16, %v5334_v0  ;;  %v5364_v13 = vadd.f32 %v5363_v61, %v5362_v25  ;;  %v5344_v36 = vadd.f32 %v5343_v52, %v5309_v31  ;;  %v11435_v38 = vsub.f32 %v11395_v23, %v5370_v15  ;;  %7938 = vmatpush3.bf16.msra.mxu0 %v7935_v3 }
0x1454   : > { %v5352_v37 = vadd.f32 %v5351_v47, %v5350_v40  ;;  %v5394_v41 = vsel %vm846_vm8, %v5384_v10, 0.0  ;;  %v5315_v62 = vpop.xlane.xlu0 %5314  ;;  %v5391_v53 = vsel %vm846_vm8, %v5383_v26, 0.0  ;;  %7940 = vmatprep.subr.bf16.mxu0 %v7939_v7 }
0x1455   : > { %v5369_v55 = vmul.f32 0.00390625, %v5336_v22  ;;  %v5365_v32 = vrot.slane %v5364_v13, 1  ;;  %v5345_v44 = vrot.slane %v5344_v36, 2  ;;  %5395 = vadd.xlane.f32.xlu1 %v5394_v41  ;;  %v5355_v60 = vrot.slane %v5315_v62, 4  ;;  %5392 = vadd.xlane.f32.xlu0 %v5391_v53 }
0x1456   : > { %v5353_v18 = vrot.slane %v5352_v37, 1  ;;  %v5386_v2 = vmul.f32 %v11435_v38, %v11435_v38 }
0x1457   : > { %v5366_v19 = vadd.f32 %v5365_v32, %v5364_v13  ;;  %v5346_v6 = vadd.f32 %v5345_v44, %v5344_v36  ;;  %v5356_v23 = vadd.f32 %v5355_v60, %v5315_v62  ;;  %v11442_v8 = vsub.f32 %v11398_v42, %v5369_v55  ;;  %7942 = vmatpush3.bf16.msra.mxu0 %v7939_v7 }
0x1458   : > { %v5354_v49 = vadd.f32 %v5353_v18, %v5352_v37  ;;  %v5400_v21 = vsel %vm846_vm8, %v5386_v2, 0.0 }
0x1459   : > { %v5374_v11 = vmul.f32 0.00390625, %v5366_v19  ;;  %v5347_v51 = vrot.slane %v5346_v6, 1  ;;  %v5357_v29 = vrot.slane %v5356_v23, 2  ;;  %5401 = vadd.xlane.f32.xlu1 %v5400_v21  ;;  %v5385_v30 = vmul.f32 %v11442_v8, %v11442_v8 }
0x145a   : > { %v5372_v50 = vmul.f32 0.00390625, %v5354_v49 }
0x145b   : > { %v5348_v48 = vadd.f32 %v5347_v51, %v5346_v6  ;;  %v5358_v54 = vadd.f32 %v5357_v29, %v5356_v23  ;;  %v5397_v20 = vsel %vm846_vm8, %v5385_v30, 0.0  ;;  %v11452_v42 = vsub.f32 %v11408_v35, %v5374_v11 }
0x145c   : > { %5398 = vadd.xlane.f32.xlu0 %v5397_v20  ;;  %v11449_v9 = vsub.f32 %v11403_v63, %v5372_v50 }
0x145d   : > { %v5371_v43 = vmul.f32 0.00390625, %v5348_v48  ;;  %v5359_v1 = vrot.slane %v5358_v54, 1  ;;  %v5390_v4 = vmul.f32 %v11452_v42, %v11452_v42 }
0x145e   : > { %v5388_v28 = vmul.f32 %v11449_v9, %v11449_v9 }
0x145f   : > { %v5360_v5 = vadd.f32 %v5359_v1, %v5358_v54  ;;  %v11457_v57 = vsub.f32 %v11411_v12, %v5371_v43  ;;  %v5412_v34 = vsel %vm846_vm8, %v5390_v4, 0.0 }
0x1460   : > { %v5406_v46 = vsel %vm846_vm8, %v5388_v28, 0.0 }
0x1461   : > { %v5373_v17 = vmul.f32 0.00390625, %v5360_v5  ;;  %5407 = vadd.xlane.f32.xlu1 %v5406_v46  ;;  %v5387_v63 = vmul.f32 %v11457_v57, %v11457_v57 }
0x1463   : > { %v5403_v35 = vsel %vm846_vm8, %v5387_v63, 0.0  ;;  %v11466_v39 = vsub.f32 %v11418_v27, %v5373_v17 }
0x1464   : > { %5404 = vadd.xlane.f32.xlu0 %v5403_v35 }
0x1465   : > { %5413 = vadd.xlane.f32.xlu1 %v5412_v34  ;;  %v5389_v12 = vmul.f32 %v11466_v39, %v11466_v39 }
0x1467   : > { %v5409_v59 = vsel %vm846_vm8, %v5389_v12, 0.0 }
0x1468   : > { %5410 = vadd.xlane.f32.xlu0 %v5409_v59 }
0x14e2   : > { %v5396_v27 = vpop.xlane.xlu1 %5395  ;;  %v5393_v0 = vpop.xlane.xlu0 %5392 }
0x14e3   : > { %v5421_v25 = vrot.slane %v5396_v27, 4  ;;  %v5415_v40 = vrot.slane %v5393_v0, 4 }
0x14e5   : > { %v5422_v31 = vadd.f32 %v5421_v25, %v5396_v27  ;;  %v5416_v15 = vadd.f32 %v5415_v40, %v5393_v0 }
0x14e6   : > { %v5402_v16 = vpop.xlane.xlu1 %5401 }
0x14e7   : > { %v5423_v61 = vrot.slane %v5422_v31, 2  ;;  %v5417_v52 = vrot.slane %v5416_v15, 2  ;;  %v5433_v47 = vrot.slane %v5402_v16, 4 }
0x14e9   : > { %v5424_v10 = vadd.f32 %v5423_v61, %v5422_v31  ;;  %v5418_v26 = vadd.f32 %v5417_v52, %v5416_v15  ;;  %v5434_v22 = vadd.f32 %v5433_v47, %v5402_v16  ;;  %v5399_v13 = vpop.xlane.xlu0 %5398  ;;  %v5292_v47 = vld [vmem:[#allocation7 + $0x8] sm:$0xff] }
0x14ea   : > { %v5427_v36 = vrot.slane %v5399_v13, 4 }
0x14eb   : > { %v5425_v37 = vrot.slane %v5424_v10, 1  ;;  %v5419_v41 = vrot.slane %v5418_v26, 1  ;;  %v5435_v62 = vrot.slane %v5434_v22, 2 }
0x14ec   : > { %v5428_v53 = vadd.f32 %v5427_v36, %v5399_v13 }
0x14ed   : > { %v5426_v55 = vadd.f32 %v5425_v37, %v5424_v10  ;;  %v5420_v32 = vadd.f32 %v5419_v41, %v5418_v26  ;;  %v5436_v44 = vadd.f32 %v5435_v62, %v5434_v22 }
0x14ee   : > { %v5429_v60 = vrot.slane %v5428_v53, 2  ;;  %v5408_v18 = vpop.xlane.xlu1 %5407 }
0x14ef   : > { %v5464_v2 = vmul.f32 0.00390625, %v5426_v55  ;;  %v5463_v19 = vmul.f32 0.00390625, %v5420_v32  ;;  %v5437_v6 = vrot.slane %v5436_v44, 1  ;;  %v5445_v23 = vrot.slane %v5408_v18, 4 }
0x14f0   : > { %v5430_v49 = vadd.f32 %v5429_v60, %v5428_v53  ;;  %v5294_v53 = vld [vmem:[#allocation8 + $0x8] sm:$0xff] }
0x14f1   : > { %v5472_v21 = vadd.f32 1e-05, %v5464_v2  ;;  %v5471_v11 = vadd.f32 1e-05, %v5463_v19  ;;  %v5438_v51 = vadd.f32 %v5437_v6, %v5436_v44  ;;  %v5446_v29 = vadd.f32 %v5445_v23, %v5408_v18  ;;  %v5405_v30 = vpop.xlane.xlu0 %5404 }
0x14f2   : > { %v5431_v50 = vrot.slane %v5430_v49, 1  ;;  %v5414_v48 = vpop.xlane.xlu1 %5413  ;;  %v5439_v54 = vrot.slane %v5405_v30, 4 }
0x14f3   : > { %8754 = vrsqrt.f32 %v5472_v21  ;;  %v5466_v20 = vmul.f32 0.00390625, %v5438_v51  ;;  %v5447_v43 = vrot.slane %v5446_v29, 2  ;;  %v5457_v1 = vrot.slane %v5414_v48, 4 }
0x14f4   : > { %8756 = vrsqrt.f32 %v5471_v11  ;;  %v5432_v28 = vadd.f32 %v5431_v50, %v5430_v49  ;;  %v5440_v5 = vadd.f32 %v5439_v54, %v5405_v30 }
0x14f5   : > { %v5474_v46 = vadd.f32 1e-05, %v5466_v20  ;;  %v5448_v4 = vadd.f32 %v5447_v43, %v5446_v29  ;;  %v5458_v17 = vadd.f32 %v5457_v1, %v5414_v48  ;;  %v5411_v63 = vpop.xlane.xlu0 %5410 }
0x14f6   : > { %v5465_v35 = vmul.f32 0.00390625, %v5432_v28  ;;  %v5441_v34 = vrot.slane %v5440_v5, 2  ;;  %v5451_v12 = vrot.slane %v5411_v63, 4 }
0x14f7   : > { %8758 = vrsqrt.f32 %v5474_v46  ;;  %v5449_v59 = vrot.slane %v5448_v4, 1  ;;  %v5459_v58 = vrot.slane %v5458_v17, 2 }
0x14f8   : > { %v5473_v14 = vadd.f32 1e-05, %v5465_v35  ;;  %v5442_v3 = vadd.f32 %v5441_v34, %v5440_v5  ;;  %v5452_v33 = vadd.f32 %v5451_v12, %v5411_v63 }
0x14f9   : > { %v5450_v45 = vadd.f32 %v5449_v59, %v5448_v4  ;;  %v5460_v7 = vadd.f32 %v5459_v58, %v5458_v17 }
0x14fa   : > { %8760 = vrsqrt.f32 %v5473_v14  ;;  %v5443_v27 = vrot.slane %v5442_v3, 1  ;;  %v5453_v0 = vrot.slane %v5452_v33, 2 }
0x14fb   : > { %v5468_v25 = vmul.f32 0.00390625, %v5450_v45  ;;  %v5461_v40 = vrot.slane %v5460_v7, 1 }
0x14fc   : > { %v5444_v31 = vadd.f32 %v5443_v27, %v5442_v3  ;;  %v5454_v15 = vadd.f32 %v5453_v0, %v5452_v33 }
0x14fd   : > { %v8755_v16 = vpop.eup %8754  ;;  %v5476_v61 = vadd.f32 1e-05, %v5468_v25  ;;  %v5462_v52 = vadd.f32 %v5461_v40, %v5460_v7 }
0x14fe   : > { %v8757_v10 = vpop.eup %8756  ;;  %v5488_v26 = vmul.f32 %v8755_v16, %v11425_v24  ;;  %v5467_v22 = vmul.f32 0.00390625, %v5444_v31  ;;  %v5455_v13 = vrot.slane %v5454_v15, 1 }
0x14ff   : > { %8762 = vrsqrt.f32 %v5476_v61  ;;  %v5470_v36 = vmul.f32 0.00390625, %v5462_v52  ;;  %v5487_v37 = vmul.f32 %v8757_v10, %v11428_v56 }
0x1500   : > { %v5475_v41 = vadd.f32 1e-05, %v5467_v22  ;;  %v5456_v62 = vadd.f32 %v5455_v13, %v5454_v15  ;;  %v5496_v55 = vmul.f32 %v5488_v26, %v5292_v47 }
0x1501   : > { %v8759_v32 = vpop.eup %8758  ;;  %v5478_v44 = vadd.f32 1e-05, %v5470_v36  ;;  %v5495_v60 = vmul.f32 %v5487_v37, %v5292_v47 }
0x1502   : > { %8764 = vrsqrt.f32 %v5475_v41  ;;  %v5469_v18 = vmul.f32 0.00390625, %v5456_v62  ;;  %v5490_v2 = vmul.f32 %v8759_v32, %v11435_v38  ;;  %v5504_v23 = vadd.f32 %v5496_v55, %v5294_v53 }
0x1503   : > { %8766 = vrsqrt.f32 %v5478_v44  ;;  %v5503_v19 = vadd.f32 %v5495_v60, %v5294_v53 }
0x1504   : > { %v8761_v24 = vpop.eup %8760  ;;  %v5477_v6 = vadd.f32 1e-05, %v5469_v18  ;;  %v5498_v49 = vmul.f32 %v5490_v2, %v5292_v47 }
0x1505   : > { %7531 = vmatprep.mubr.msk.f32.mxu0 %vm846_vm8, %v5503_v19  ;;  %v5489_v56 = vmul.f32 %v8761_v24, %v11442_v8 }
0x1506   : > { %8768 = vrsqrt.f32 %v5477_v6  ;;  %7532 = vmatmul.mubr.msk.f32.vlgmr.msra.gmra.mrb[84].mxu0 %vm846_vm8, %v5504_v23  ;;  %v5506_v29 = vadd.f32 %v5498_v49, %v5294_v53 }
0x1507   : > { %v5497_v21 = vmul.f32 %v5489_v56, %v5292_v47 }
0x1509   : > { %v8763_v11 = vpop.eup %8762  ;;  %v5505_v51 = vadd.f32 %v5497_v21, %v5294_v53 }
0x150a   : > { %v5492_v30 = vmul.f32 %v8763_v11, %v11449_v9 }
0x150b   : > { %7534 = vmatprep.mubr.msk.f32.mxu0 %vm846_vm8, %v5505_v51 }
0x150c   : > { %v8765_v38 = vpop.eup %8764  ;;  %7535 = vmatmul.mubr.msk.f32.gmra.mrb[86].mxu0 %vm846_vm8, %v5506_v29  ;;  %v5500_v54 = vmul.f32 %v5492_v30, %v5292_v47 }
0x150d   : > { %v8767_v50 = vpop.eup %8766  ;;  %v5491_v48 = vmul.f32 %v8765_v38, %v11457_v57  ;;  %v6594_v57 = vld [vmem:[#allocation11 + $0x1] ss:$0 sm:$0xff] }
0x150e   : > { %v5494_v8 = vmul.f32 %v8767_v50, %v11452_v42  ;;  %v5508_v5 = vadd.f32 %v5500_v54, %v5294_v53 }
0x150f   : > { %v5499_v20 = vmul.f32 %v5491_v48, %v5292_v47 }
0x1510   : > { %v8769_v43 = vpop.eup %8768  ;;  %v5502_v46 = vmul.f32 %v5494_v8, %v5292_v47 }
0x1511   : > { %v5507_v1 = vadd.f32 %v5499_v20, %v5294_v53  ;;  %v5493_v28 = vmul.f32 %v8769_v43, %v11466_v39 }
0x1512   : > { %v5510_v17 = vadd.f32 %v5502_v46, %v5294_v53 }
0x1513   : > { %7537 = vmatprep.mubr.msk.f32.mxu0 %vm846_vm8, %v5507_v1  ;;  %v5501_v9 = vmul.f32 %v5493_v28, %v5292_v47 }
0x1514   : > { %7538 = vmatmul.mubr.msk.f32.gmra.mrb[88].mxu0 %vm846_vm8, %v5508_v5 }
0x1515   : > { %v5509_v4 = vadd.f32 %v5501_v9, %v5294_v53 }
0x1517   : > { %7540 = vmatprep.mubr.msk.f32.mxu0 %vm846_vm8, %v5509_v4 }
0x1518   : > { %7541 = vmatmul.mubr.msk.f32.gmra.mrb[90].mxu0 %vm846_vm8, %v5510_v17 }
0x15d9   : > { %v7533_v42 = vpop.f32.mrb[84].mxu0 }
0x15da   : > { %v5620_v63 = vadd.f32 %v7533_v42, %v6594_v57  ;;  %v5614_v35 = vpop.f32.mrb[85].mxu0 }
0x15db   : > { %v5615_v34 = vadd.f32 %v6594_v57, %v5614_v35 }
0x15dc   : > { %v11488_v12 = vadd.f32 %v5620_v63, %v5504_v23 }
0x15dd   : > { %v11490_v39 = vadd.f32 %v5615_v34, %v5503_v19 }
0x15de   : > { %v5668_v59 = vsel %vm846_vm8, %v11488_v12, 0.0 }
0x15df   : > { %5669 = vadd.xlane.f32.xlu1 %v5668_v59  ;;  %v5665_v58 = vsel %vm846_vm8, %v11490_v39, 0.0  ;;  %v7536_v14 = vpop.f32.mrb[86].mxu0 }
0x15e0   : > { %5666 = vadd.xlane.f32.xlu0 %v5665_v58  ;;  %v5630_v3 = vadd.f32 %v7536_v14, %v6594_v57  ;;  %v5624_v33 = vpop.f32.mrb[87].mxu0 }
0x15e1   : > { %v5625_v45 = vadd.f32 %v6594_v57, %v5624_v33 }
0x15e2   : > { %v11496_v7 = vadd.f32 %v5630_v3, %v5506_v29 }
0x15e3   : > { %v11498_v27 = vadd.f32 %v5625_v45, %v5505_v51 }
0x15e4   : > { %v5674_v0 = vsel %vm846_vm8, %v11496_v7, 0.0 }
0x15e5   : > { %5675 = vadd.xlane.f32.xlu1 %v5674_v0  ;;  %v5671_v25 = vsel %vm846_vm8, %v11498_v27, 0.0 }
0x15e6   : > { %5672 = vadd.xlane.f32.xlu0 %v5671_v25 }
0x15e7   : > { %v7539_v40 = vpop.f32.mrb[88].mxu0 }
0x15e8   : > { %v5640_v31 = vadd.f32 %v7539_v40, %v6594_v57  ;;  %v5634_v15 = vpop.f32.mrb[89].mxu0 }
0x15e9   : > { %v5635_v16 = vadd.f32 %v6594_v57, %v5634_v15 }
0x15ea   : > { %v11504_v61 = vadd.f32 %v5640_v31, %v5508_v5 }
0x15eb   : > { %v11506_v52 = vadd.f32 %v5635_v16, %v5507_v1  ;;  %v7542_v47 = vpop.f32.mrb[90].mxu0 }
0x15ec   : > { %v5650_v10 = vadd.f32 %v7542_v47, %v6594_v57  ;;  %v5644_v26 = vpop.f32.mrb[91].mxu0  ;;  %v5680_v22 = vsel %vm846_vm8, %v11504_v61, 0.0 }
0x15ed   : > { %v5645_v13 = vadd.f32 %v6594_v57, %v5644_v26  ;;  %5681 = vadd.xlane.f32.xlu1 %v5680_v22  ;;  %v5677_v36 = vsel %vm846_vm8, %v11506_v52, 0.0 }
0x15ee   : > { %v11512_v37 = vadd.f32 %v5650_v10, %v5510_v17  ;;  %5678 = vadd.xlane.f32.xlu0 %v5677_v36 }
0x15ef   : > { %v11514_v41 = vadd.f32 %v5645_v13, %v5509_v4 }
0x15f0   : > { %v5686_v62 = vsel %vm846_vm8, %v11512_v37, 0.0 }
0x15f1   : > { %5687 = vadd.xlane.f32.xlu1 %v5686_v62  ;;  %v5683_v53 = vsel %vm846_vm8, %v11514_v41, 0.0 }
0x15f2   : > { %5684 = vadd.xlane.f32.xlu0 %v5683_v53 }
0x166c   : > { %v5670_v55 = vpop.xlane.xlu1 %5669 }
0x166d   : > { %v5695_v32 = vrot.slane %v5670_v55, 4  ;;  %v5667_v44 = vpop.xlane.xlu0 %5666 }
0x166e   : > { %v5689_v60 = vrot.slane %v5667_v44, 4 }
0x166f   : > { %v5696_v18 = vadd.f32 %v5695_v32, %v5670_v55 }
0x1670   : > { %v5690_v2 = vadd.f32 %v5689_v60, %v5667_v44 }
0x1671   : > { %v5697_v19 = vrot.slane %v5696_v18, 2 }
0x1672   : > { %v5691_v24 = vrot.slane %v5690_v2, 2  ;;  %v5676_v6 = vpop.xlane.xlu1 %5675 }
0x1673   : > { %v5698_v23 = vadd.f32 %v5697_v19, %v5696_v18  ;;  %v5707_v56 = vrot.slane %v5676_v6, 4  ;;  %v5673_v49 = vpop.xlane.xlu0 %5672 }
0x1674   : > { %v5692_v21 = vadd.f32 %v5691_v24, %v5690_v2  ;;  %v5701_v11 = vrot.slane %v5673_v49, 4 }
0x1675   : > { %v5699_v51 = vrot.slane %v5698_v23, 1  ;;  %v5708_v29 = vadd.f32 %v5707_v56, %v5676_v6 }
0x1676   : > { %v5693_v30 = vrot.slane %v5692_v21, 1  ;;  %v5702_v38 = vadd.f32 %v5701_v11, %v5673_v49 }
0x1677   : > { %v5700_v50 = vadd.f32 %v5699_v51, %v5698_v23  ;;  %v5709_v48 = vrot.slane %v5708_v29, 2 }
0x1678   : > { %v5694_v54 = vadd.f32 %v5693_v30, %v5692_v21  ;;  %v5703_v8 = vrot.slane %v5702_v38, 2 }
0x1679   : > { %v5738_v20 = vmul.f32 0.00390625, %v5700_v50  ;;  %v5710_v43 = vadd.f32 %v5709_v48, %v5708_v29 }
0x167a   : > { %v5737_v1 = vmul.f32 0.00390625, %v5694_v54  ;;  %v5704_v28 = vadd.f32 %v5703_v8, %v5702_v38  ;;  %v5682_v5 = vpop.xlane.xlu1 %5681 }
0x167b   : > { %v5711_v46 = vrot.slane %v5710_v43, 1  ;;  %v5719_v9 = vrot.slane %v5682_v5, 4  ;;  %v5679_v4 = vpop.xlane.xlu0 %5678  ;;  %v11521_v17 = vsub.f32 %v11488_v12, %v5738_v20 }
0x167c   : > { %v5705_v57 = vrot.slane %v5704_v28, 1  ;;  %v5713_v42 = vrot.slane %v5679_v4, 4  ;;  %v11524_v63 = vsub.f32 %v11490_v39, %v5737_v1 }
0x167d   : > { %v5712_v35 = vadd.f32 %v5711_v46, %v5710_v43  ;;  %v5720_v34 = vadd.f32 %v5719_v9, %v5682_v5  ;;  %v5754_v59 = vmul.f32 %v11521_v17, %v11521_v17  ;;  %v6048_v5 = vld [vmem:[%s11898_s29] sm:$0xff]  ;;  %v6049_v9 = vld [vmem:[%s11898_s29 + $0x8] sm:$0xff] }
0x167e   : > { %v5706_v58 = vadd.f32 %v5705_v57, %v5704_v28  ;;  %v5714_v14 = vadd.f32 %v5713_v42, %v5679_v4  ;;  %v5688_v3 = vpop.xlane.xlu1 %5687  ;;  %v5753_v33 = vmul.f32 %v11524_v63, %v11524_v63  ;;  %v6066_v4 = vld [vmem:[%s11898_s29 + $0x90] sm:$0xff]  ;;  %v6067_v57 = vld [vmem:[%s11898_s29 + $0x98] sm:$0xff]  ;;  %v7945_v42 = vpack.c.bf16 %v6049_v9, %v6048_v5 }
0x167f   : > { %v5740_v45 = vmul.f32 0.00390625, %v5712_v35  ;;  %v5721_v0 = vrot.slane %v5720_v34, 2  ;;  %v5731_v12 = vrot.slane %v5688_v3, 4  ;;  %v5764_v25 = vsel %vm846_vm8, %v5754_v59, 0.0  ;;  %v5685_v40 = vpop.xlane.xlu0 %5684  ;;  %v6051_v59 = vld [vmem:[%s11898_s29 + $0x18] sm:$0xff] }
0x1680   : > { %v5739_v31 = vmul.f32 0.00390625, %v5706_v58  ;;  %v5715_v39 = vrot.slane %v5714_v14, 2  ;;  %5765 = vadd.xlane.f32.xlu1 %v5764_v25  ;;  %v5725_v15 = vrot.slane %v5685_v40, 4  ;;  %v5761_v16 = vsel %vm846_vm8, %v5753_v33, 0.0  ;;  %v6068_v58 = vld [vmem:[%s11898_s29 + $0xa0] sm:$0xff]  ;;  %v6071_v25 = vld [vmem:[%s11898_s29 + $0xb8] sm:$0xff] }
0x1681   : > { %v5722_v47 = vadd.f32 %v5721_v0, %v5720_v34  ;;  %v5732_v10 = vadd.f32 %v5731_v12, %v5688_v3  ;;  %5762 = vadd.xlane.f32.xlu0 %v5761_v16  ;;  %v11533_v26 = vsub.f32 %v11496_v7, %v5740_v45  ;;  %v7947_v35 = vpack.c.bf16 %v6067_v57, %v6066_v4  ;;  %v6050_v34 = vld [vmem:[%s11898_s29 + $0x10] sm:$0xff]  ;;  %v6052_v45 = vld [vmem:[%s11898_s29 + $0x20] sm:$0xff]  ;;  %v6053_v0 = vld [vmem:[%s11898_s29 + $0x28] sm:$0xff] }
0x1682   : > { %v5716_v22 = vadd.f32 %v5715_v39, %v5714_v14  ;;  %v5726_v13 = vadd.f32 %v5725_v15, %v5685_v40  ;;  %v11536_v36 = vsub.f32 %v11498_v27, %v5739_v31  ;;  %v6069_v14 = vld [vmem:[%s11898_s29 + $0xa8] sm:$0xff]  ;;  %v7949_v3 = vpack.c.bf16 %v6051_v59, %v6050_v34  ;;  %v6070_v12 = vld [vmem:[%s11898_s29 + $0xb0] sm:$0xff]  ;;  %v6055_v15 = vld [vmem:[%s11898_s29 + $0x38] sm:$0xff] }
0x1683   : > { %v5723_v62 = vrot.slane %v5722_v47, 1  ;;  %v5733_v53 = vrot.slane %v5732_v10, 2  ;;  %v5756_v55 = vmul.f32 %v11533_v26, %v11533_v26  ;;  %v7951_v33 = vpack.c.bf16 %v6069_v14, %v6068_v58  ;;  %v6054_v39 = vld [vmem:[%s11898_s29 + $0x30] sm:$0xff]  ;;  %v6072_v16 = vld [vmem:[%s11898_s29 + $0xc0] sm:$0xff] }
0x1684   : > { %v5717_v32 = vrot.slane %v5716_v22, 1  ;;  %v5727_v44 = vrot.slane %v5726_v13, 2  ;;  %v5755_v60 = vmul.f32 %v11536_v36, %v11536_v36  ;;  %v7953_v40 = vpack.c.bf16 %v6053_v0, %v6052_v45 }
0x1685   : > { %v5724_v18 = vadd.f32 %v5723_v62, %v5722_v47  ;;  %v5734_v2 = vadd.f32 %v5733_v53, %v5732_v10  ;;  %v5770_v7 = vsel %vm846_vm8, %v5756_v55, 0.0  ;;  %v7955_v31 = vpack.c.bf16 %v6071_v25, %v6070_v12  ;;  %v6073_v47 = vld [vmem:[%s11898_s29 + $0xc8] sm:$0xff]  ;;  %v6074_v53 = vld [vmem:[%s11898_s29 + $0xd0] sm:$0xff]  ;;  %v6075_v55 = vld [vmem:[%s11898_s29 + $0xd8] sm:$0xff] }
0x1686   : > { %v5718_v19 = vadd.f32 %v5717_v32, %v5716_v22  ;;  %v5728_v24 = vadd.f32 %v5727_v44, %v5726_v13  ;;  %5771 = vadd.xlane.f32.xlu1 %v5770_v7  ;;  %v5767_v27 = vsel %vm846_vm8, %v5755_v60, 0.0  ;;  %v7957_v10 = vpack.c.bf16 %v6055_v15, %v6054_v39  ;;  %v6056_v13 = vld [vmem:[%s11898_s29 + $0x40] sm:$0xff]  ;;  %v6057_v62 = vld [vmem:[%s11898_s29 + $0x48] sm:$0xff]  ;;  %v6058_v60 = vld [vmem:[%s11898_s29 + $0x50] sm:$0xff] }
0x1687   : > { %v5742_v6 = vmul.f32 0.00390625, %v5724_v18  ;;  %v5735_v23 = vrot.slane %v5734_v2, 1  ;;  %5768 = vadd.xlane.f32.xlu0 %v5767_v27  ;;  %v7959_v22 = vpack.c.bf16 %v6073_v47, %v6072_v16  ;;  %v7961_v32 = vpack.c.bf16 %v6057_v62, %v6056_v13  ;;  %v6059_v18 = vld [vmem:[%s11898_s29 + $0x58] sm:$0xff] }
0x1688   : > { %v5741_v56 = vmul.f32 0.00390625, %v5718_v19  ;;  %v5729_v49 = vrot.slane %v5728_v24, 1  ;;  %v7963_v44 = vpack.c.bf16 %v6075_v55, %v6074_v53 }
0x1689   : > { %v5736_v21 = vadd.f32 %v5735_v23, %v5734_v2  ;;  %v11545_v11 = vsub.f32 %v11504_v61, %v5742_v6  ;;  %v7965_v2 = vpack.c.bf16 %v6059_v18, %v6058_v60 }
0x168a   : > { %v5730_v51 = vadd.f32 %v5729_v49, %v5728_v24  ;;  %v11548_v29 = vsub.f32 %v11506_v52, %v5741_v56 }
0x168b   : > { %v5744_v30 = vmul.f32 0.00390625, %v5736_v21  ;;  %v5758_v38 = vmul.f32 %v11545_v11, %v11545_v11 }
0x168c   : > { %v5743_v50 = vmul.f32 0.00390625, %v5730_v51  ;;  %v5757_v48 = vmul.f32 %v11548_v29, %v11548_v29 }
0x168d   : > { %v5776_v54 = vsel %vm846_vm8, %v5758_v38, 0.0  ;;  %v11556_v8 = vsub.f32 %v11512_v37, %v5744_v30  ;;  %v6064_v37 = vld [vmem:[%s11898_s29 + $0x80] sm:$0xff] }
0x168e   : > { %5777 = vadd.xlane.f32.xlu1 %v5776_v54  ;;  %v5773_v61 = vsel %vm846_vm8, %v5757_v48, 0.0  ;;  %v11560_v20 = vsub.f32 %v11514_v41, %v5743_v50  ;;  %v6065_v41 = vld [vmem:[%s11898_s29 + $0x88] sm:$0xff] }
0x168f   : > { %5774 = vadd.xlane.f32.xlu0 %v5773_v61  ;;  %v5760_v52 = vmul.f32 %v11556_v8, %v11556_v8  ;;  %v7943_v46 = vpack.c.bf16 %v6065_v41, %v6064_v37 }
0x1690   : > { %v5759_v43 = vmul.f32 %v11560_v20, %v11560_v20 }
0x1691   : > { %v5782_v1 = vsel %vm846_vm8, %v5760_v52, 0.0  ;;  %7944 = vmatprep.subr.bf16.mxu1 %v7943_v46 }
0x1692   : > { %5783 = vadd.xlane.f32.xlu1 %v5782_v1  ;;  %v5779_v28 = vsel %vm846_vm8, %v5759_v43, 0.0  ;;  %7946 = vmatpush3.bf16.msra.mxu1 %v7945_v42 }
0x1693   : > { %5780 = vadd.xlane.f32.xlu0 %v5779_v28  ;;  %7948 = vmatprep.subr.bf16.mxu1 %v7947_v35 }
0x1696   : > { %7950 = vmatpush3.bf16.msra.mxu1 %v7949_v3 }
0x1697   : > { %7952 = vmatprep.subr.bf16.mxu1 %v7951_v33 }
0x169a   : > { %7954 = vmatpush3.bf16.msra.mxu1 %v7953_v40 }
0x169b   : > { %7956 = vmatprep.subr.bf16.mxu1 %v7955_v31 }
0x169e   : > { %7958 = vmatpush3.bf16.msra.mxu1 %v7957_v10 }
0x169f   : > { %7960 = vmatprep.subr.bf16.mxu1 %v7959_v22 }
0x16a2   : > { %7962 = vmatpush3.bf16.msra.mxu1 %v7961_v32 }
0x16a3   : > { %7964 = vmatprep.subr.bf16.mxu1 %v7963_v44 }
0x16a6   : > { %7966 = vmatpush3.bf16.msra.mxu1 %v7965_v2 }
0x170d   : > { %v5766_v7 = vpop.xlane.xlu1 %5765 }
0x170e   : > { %v5791_v19 = vrot.slane %v5766_v7, 4  ;;  %v5763_v24 = vpop.xlane.xlu0 %5762 }
0x170f   : > { %v5785_v27 = vrot.slane %v5763_v24, 4 }
0x1710   : > { %v5792_v6 = vadd.f32 %v5791_v19, %v5766_v7 }
0x1711   : > { %v5786_v23 = vadd.f32 %v5785_v27, %v5763_v24 }
0x1712   : > { %v5793_v56 = vrot.slane %v5792_v6, 2 }
0x1713   : > { %v5787_v49 = vrot.slane %v5786_v23, 2  ;;  %v5772_v21 = vpop.xlane.xlu1 %5771 }
0x1714   : > { %v5794_v51 = vadd.f32 %v5793_v56, %v5792_v6  ;;  %v5803_v30 = vrot.slane %v5772_v21, 4  ;;  %v5769_v38 = vpop.xlane.xlu0 %5768 }
0x1715   : > { %v5788_v50 = vadd.f32 %v5787_v49, %v5786_v23  ;;  %v5797_v48 = vrot.slane %v5769_v38, 4 }
0x1716   : > { %v5795_v54 = vrot.slane %v5794_v51, 1  ;;  %v5804_v61 = vadd.f32 %v5803_v30, %v5772_v21 }
0x1717   : > { %v5789_v52 = vrot.slane %v5788_v50, 1  ;;  %v5798_v43 = vadd.f32 %v5797_v48, %v5769_v38 }
0x1718   : > { %v5796_v1 = vadd.f32 %v5795_v54, %v5794_v51  ;;  %v5805_v28 = vrot.slane %v5804_v61, 2 }
0x1719   : > { %v5790_v37 = vadd.f32 %v5789_v52, %v5788_v50  ;;  %v5799_v41 = vrot.slane %v5798_v43, 2 }
0x171a   : > { %v5834_v5 = vmul.f32 0.00390625, %v5796_v1  ;;  %v5806_v46 = vadd.f32 %v5805_v28, %v5804_v61 }
0x171b   : > { %v5833_v9 = vmul.f32 0.00390625, %v5790_v37  ;;  %v5800_v4 = vadd.f32 %v5799_v41, %v5798_v43  ;;  %v5778_v57 = vpop.xlane.xlu1 %5777 }
0x171c   : > { %v5807_v42 = vrot.slane %v5806_v46, 1  ;;  %v5815_v35 = vrot.slane %v5778_v57, 4  ;;  %v5775_v34 = vpop.xlane.xlu0 %5774  ;;  %v5842_v14 = vadd.f32 1e-05, %v5834_v5  ;;  %v5662_v5 = vld [vmem:[#allocation13 + $0x8] sm:$0xff] }
0x171d   : > { %v5801_v59 = vrot.slane %v5800_v4, 1  ;;  %v5809_v58 = vrot.slane %v5775_v34, 4  ;;  %v5841_v45 = vadd.f32 1e-05, %v5833_v9 }
0x171e   : > { %v5808_v3 = vadd.f32 %v5807_v42, %v5806_v46  ;;  %v5816_v33 = vadd.f32 %v5815_v35, %v5778_v57  ;;  %8770 = vrsqrt.f32 %v5842_v14 }
0x171f   : > { %v5802_v0 = vadd.f32 %v5801_v59, %v5800_v4  ;;  %v5810_v12 = vadd.f32 %v5809_v58, %v5775_v34  ;;  %v5784_v25 = vpop.xlane.xlu1 %5783  ;;  %8772 = vrsqrt.f32 %v5841_v45  ;;  %v9130_v4 = vmov 1983009808   ;;  %v5664_v58 = vld [vmem:[#allocation14 + $0x8] sm:$0xff] }
0x1720   : > { %v5836_v40 = vmul.f32 0.00390625, %v5808_v3  ;;  %v5817_v31 = vrot.slane %v5816_v33, 2  ;;  %v5827_v39 = vrot.slane %v5784_v25, 4  ;;  %v5781_v15 = vpop.xlane.xlu0 %5780  ;;  %v5884_v57 = vunpack.c.l.s4 %v9130_v4  ;;  %v6063_v4 = vld [vmem:[%s11898_s29 + $0x78] sm:$0xff] }
0x1721   : > { %v5835_v16 = vmul.f32 0.00390625, %v5802_v0  ;;  %v5811_v47 = vrot.slane %v5810_v12, 2  ;;  %v5821_v10 = vrot.slane %v5781_v15, 4 }
0x1722   : > { %v5844_v22 = vadd.f32 1e-05, %v5836_v40  ;;  %v5818_v13 = vadd.f32 %v5817_v31, %v5816_v33  ;;  %v5828_v62 = vadd.f32 %v5827_v39, %v5784_v25  ;;  %v5885_v14 = vunpack.c.0.s8 %v5884_v57 }
0x1723   : > { %v5843_v53 = vadd.f32 1e-05, %v5835_v16  ;;  %v5812_v55 = vadd.f32 %v5811_v47, %v5810_v12  ;;  %v5822_v32 = vadd.f32 %v5821_v10, %v5781_v15  ;;  %v11899_v12 = vld [vmem:[#allocation39_spill] sm:$0xff]  ;;  %v9131_v31 = vmov 1934713408  }
0x1724   : > { %8774 = vrsqrt.f32 %v5844_v22  ;;  %v5819_v44 = vrot.slane %v5818_v13, 1  ;;  %v5829_v60 = vrot.slane %v5828_v62, 2  ;;  %v5888_v25 = vsub.s32 %v5885_v14, %v11899_v12 }
0x1725   : > { %8776 = vrsqrt.f32 %v5843_v53  ;;  %v5813_v18 = vrot.slane %v5812_v55, 1  ;;  %v5823_v2 = vrot.slane %v5822_v32, 2  ;;  %v5948_v39 = vunpack.c.l.s4 %v9131_v31 }
0x1726   : > { %v5820_v7 = vadd.f32 %v5819_v44, %v5818_v13  ;;  %v5830_v19 = vadd.f32 %v5829_v60, %v5828_v62 }
0x1727   : > { %v5814_v24 = vadd.f32 %v5813_v18, %v5812_v55  ;;  %v5824_v27 = vadd.f32 %v5823_v2, %v5822_v32 }
0x1728   : > { %v5838_v6 = vmul.f32 0.00390625, %v5820_v7  ;;  %v5831_v23 = vrot.slane %v5830_v19, 1  ;;  %v8771_v50 = vpop.eup %8770 }
0x1729   : > { %v5837_v56 = vmul.f32 0.00390625, %v5814_v24  ;;  %v5825_v49 = vrot.slane %v5824_v27, 1  ;;  %v8773_v54 = vpop.eup %8772  ;;  %v5858_v28 = vmul.f32 %v8771_v50, %v11521_v17  ;;  %v6076_v24 = vld [vmem:[%s11898_s29 + $0xe0] sm:$0xff] }
0x172a   : > { %v5846_v21 = vadd.f32 1e-05, %v5838_v6  ;;  %v5832_v51 = vadd.f32 %v5831_v23, %v5830_v19  ;;  %v5857_v46 = vmul.f32 %v8773_v54, %v11524_v63  ;;  %v6060_v23 = vld [vmem:[%s11898_s29 + $0x60] sm:$0xff] }
0x172b   : > { %v5845_v30 = vadd.f32 1e-05, %v5837_v56  ;;  %v5826_v38 = vadd.f32 %v5825_v49, %v5824_v27  ;;  %v5866_v34 = vmul.f32 %v5858_v28, %v5662_v5  ;;  %v6061_v56 = vld [vmem:[%s11898_s29 + $0x68] sm:$0xff]  ;;  %v6078_v28 = vld [vmem:[%s11898_s29 + $0xf0] sm:$0xff] }
0x172c   : > { %8778 = vrsqrt.f32 %v5846_v21  ;;  %v5840_v48 = vmul.f32 0.00390625, %v5832_v51  ;;  %v5865_v59 = vmul.f32 %v5857_v46, %v5662_v5 }
0x172d   : > { %8780 = vrsqrt.f32 %v5845_v30  ;;  %v5839_v61 = vmul.f32 0.00390625, %v5826_v38  ;;  %v5874_v0 = vadd.f32 %v5866_v34, %v5664_v58  ;;  %v7969_v30 = vpack.c.bf16 %v6061_v56, %v6060_v23 }
0x172e   : > { %v8775_v52 = vpop.eup %8774  ;;  %v5848_v43 = vadd.f32 1e-05, %v5840_v48 }
0x172f   : > { %v8777_v1 = vpop.eup %8776  ;;  %v5860_v37 = vmul.f32 %v8775_v52, %v11533_v26  ;;  %v5847_v41 = vadd.f32 1e-05, %v5839_v61 }
0x1730   : > { %v5859_v9 = vmul.f32 %v8777_v1, %v11536_v36  ;;  %8782 = vrsqrt.f32 %v5848_v43  ;;  %v5873_v36 = vadd.f32 %v5865_v59, %v5664_v58 }
0x1731   : > { %v5868_v42 = vmul.f32 %v5860_v37, %v5662_v5  ;;  %8784 = vrsqrt.f32 %v5847_v41  ;;  %v6079_v37 = vld [vmem:[%s11898_s29 + $0xf8] sm:$0xff] }
0x1732   : > { %v5867_v35 = vmul.f32 %v5859_v9, %v5662_v5  ;;  %v7971_v46 = vpack.c.bf16 %v6079_v37, %v6078_v28  ;;  %v6062_v9 = vld [vmem:[%s11898_s29 + $0x70] sm:$0xff] }
0x1733   : > { %v5876_v3 = vadd.f32 %v5868_v42, %v5664_v58  ;;  %v7973_v57 = vpack.c.bf16 %v6063_v4, %v6062_v9 }
0x1734   : > { %v5875_v33 = vadd.f32 %v5867_v35, %v5664_v58 }
0x1735   : > { %v5897_v40 = vcombine.low %v5874_v0, %v5876_v3  ;;  %v5898_v10 = vcombine.high %v5874_v0, %v5876_v3 }
0x1736   : > { %v8779_v17 = vpop.eup %8778  ;;  %v5881_v16 = vcombine.low %v5873_v36, %v5875_v33  ;;  %v5882_v47 = vcombine.high %v5873_v36, %v5875_v33 }
0x1737   : > { %v8781_v26 = vpop.eup %8780  ;;  %v5862_v45 = vmul.f32 %v8779_v17, %v11545_v11  ;;  %v5905_v32 = vrot.slane %v5897_v40, %v5888_v25  ;;  %v5912_v2 = vrot.slane %v5898_v10, %v5888_v25 }
0x1738   : > { %v5861_v63 = vmul.f32 %v8781_v26, %v11548_v29  ;;  %v5949_v29 = vunpack.c.0.s8 %v5948_v39  ;;  %v5889_v60 = vrot.slane %v5881_v16, %v5888_v25  ;;  %v5896_v18 = vrot.slane %v5882_v47, %v5888_v25 }
0x1739   : > { %v5870_v13 = vmul.f32 %v5862_v45, %v5662_v5 }
0x173a   : > { %v8783_v15 = vpop.eup %8782  ;;  %v5869_v53 = vmul.f32 %v5861_v63, %v5662_v5  ;;  %v5952_v51 = vsub.s32 %v5949_v29, %v11899_v12  ;;  %v5946_v48 = vcombine.high %v5889_v60, %v5905_v32  ;;  %v5962_v54 = vcombine.high %v5896_v18, %v5912_v2 }
0x173b   : > { %v8785_v22 = vpop.eup %8784  ;;  %v5864_v62 = vmul.f32 %v8783_v15, %v11556_v8  ;;  %v5878_v7 = vadd.f32 %v5870_v13, %v5664_v58  ;;  %v6077_v8 = vld [vmem:[%s11898_s29 + $0xe8] sm:$0xff]  ;;  %v5945_v43 = vcombine.low %v5889_v60, %v5905_v32  ;;  %v5961_v1 = vcombine.low %v5896_v18, %v5912_v2 }
0x173c   : > { %v5863_v11 = vmul.f32 %v8785_v22, %v11560_v20  ;;  %v5877_v27 = vadd.f32 %v5869_v53, %v5664_v58  ;;  %v7967_v20 = vpack.c.bf16 %v6077_v8, %v6076_v24  ;;  %v5976_v14 = vrot.slane %v5962_v54, %v5952_v51 }
0x173d   : > { %v5872_v55 = vmul.f32 %v5864_v62, %v5662_v5  ;;  %v5953_v3 = vrot.slane %v5945_v43, %v5952_v51  ;;  %v5969_v17 = vrot.slane %v5961_v1, %v5952_v51 }
0x173e   : > { %v5871_v44 = vmul.f32 %v5863_v11, %v5662_v5  ;;  %7968 = vmatprep.subr.bf16.mxu1 %v7967_v20 }
0x173f   : > { %v5880_v19 = vadd.f32 %v5872_v55, %v5664_v58  ;;  %7970 = vmatpush3.bf16.msra.mxu1 %v7969_v30 }
0x1740   : > { %v5879_v6 = vadd.f32 %v5871_v44, %v5664_v58  ;;  %7972 = vmatprep.subr.bf16.mxu1 %v7971_v46  ;;  %v5960_v58 = vrot.slane %v5946_v48, %v5952_v51 }
0x1741   : > { %v5929_v49 = vcombine.low %v5878_v7, %v5880_v19  ;;  %v5930_v21 = vcombine.high %v5878_v7, %v5880_v19 }
0x1742   : > { %v5913_v38 = vcombine.low %v5877_v27, %v5879_v6  ;;  %v5914_v50 = vcombine.high %v5877_v27, %v5879_v6  ;;  %v6603_v27 = vld [vmem:[%s11901_s19] ss:$0 sm:$0xff] }
0x1743   : > { %v5937_v61 = vrot.slane %v5929_v49, %v5888_v25  ;;  %v5944_v52 = vrot.slane %v5930_v21, %v5888_v25  ;;  %7974 = vmatpush3.bf16.msra.mxu1 %v7973_v57 }
0x1744   : > { %v5921_v41 = vrot.slane %v5913_v38, %v5888_v25  ;;  %v5928_v5 = vrot.slane %v5914_v50, %v5888_v25 }
0x1746   : > { %v5978_v42 = vcombine.high %v5921_v41, %v5937_v61  ;;  %v5994_v35 = vcombine.high %v5928_v5, %v5944_v52  ;;  %v5977_v34 = vcombine.low %v5921_v41, %v5937_v61  ;;  %v5993_v59 = vcombine.low %v5928_v5, %v5944_v52 }
0x1748   : > { %v5992_v33 = vrot.slane %v5978_v42, %v5952_v51  ;;  %v6008_v26 = vrot.slane %v5994_v35, %v5952_v51  ;;  %v5985_v45 = vrot.slane %v5977_v34, %v5952_v51  ;;  %v6001_v0 = vrot.slane %v5993_v59, %v5952_v51 }
0x174a   : > { %v6011_v63 = vcombine.low %v5960_v58, %v5992_v33  ;;  %v6015_v36 = vcombine.low %v5976_v14, %v6008_v26  ;;  %v6010_v12 = vcombine.high %v5953_v3, %v5985_v45  ;;  %v6014_v25 = vcombine.high %v5969_v17, %v6001_v0 }
0x174b   : > { %v6009_v40 = vcombine.low %v5953_v3, %v5985_v45  ;;  %v6013_v31 = vcombine.low %v5969_v17, %v6001_v0  ;;  %v6012_v16 = vcombine.high %v5960_v58, %v5992_v33  ;;  %v6016_v47 = vcombine.high %v5976_v14, %v6008_v26 }
0x174c   : > { %v8456_v39 = vpack.i.bf16 %v6011_v63, %v6015_v36  ;;  %v8451_v15 = vpack.i.bf16 %v6010_v12, %v6014_v25 }
0x174d   : > { %v8461_v10 = vpack.i.bf16 %v6012_v16, %v6016_v47 }
0x174e   : > { %8457 = vrot.lane.b32.xlu1 %v8456_v39, %s9127_s23  ;;  %8452 = vrot.lane.b32.xlu0 %v8451_v15, %s9126_s21 }
0x1752   : > { %8462 = vrot.lane.b32.xlu1 %v8461_v10, %s9122_s26  ;;  %s11900_s26 = sld [smem:[#allocation24_spill]] }
0x1758   : > { %s630_s17 = sand.u32 1, %s11900_s26   ;;  %s9026_s26 = sshll.u32 %s9132_s25, 4  ;;  %s9027_s26 = int_to_ptr.vmem [resolvable:$false] %s9026_s26 }
0x1759   : > { %s6339_s0 = sshll.u32 %s630_s17, 3  ;;  %s6168_s22 = scalar_lea.sflag [#allocation4], %s630_s17 }
0x175a   : > { %s632_s14 = scalar_lea.vmem [#allocation16], %s6339_s0  ;;  %s9028_s21 = scalar_lea.vmem %s9027_s26, 256 }
0x175b   : > { %s6181_s24 = sshll.u32 %s632_s14, 4  ;;  %s11691_s24 = int_to_ptr.vmem [resolvable:$true] %s6181_s24 }
0x175c   : > { %s9022_s18 = scalar_lea.vmem %s11691_s24, 128  ;;  %p9029_p6 = scmp.lt.s32.totalorder %s11691_s24, %s9027_s26 }
0x175d   : > { %p9023_p8 = scmp.ne.s32.totalorder %s11691_s24, %s9022_s18  ;;  %p9030_p9 = scmp.lt.s32.totalorder %s9028_s21, %s9022_s18 }
0x175f   : > { %p9024_p5 = pnand %p9023_p8, %p11904_p11  ;;  %p9031_p10 = por %p9030_p9, %p9029_p6 }
0x1761   : > { %p9025_p0 = pneg %p9024_p5 }
0x1763   : > { %p9032_p13 = pnand %p9031_p10, %p9025_p0 }
0x17c0   : > { %v8458_v22 = vpop.permute.xlu1 %8457  ;;  %v8453_v13 = vpop.permute.xlu0 %8452 }
0x17c1   : > { %v8455_v62 = vunpack.i.h.bf16 %v8453_v13  ;;  %v8454_v53 = vunpack.i.l.bf16 %v8453_v13  ;;  %v8460_v11 = vunpack.i.h.bf16 %v8458_v22  ;;  %v8459_v55 = vunpack.i.l.bf16 %v8458_v22 }
0x17c3   : > { %v6041_v32 = vsel %vm846_vm8, %v6009_v40, %v8455_v62  ;;  %v6045_v29 = vsel %vm846_vm8, %v6013_v31, %v8454_v53 }
0x17c4   : > { %v8463_v44 = vpop.permute.xlu1 %8462  ;;  %v6046_v2 = vsel %vm1146_vm11, %v6045_v29, %v8459_v55  ;;  %v6042_v7 = vsel %vm1146_vm11, %v6041_v32, %v8460_v11 }
0x17c5   : > { %v8465_v60 = vunpack.i.h.bf16 %v8463_v44  ;;  %v8464_v18 = vunpack.i.l.bf16 %v8463_v44 }
0x17c7   : > { %v6047_v19 = vsel %vm6043_vm12, %v6046_v2, %v8464_v18  ;;  %v6044_v24 = vsel %vm6043_vm12, %v6042_v7, %v8465_v60 }
0x17c8   : > { %6151 = vmatprep.mubr.f32.mxu1 %v6047_v19 }
0x17c9   : > { %6152 = vmatmul.mubr.f32.vlgmr.msra.gmra.mrb[64].mxu1 %v6044_v24 }
0x189c   : > { %v6968_v8 = vpop.f32.mrb[64].mxu1 }
0x189d   : > { %v6969_v6 = vpop.f32.mrb[65].mxu1 }
0x189e   : > { %v6970_v20 = vadd.f32 %v6969_v6, %v6968_v8 }
0x18a0   : > { %v6154_v23 = vadd.f32 %v6970_v20, %v6603_v27 }
0x18a2   : > { %6157 = vmax.xlane.f32.xlu0 %v6154_v23 }
0x192f   : > { %v6158_v56 = vpop.xlane.xlu0 %6157 }
0x1930   : > { %v6159_v49 = vsub.f32 %v6154_v23, %v6158_v56 }
0x1932   : > { %v6160_v21 = vmul.f32 1.442695, %v6159_v49 }
0x1934   : > { %8786 = vpow2.f32 %v6160_v21 }
0x193e   : > { %v8787_v51 = vpop.eup %8786 }
0x193f   : > { %6162 = vadd.xlane.f32.xlu1 %v8787_v51 }
0x19cc   : > { %v6163_v30 = vpop.xlane.xlu1 %6162 }
0x19cd   : > { %8788 = vrcp.f32 %v6163_v30 }
0x19d7   : > { %v8789_v38 = vpop.eup %8788 }
0x19d8   : > { %v6165_v50 = vmul.f32 %v8789_v38, %v8787_v51 }
0x19da   : > { %6166 = vst [vmem:[%s632_s14] sm:$0xff] %v6165_v50 }
0x19db   : > { %9035 = shalt.err (!%p9032_p13)
}
0x19dc   : > { %s9036_s23 = scalar_lea.hbm %s11689_s16, 128  ;;  %s9040_s0 = scalar_lea.hbm %s11903_s1, 256 }
0x19dd   : > { %p9037_p12 = scmp.ne.s32.totalorder %s11689_s16, %s9036_s23  ;;  %p9041_p3 = scmp.lt.u32.totalorder %s11689_s16, %s11903_s1 }
0x19de   : > { %p9042_p4 = scmp.lt.u32.totalorder %s9040_s0, %s9036_s23  ;;  %p9044_p8 = scmp.lt.u32.totalorder %s9036_s23, %s11689_s16 }
0x19df   : > { %p9038_p1 = pnand %p9037_p12, %p11904_p11 }
0x19e0   : > { %p9043_p7 = por %p9042_p4, %p9041_p3 }
0x19e1   : > { %p9039_p2 = pneg %p9038_p1 }
0x19e2   : > { %p9045_p5 = por %p9044_p8, %p9043_p7 }
0x19e4   : > { %p9046_p0 = pnand %p9045_p5, %p9039_p2 }
0x19e6   : > { %9049 = shalt.err (!%p9046_p0)
}
0x19e7   : > { %8063 = dma.vmem_to_hbm [thread:$0]  (%p11904_p11), %s11691_s24, 128, %s11689_s16, %s6168_s22  }
0x19e8 PF: > { %s11905_s27 = sld [smem:[#allocation26_spill]]  ;;  %s11906_s20 = sld [smem:[#allocation23_spill]] }
0x19e9   : > { %s11907_s18 = sld [smem:[#allocation30_spill]] }
0x19ee   : > { %p8110_p6 = scmp.ge.s32.totalorder %s11905_s27, 2  ;;  %s6193_s25 = sand.u32 1, %s11906_s20  }
0x19ef   : > { %p11908_p9 = scmp.ne.s32.totalorder %s11907_s18, 0  ;;  %s6194_s26 = scalar_lea.sflag [#allocation4], %s6193_s25 }
0x19f1   : > { %p8091_p10 = pnand %p8110_p6, %p11908_p9 }
0x19f3   : > { %9087 = dma.done.wait (!%p8091_p10), %s6194_s26, 128  }
0x19f4   : > { %9089 = vsyncadd (!%p8091_p10), %s6194_s26, 4294967168  ;;  %s11909_s24 = sld [smem:[#allocation27_spill]]  ;;  %s11910_s21 = sld [smem:[#allocation24_spill]] }
0x19f5   : > { %s11911_s22 = sld [smem:[#allocation25_spill]]  ;;  %s11912_s23 = sld [smem:[#allocation28_spill]] }
0x19fa   : > { %p31_p13 = scmp.ge.s32.totalorder %s11909_s24, 4  }
0x19fc   :  { %33 = sbr.rel (!%p31_p13) target bundleno = 14 (0xe), region = 162 }
0x1a03   :  { %6199 = vsyncpa [#allocation3], 1 }
0x1a04   :  { %6201 = vsyncpa [#allocation3 + $0x1], 1 }
0x1a05   :  { %6202 = vsyncpa [#allocation6], 1 }
0x1a06   :  { %6203 = vsyncpa [#allocation9], 1 }
0x1a07   :  { %6204 = vsyncpa [#allocation12], 1 }
0x1a08   :  { %6205 = vsyncpa [#allocation15], 1 }
0x1a09   :  { %6206 = vsyncpa [#allocation4], 1 }
0x1a0a   :  { %6208 = vsyncpa [#allocation4 + $0x1], 1 }

</bundles_post_ra>
